<compile_context>
chip_gen: v6e
topology: v6e:2x2x1
jax: 0.10.0
libtpu: 0.0.40
codegen_flags: <defaults>
</compile_context>

<pallas_src>
import jax
import jax.numpy as jnp
from jax.experimental import pallas as pl
from jax.experimental.pallas import tpu as pltpu

CONDITION_SIZE = 7
IMG_SIZE = 56 * 56
IN_FEATURES = IMG_SIZE + CONDITION_SIZE      # 3143
IN_FEATURES_PAD = 3200                       # 25 * 128 (lane aligned)
H1, H2, H3 = 1024, 512, 256
OUT_FEATURES = 1
OUT_LANES = 128                              # lane-dense output slab width
TK = 640                                     # layer-1 K tile (3200 / 5)


def _leaky_relu(x, negative_slope=0.2):
    return jnp.where(x > 0, x, negative_slope * x)


def _round_up(x, m):
    return (x + m - 1) // m * m


def discriminator_kernel(x_ref,
                         w1_ref, b1_ref,
                         w2_ref, b2_ref,
                         w3_ref, b3_ref,
                         w4_ref, b4_ref,
                         o_ref, acc_ref):
    k = pl.program_id(1)

    @pl.when(k == 0)
    def _():
        acc_ref[...] = jnp.zeros_like(acc_ref)

    # Layer-1 partial: [bm, tk](bf16) @ [tk, 1024](bf16) -> f32 accumulator.
    acc_ref[...] += jnp.dot(x_ref[...], w1_ref[...],
                            preferred_element_type=jnp.float32)

    @pl.when(k == pl.num_programs(1) - 1)
    def _():
        # Layer 1 epilogue.
        h = _leaky_relu(acc_ref[...] + b1_ref[...])
        # Layer 2: [bm,1024] @ [1024,512].
        h = _leaky_relu(
            jnp.dot(h.astype(w2_ref.dtype), w2_ref[...],
                    preferred_element_type=jnp.float32) + b2_ref[...])
        # Layer 3: [bm,512] @ [512,256].
        h = _leaky_relu(
            jnp.dot(h.astype(w3_ref.dtype), w3_ref[...],
                    preferred_element_type=jnp.float32) + b3_ref[...])
        # Layer 4 (N=1): VPU multiply + lane reduction instead of an MXU pass.
        logits = jnp.sum(h * w4_ref[...].astype(jnp.float32), axis=-1,
                         keepdims=True) + b4_ref[...]
        sig = jax.nn.sigmoid(logits)
        # Lane-dense store: replicate across 128 lanes; col 0 sliced outside.
        o_ref[...] = jnp.broadcast_to(sig, o_ref.shape).astype(o_ref.dtype)


@jax.jit
def discriminator_forward(x, params):
    """x: [B, 3143] float32. params: dict (bf16 weights, f32 biases)."""
    B = x.shape[0]
    if B <= 128:
        bm = _round_up(B, 8)
    else:
        bm = 128
    b_pad = _round_up(B, bm)

    # Pad ragged feature dim (3143 -> 3200) and batch; cast to bf16 for the
    # MXU. x is tiny next to the weight stream, so this extra pass is
    # negligible even at large batch.
    # TODO(synk): for very large batches, DMA raw x and zero the 57-col tail
    # in-kernel to skip this wrapper-side pad pass.
    x_pad = jnp.pad(x, ((0, b_pad - B), (0, IN_FEATURES_PAD - IN_FEATURES)))
    x_pad = x_pad.astype(jnp.bfloat16)

    nb = b_pad // bm
    nk = IN_FEATURES_PAD // TK

    const = lambda b, k: (0, 0)
    grid_spec = pltpu.PrefetchScalarGridSpec(
        num_scalar_prefetch=0,
        grid=(nb, nk),
        in_specs=[
            pl.BlockSpec((bm, TK), lambda b, k: (b, k)),     # x       (streamed over K)
            pl.BlockSpec((TK, H1), lambda b, k: (k, 0)),     # w1      (streamed over K)
            pl.BlockSpec((1, H1), const),                    # b1      (resident)
            pl.BlockSpec((H1, H2), const),                   # w2      (resident)
            pl.BlockSpec((1, H2), const),                    # b2
            pl.BlockSpec((H2, H3), const),                   # w3
            pl.BlockSpec((1, H3), const),                    # b3
            pl.BlockSpec((1, H3), const),                    # w4 row
            pl.BlockSpec((1, 1), const),                     # b4
        ],
        out_specs=pl.BlockSpec((bm, OUT_LANES), lambda b, k: (b, 0)),
        scratch_shapes=[pltpu.VMEM((bm, H1), jnp.float32)],  # layer-1 acc
    )

    out = pl.pallas_call(
        discriminator_kernel,
        out_shape=jax.ShapeDtypeStruct((b_pad, OUT_LANES), jnp.float32),
        grid_spec=grid_spec,
        compiler_params=pltpu.CompilerParams(
            dimension_semantics=("parallel", "arbitrary"),
            vmem_limit_bytes=32 * 1024 * 1024),
    )(x_pad,
      params["w1"], params["b1"],
      params["w2"], params["b2"],
      params["w3"], params["b3"],
      params["w4"], params["b4"])

    return out[:B, :OUT_FEATURES]


def init_params(key):
    """Deterministic synthetic weights (PyTorch-Linear-like uniform init).

    Weights are stored in bf16 ([F_in, F_out]; w1 zero-padded to 3200 rows;
    w4 kept as a [1, 256] row), biases in f32.
    """
    def uniform(k, shape, fan_in):
        bound = 1.0 / jnp.sqrt(fan_in)
        return jax.random.uniform(k, shape, jnp.float32,
                                  minval=-bound, maxval=bound)

    k1w, k1b, k2w, k2b, k3w, k3b, k4w, k4b = jax.random.split(key, 8)
    w1 = uniform(k1w, (IN_FEATURES, H1), IN_FEATURES)
    w1 = jnp.pad(w1, ((0, IN_FEATURES_PAD - IN_FEATURES), (0, 0)))
    return dict(
        w1=w1.astype(jnp.bfloat16),
        b1=uniform(k1b, (1, H1), IN_FEATURES),
        w2=uniform(k2w, (H1, H2), H1).astype(jnp.bfloat16),
        b2=uniform(k2b, (1, H2), H1),
        w3=uniform(k3w, (H2, H3), H2).astype(jnp.bfloat16),
        b3=uniform(k3b, (1, H3), H2),
        w4=uniform(k4w, (1, H3), H3).astype(jnp.bfloat16),
        b4=uniform(k4b, (1, 1), H3),
    )


def reference_forward(x, params):
    """Plain-JAX reference mirroring the PyTorch forward (same bf16 weights,
    f32 accumulation), for a tight numerical check of the kernel."""
    x_pad = jnp.pad(x, ((0, 0), (0, IN_FEATURES_PAD - IN_FEATURES)))
    x_pad = x_pad.astype(jnp.bfloat16)
    h = _leaky_relu(jnp.dot(x_pad, params["w1"],
                            preferred_element_type=jnp.float32)
                    + params["b1"])
    h = _leaky_relu(jnp.dot(h.astype(jnp.bfloat16), params["w2"],
                            preferred_element_type=jnp.float32)
                    + params["b2"])
    h = _leaky_relu(jnp.dot(h.astype(jnp.bfloat16), params["w3"],
                            preferred_element_type=jnp.float32)
                    + params["b3"])
    logits = jnp.sum(h * params["w4"].astype(jnp.float32), axis=-1,
                     keepdims=True) + params["b4"]
    return jax.nn.sigmoid(logits)


if __name__ == "__main__":
    key = jax.random.PRNGKey(0)
    k_params, k_x = jax.random.split(key)

    params = init_params(k_params)
    batch = 8
    x = jax.random.normal(k_x, (batch, IN_FEATURES), jnp.float32)

    out = discriminator_forward(x, params)
    out = jax.block_until_ready(out)

    ref = reference_forward(x, params)
    assert out.shape == (batch, OUT_FEATURES), out.shape
    max_err = float(jnp.max(jnp.abs(out - ref)))
    assert jnp.allclose(out, ref, atol=1e-3, rtol=1e-3), max_err

    print("KERNEL_OK")
</pallas_src>

<mosaic_0001>
module attributes {stable_mosaic.version = 11 : i64} {
  func.func @discriminator_kernel(%arg0: i32, %arg1: i32, %arg2: memref<8x640xbf16, #tpu.memory_space<vmem>>, %arg3: memref<640x1024xbf16, #tpu.memory_space<vmem>>, %arg4: memref<1x1024xf32, #tpu.memory_space<vmem>>, %arg5: memref<1024x512xbf16, #tpu.memory_space<vmem>>, %arg6: memref<1x512xf32, #tpu.memory_space<vmem>>, %arg7: memref<512x256xbf16, #tpu.memory_space<vmem>>, %arg8: memref<1x256xf32, #tpu.memory_space<vmem>>, %arg9: memref<1x256xbf16, #tpu.memory_space<vmem>>, %arg10: memref<1x1xf32, #tpu.memory_space<vmem>>, %arg11: memref<8x128xf32, #tpu.memory_space<vmem>>, %arg12: memref<8x1024xf32, #tpu.memory_space<vmem>>) attributes {dimension_semantics = [#tpu.dimension_semantics<parallel>, #tpu.dimension_semantics<arbitrary>], iteration_bounds = array<i64: 1, 5>, scalar_prefetch = 0 : i64, scratch_operands = 1 : i64, tpu.core_type = #tpu.core_type<tc>, window_params = [{transform_indices = @transform_0, window_bounds = array<i64: 8, 640>}, {transform_indices = @transform_1, window_bounds = array<i64: 640, 1024>}, {pipeline_mode = #tpu.pipeline_mode<synchronous>, transform_indices = @transform_2, window_bounds = array<i64: 1, 1024>}, {pipeline_mode = #tpu.pipeline_mode<synchronous>, transform_indices = @transform_3, window_bounds = array<i64: 1024, 512>}, {pipeline_mode = #tpu.pipeline_mode<synchronous>, transform_indices = @transform_4, window_bounds = array<i64: 1, 512>}, {pipeline_mode = #tpu.pipeline_mode<synchronous>, transform_indices = @transform_5, window_bounds = array<i64: 512, 256>}, {pipeline_mode = #tpu.pipeline_mode<synchronous>, transform_indices = @transform_6, window_bounds = array<i64: 1, 256>}, {pipeline_mode = #tpu.pipeline_mode<synchronous>, transform_indices = @transform_7, window_bounds = array<i64: 1, 256>}, {pipeline_mode = #tpu.pipeline_mode<synchronous>, transform_indices = @transform_8, window_bounds = array<i64: 1, 1>}, {transform_indices = @transform_9, window_bounds = array<i64: 8, 128>}]} {
    %c0_i32 = arith.constant 0 : i32
    %0 = arith.cmpi eq, %arg1, %c0_i32 : i32
    %1 = arith.extui %0 : i1 to i32
    %c0_i32_0 = arith.constant 0 : i32
    %2 = arith.cmpi ne, %1, %c0_i32_0 : i32
    scf.if %2 {
      %cst_9 = arith.constant 0.000000e+00 : f32
      %12 = vector.broadcast %cst_9 : f32 to vector<8x1024xf32>
      %c0_10 = arith.constant 0 : index
      %c0_11 = arith.constant 0 : index
      %13 = vector.load %arg12[%c0_10, %c0_11] : memref<8x1024xf32, #tpu.memory_space<vmem>>, vector<8x1024xf32>
      tpu.vector_store %arg12[%c0_10, %c0_11], %12 {strides = array<i32>} : memref<8x1024xf32, #tpu.memory_space<vmem>>, vector<8x1024xf32>,
    } else {
    }
    %c0 = arith.constant 0 : index
    %c0_1 = arith.constant 0 : index
    %3 = vector.load %arg12[%c0, %c0_1] : memref<8x1024xf32, #tpu.memory_space<vmem>>, vector<8x1024xf32>
    %c0_2 = arith.constant 0 : index
    %c0_3 = arith.constant 0 : index
    %4 = vector.load %arg2[%c0_2, %c0_3] : memref<8x640xbf16, #tpu.memory_space<vmem>>, vector<8x640xbf16>
    %c0_4 = arith.constant 0 : index
    %c0_5 = arith.constant 0 : index
    %5 = vector.load %arg3[%c0_4, %c0_5] : memref<640x1024xbf16, #tpu.memory_space<vmem>>, vector<640x1024xbf16>
    %cst = arith.constant dense<0.000000e+00> : vector<8x1024xf32>
    %6 = tpu.matmul %4, %5, %cst {dimension_numbers = #tpu.dot_dimension_numbers<[1], [0], [0], [1], [0, 0, 1, 1], [], []>} : vector<8x640xbf16>, vector<640x1024xbf16>, vector<8x1024xf32> -> vector<8x1024xf32>
    %7 = arith.addf %3, %6 : vector<8x1024xf32>
    %c0_6 = arith.constant 0 : index
    %c0_7 = arith.constant 0 : index
    %8 = vector.load %arg12[%c0_6, %c0_7] : memref<8x1024xf32, #tpu.memory_space<vmem>>, vector<8x1024xf32>
    tpu.vector_store %arg12[%c0_6, %c0_7], %7 {strides = array<i32>} : memref<8x1024xf32, #tpu.memory_space<vmem>>, vector<8x1024xf32>,
    %c4_i32 = arith.constant 4 : i32
    %9 = arith.cmpi eq, %arg1, %c4_i32 : i32
    %10 = arith.extui %9 : i1 to i32
    %c0_i32_8 = arith.constant 0 : i32
    %11 = arith.cmpi ne, %10, %c0_i32_8 : i32
    scf.if %11 {
      %c0_9 = arith.constant 0 : index
      %c0_10 = arith.constant 0 : index
      %12 = vector.load %arg12[%c0_9, %c0_10] : memref<8x1024xf32, #tpu.memory_space<vmem>>, vector<8x1024xf32>
      %c0_11 = arith.constant 0 : index
      %c0_12 = arith.constant 0 : index
      %13 = vector.load %arg4[%c0_11, %c0_12] : memref<1x1024xf32, #tpu.memory_space<vmem>>, vector<1x1024xf32>
      %14 = vector.broadcast %13 : vector<1x1024xf32> to vector<8x1024xf32>
      %15 = arith.addf %12, %14 : vector<8x1024xf32>
      %cst_13 = arith.constant 0.000000e+00 : f32
      %16 = vector.broadcast %cst_13 : f32 to vector<8x1024xf32>
      %17 = arith.cmpf ogt, %15, %16 : vector<8x1024xf32>
      %cst_14 = arith.constant 2.000000e-01 : f32
      %18 = vector.broadcast %cst_14 : f32 to vector<8x1024xf32>
      %19 = arith.mulf %18, %15 : vector<8x1024xf32>
      %20 = arith.select %17, %15, %19 : vector<8x1024xi1>, vector<8x1024xf32>
      %21 = arith.truncf %20 : vector<8x1024xf32> to vector<8x1024xbf16>
      %c0_15 = arith.constant 0 : index
      %c0_16 = arith.constant 0 : index
      %22 = vector.load %arg5[%c0_15, %c0_16] : memref<1024x512xbf16, #tpu.memory_space<vmem>>, vector<1024x512xbf16>
      %cst_17 = arith.constant dense<0.000000e+00> : vector<8x512xf32>
      %23 = tpu.matmul %21, %22, %cst_17 {dimension_numbers = #tpu.dot_dimension_numbers<[1], [0], [0], [1], [0, 0, 1, 1], [], []>} : vector<8x1024xbf16>, vector<1024x512xbf16>, vector<8x512xf32> -> vector<8x512xf32>
      %c0_18 = arith.constant 0 : index
      %c0_19 = arith.constant 0 : index
      %24 = vector.load %arg6[%c0_18, %c0_19] : memref<1x512xf32, #tpu.memory_space<vmem>>, vector<1x512xf32>
      %25 = vector.broadcast %24 : vector<1x512xf32> to vector<8x512xf32>
      %26 = arith.addf %23, %25 : vector<8x512xf32>
      %cst_20 = arith.constant 0.000000e+00 : f32
      %27 = vector.broadcast %cst_20 : f32 to vector<8x512xf32>
      %28 = arith.cmpf ogt, %26, %27 : vector<8x512xf32>
      %cst_21 = arith.constant 2.000000e-01 : f32
      %29 = vector.broadcast %cst_21 : f32 to vector<8x512xf32>
      %30 = arith.mulf %29, %26 : vector<8x512xf32>
      %31 = arith.select %28, %26, %30 : vector<8x512xi1>, vector<8x512xf32>
      %32 = arith.truncf %31 : vector<8x512xf32> to vector<8x512xbf16>
      %c0_22 = arith.constant 0 : index
      %c0_23 = arith.constant 0 : index
      %33 = vector.load %arg7[%c0_22, %c0_23] : memref<512x256xbf16, #tpu.memory_space<vmem>>, vector<512x256xbf16>
      %cst_24 = arith.constant dense<0.000000e+00> : vector<8x256xf32>
      %34 = tpu.matmul %32, %33, %cst_24 {dimension_numbers = #tpu.dot_dimension_numbers<[1], [0], [0], [1], [0, 0, 1, 1], [], []>} : vector<8x512xbf16>, vector<512x256xbf16>, vector<8x256xf32> -> vector<8x256xf32>
      %c0_25 = arith.constant 0 : index
      %c0_26 = arith.constant 0 : index
      %35 = vector.load %arg8[%c0_25, %c0_26] : memref<1x256xf32, #tpu.memory_space<vmem>>, vector<1x256xf32>
      %36 = vector.broadcast %35 : vector<1x256xf32> to vector<8x256xf32>
      %37 = arith.addf %34, %36 : vector<8x256xf32>
      %cst_27 = arith.constant 0.000000e+00 : f32
      %38 = vector.broadcast %cst_27 : f32 to vector<8x256xf32>
      %39 = arith.cmpf ogt, %37, %38 : vector<8x256xf32>
      %cst_28 = arith.constant 2.000000e-01 : f32
      %40 = vector.broadcast %cst_28 : f32 to vector<8x256xf32>
      %41 = arith.mulf %40, %37 : vector<8x256xf32>
      %42 = arith.select %39, %37, %41 : vector<8x256xi1>, vector<8x256xf32>
      %c0_29 = arith.constant 0 : index
      %c0_30 = arith.constant 0 : index
      %43 = vector.load %arg9[%c0_29, %c0_30] : memref<1x256xbf16, #tpu.memory_space<vmem>>, vector<1x256xbf16>
      %44 = arith.extf %43 : vector<1x256xbf16> to vector<1x256xf32>
      %45 = vector.broadcast %44 : vector<1x256xf32> to vector<8x256xf32>
      %46 = arith.mulf %42, %45 : vector<8x256xf32>
      %cst_31 = arith.constant dense<0.000000e+00> : vector<8xf32>
      %47 = vector.multi_reduction <add>, %46, %cst_31 [1] : vector<8x256xf32> to vector<8xf32>
      %48 = vector.shape_cast %47 : vector<8xf32> to vector<8x1xf32>
      %c0_32 = arith.constant 0 : index
      %c0_33 = arith.constant 0 : index
      %49 = vector.load %arg10[%c0_32, %c0_33] : memref<1x1xf32, #tpu.memory_space<vmem>>, vector<1x1xf32>
      %50 = vector.broadcast %49 : vector<1x1xf32> to vector<8x1xf32>
      %51 = arith.addf %48, %50 : vector<8x1xf32>
      %52 = arith.negf %51 : vector<8x1xf32>
      %53 = math.exp %52 : vector<8x1xf32>
      %cst_34 = arith.constant 1.000000e+00 : f32
      %54 = vector.broadcast %cst_34 : f32 to vector<8x1xf32>
      %55 = arith.addf %54, %53 : vector<8x1xf32>
      %56 = arith.divf %54, %55 : vector<8x1xf32>
      %57 = vector.shape_cast %56 : vector<8x1xf32> to vector<8x1xf32>
      %58 = vector.broadcast %57 : vector<8x1xf32> to vector<8x128xf32>
      %c0_35 = arith.constant 0 : index
      %c0_36 = arith.constant 0 : index
      %59 = vector.load %arg11[%c0_35, %c0_36] : memref<8x128xf32, #tpu.memory_space<vmem>>, vector<8x128xf32>
      tpu.vector_store %arg11[%c0_35, %c0_36], %58 {strides = array<i32>} : memref<8x128xf32, #tpu.memory_space<vmem>>, vector<8x128xf32>,
    } else {
    }
    return
  }
  func.func @transform_0(%arg0: i32, %arg1: i32) -> (i32, i32) {
    %c0_i32 = arith.constant 0 : i32
    return %arg0, %arg1 : i32, i32
  }
  func.func @transform_1(%arg0: i32, %arg1: i32) -> (i32, i32) {
    %c0_i32 = arith.constant 0 : i32
    %c0_i32_0 = arith.constant 0 : i32
    return %arg1, %c0_i32 : i32, i32
  }
  func.func @transform_2(%arg0: i32, %arg1: i32) -> (i32, i32) {
    %c0_i32 = arith.constant 0 : i32
    %c0_i32_0 = arith.constant 0 : i32
    %c0_i32_1 = arith.constant 0 : i32
    return %c0_i32, %c0_i32_0 : i32, i32
  }
  func.func @transform_3(%arg0: i32, %arg1: i32) -> (i32, i32) {
    %c0_i32 = arith.constant 0 : i32
    %c0_i32_0 = arith.constant 0 : i32
    %c0_i32_1 = arith.constant 0 : i32
    return %c0_i32, %c0_i32_0 : i32, i32
  }
  func.func @transform_4(%arg0: i32, %arg1: i32) -> (i32, i32) {
    %c0_i32 = arith.constant 0 : i32
    %c0_i32_0 = arith.constant 0 : i32
    %c0_i32_1 = arith.constant 0 : i32
    return %c0_i32, %c0_i32_0 : i32, i32
  }
  func.func @transform_5(%arg0: i32, %arg1: i32) -> (i32, i32) {
    %c0_i32 = arith.constant 0 : i32
    %c0_i32_0 = arith.constant 0 : i32
    %c0_i32_1 = arith.constant 0 : i32
    return %c0_i32, %c0_i32_0 : i32, i32
  }
  func.func @transform_6(%arg0: i32, %arg1: i32) -> (i32, i32) {
    %c0_i32 = arith.constant 0 : i32
    %c0_i32_0 = arith.constant 0 : i32
    %c0_i32_1 = arith.constant 0 : i32
    return %c0_i32, %c0_i32_0 : i32, i32
  }
  func.func @transform_7(%arg0: i32, %arg1: i32) -> (i32, i32) {
    %c0_i32 = arith.constant 0 : i32
    %c0_i32_0 = arith.constant 0 : i32
    %c0_i32_1 = arith.constant 0 : i32
    return %c0_i32, %c0_i32_0 : i32, i32
  }
  func.func @transform_8(%arg0: i32, %arg1: i32) -> (i32, i32) {
    %c0_i32 = arith.constant 0 : i32
    %c0_i32_0 = arith.constant 0 : i32
    %c0_i32_1 = arith.constant 0 : i32
    return %c0_i32, %c0_i32_0 : i32, i32
  }
  func.func @transform_9(%arg0: i32, %arg1: i32) -> (i32, i32) {
    %c0_i32 = arith.constant 0 : i32
    %c0_i32_0 = arith.constant 0 : i32
    return %arg0, %c0_i32 : i32, i32
  }
}

</mosaic_0001>

<bundles_post_ra>
// kernel: discriminator_forward.1
= control target key start
LH: loop header
LB: loop body
LE: loop exit
PB: predicated region body
PF: predicated region fallthrough
CT: control target
= control target key end

     0   :  { %s7899_s0 = inlined_call_operand.vmem [shape: bf16[8,3200], index: 0, kind: input, shape index: {}]   ;;  %s7900_s1 = inlined_call_operand.hbm [shape: bf16[3200,1024], index: 1, kind: input, shape index: {}]   ;;  %s7901_s2 = inlined_call_operand.hbm [shape: f32[1,1024], index: 2, kind: input, shape index: {}]   ;;  %s7902_s3 = inlined_call_operand.hbm [shape: bf16[1024,512], index: 3, kind: input, shape index: {}]   ;;  %s7903_s4 = inlined_call_operand.hbm [shape: f32[1,512], index: 4, kind: input, shape index: {}]   ;;  %s7904_s5 = inlined_call_operand.hbm [shape: bf16[512,256], index: 5, kind: input, shape index: {}]   ;;  %s7905_s6 = inlined_call_operand.hbm [shape: f32[1,256], index: 6, kind: input, shape index: {}]   ;;  %s7906_s7 = inlined_call_operand.hbm [shape: bf16[1,256], index: 7, kind: input, shape index: {}]   ;;  %s7907_s8 = inlined_call_operand.<no memory space> [shape: f32[1,1], index: 8, kind: input, shape index: {}]   ;;  %s7908_s9 = inlined_call_operand.vmem [shape: f32[8,128], index: 9, kind: output, shape index: {}]  }
   0x1   :  { %7912 = sst [smem:[#allocation19_spill]] %s7900_s1  ;;  %v14_v0 = vstv %s7907_s8 }
   0x2   :  { %15 = vst [vmem:[#allocation3] sm:$0x1] %v14_v0 }
   0x3   :  { %16 = vsyncpa [#allocation5], 0 }
   0x4   :  { %18 = vsyncpa [#allocation5 + $0x1], 0 }
   0x5   :  { %19 = vsyncpa [#allocation7], 0 }
   0x6   :  { %20 = vsyncpa [#allocation10], 0 }
   0x7   :  { %21 = vsyncpa [#allocation13], 0  ;;  %s7232_s11 = smov 0   ;;  %s7234_s12 = smov 0  }
   0x8   :  { %s7236_s13 = smov 0   ;;  %s7238_s14 = smov 0  }
   0x9   :  { %s7240_s15 = smov 0   ;;  %s7242_s16 = smov 0  }
   0xa LB: > { %s5623_s8 = sadd.s32 4294967295, %s7161_s16   ;;  %p5624_p0 = scmp.ge.s32.totalorder %s7161_s16, 1  ;;  %s7161_s16 = sphi %s7242_s16, %s27_s16   ;;  %s7157_s15 = sphi %s7240_s15, %s7927_s15   ;;  %s7153_s14 = sphi %s7238_s14, %s7926_s14   ;;  %s7149_s13 = sphi %s7236_s13, %s7925_s13   ;;  %s7145_s12 = sphi %s7234_s12, %s7924_s12   ;;  %s7141_s11 = sphi %s7232_s11, %s7923_s11  }
   0xb   : > { %p7264_p1 = scmp.eq.s32.totalorder %s5623_s8, 0  ;;  %p271_p2 = scmp.lt.s32.totalorder %s7161_s16, 6 }
   0xc   : > { %s7163_s19 = smov [#allocation6]   ;;  %s7164_s21 = smov [#allocation9]  }
   0xd   : > { %s7913_s17 = scalar_select %p7264_p1, 1, 0 }
   0xe   : > { %p7269_p3 = pnand %p5624_p0, %p271_p2  ;;  %s284_s20 = sshll.u32 %s7163_s19, 4  ;;  %s285_s20 = int_to_ptr.vmem [resolvable:$true] %s284_s20 }
   0xf   : > { %s308_s22 = sshll.u32 %s7164_s21, 4  ;;  %s7165_s24 = smov [#allocation12]   ;;  %s309_s22 = int_to_ptr.vmem [resolvable:$true] %s308_s22 }
  0x10   : > { %s7914_s18 = scalar_select %p7269_p3, 1, 0 }
  0x11   : > { %p6325_p4 = pneg %p7269_p3  ;;  %s332_s25 = sshll.u32 %s7165_s24, 4  ;;  %s7281_s25 = int_to_ptr.vmem [resolvable:$true] %s332_s25 }
  0x12   : > { %s6926_s27 = scalar_lea.vmem %s285_s20, 128  ;;  %p6934_p10 = scmp.lt.s32.totalorder %s285_s20, %s285_s20 }
  0x13   : > { %p7277_p5 = pnand %p6325_p4, %p7264_p1  ;;  %p6927_p7 = scmp.ne.s32.totalorder %s285_s20, %s6926_s27 }
  0x14   : > { %p6935_p11 = scmp.lt.s32.totalorder %s6926_s27, %s6926_s27 }
  0x15   : > { %p7285_p6 = pneg %p7277_p5 }
  0x16   : > { %p6936_p12 = por %p6935_p11, %p6934_p10 }
  0x17   : > { %p6929_p8 = pnand %p6927_p7, %p7285_p6 }
  0x19   : > { %p6930_p9 = pneg %p6929_p8 }
  0x1b   : > { %p6937_p13 = pnand %p6936_p12, %p6930_p9 }
  0x1d   : > { %6940 = shalt.err (!%p6937_p13)
}
  0x1e   : > { %6328 = dma.hbm_to_vmem [thread:$0]  (!%p7277_p5), %s7901_s2, 128, %s285_s20, [#allocation7]  }
  0x1f   : > { %s6952_s30 = scalar_lea.vmem %s309_s22, 64  ;;  %p6960_p3 = scmp.lt.s32.totalorder %s309_s22, %s309_s22 }
  0x20   : > { %p6953_p0 = scmp.ne.s32.totalorder %s309_s22, %s6952_s30  ;;  %p6961_p7 = scmp.lt.s32.totalorder %s6952_s30, %s6952_s30 }
  0x22   : > { %p6955_p2 = pnand %p6953_p0, %p7285_p6  ;;  %p6962_p8 = por %p6961_p7, %p6960_p3 }
  0x24   : > { %p6956_p4 = pneg %p6955_p2 }
  0x26   : > { %p6963_p1 = pnand %p6962_p8, %p6956_p4 }
  0x28   : > { %6966 = shalt.err (!%p6963_p1)
}
  0x29   : > { %6334 = dma.hbm_to_vmem [thread:$0]  (!%p7277_p5), %s7903_s4, 64, %s309_s22, [#allocation10]  }
  0x2a   : > { %s6978_s19 = scalar_lea.vmem %s7281_s25, 32  ;;  %p6986_p12 = scmp.lt.s32.totalorder %s7281_s25, %s7281_s25 }
  0x2b   : > { %p6979_p9 = scmp.ne.s32.totalorder %s7281_s25, %s6978_s19  ;;  %p6987_p3 = scmp.lt.s32.totalorder %s6978_s19, %s6978_s19 }
  0x2d   : > { %p6981_p10 = pnand %p6979_p9, %p7285_p6  ;;  %p6988_p13 = por %p6987_p3, %p6986_p12 }
  0x2f   : > { %p6982_p11 = pneg %p6981_p10 }
  0x31   : > { %p6989_p1 = pnand %p6988_p13, %p6982_p11 }
  0x33   : > { %6992 = shalt.err (!%p6989_p1)
}
  0x34   : > { %6340 = dma.hbm_to_vmem [thread:$0]  (!%p7277_p5), %s7905_s6, 32, %s7281_s25, [#allocation13]  }
  0x35   : > { %s7166_s22 = smov [#allocation8]  }
  0x36   : > { %s294_s24 = sshll.u32 %s7166_s22, 4  ;;  %s295_s24 = int_to_ptr.vmem [resolvable:$true] %s294_s24 }
  0x37   : > { %s7004_s27 = scalar_lea.vmem %s295_s24, 32768  ;;  %p7012_p7 = scmp.lt.s32.totalorder %s295_s24, %s295_s24 }
  0x38   : > { %p7005_p0 = scmp.ne.s32.totalorder %s295_s24, %s7004_s27  ;;  %p7013_p8 = scmp.lt.s32.totalorder %s7004_s27, %s7004_s27 }
  0x3a   : > { %p7007_p2 = pnand %p7005_p0, %p7285_p6  ;;  %p7014_p9 = por %p7013_p8, %p7012_p7 }
  0x3c   : > { %p7008_p4 = pneg %p7007_p2 }
  0x3e   : > { %p7015_p10 = pnand %p7014_p9, %p7008_p4 }
  0x40   : > { %7018 = shalt.err (!%p7015_p10)
}
  0x41   : > { %s7167_s28 = smov 256   ;;  %s7168_s29 = smov 16  }
  0x42   : > { %6331 = dma.hbm_to_vmem [thread:$0]  (!%p7277_p5), %s7902_s3, 32768, %s295_s24, [#allocation7], %s7167_s28, %s7167_s28, %s7168_s29  }
  0x43   : > { %s7169_s10 = smov [#allocation11]  }
  0x44   : > { %s318_s8 = sshll.u32 %s7169_s10, 4  ;;  %s319_s8 = int_to_ptr.vmem [resolvable:$true] %s318_s8 }
  0x45   : > { %s7030_s19 = scalar_lea.vmem %s319_s8, 8192  ;;  %p7038_p13 = scmp.lt.s32.totalorder %s319_s8, %s319_s8 }
  0x46   : > { %p7031_p11 = scmp.ne.s32.totalorder %s319_s8, %s7030_s19  ;;  %p7039_p1 = scmp.lt.s32.totalorder %s7030_s19, %s7030_s19 }
  0x48   : > { %p7033_p12 = pnand %p7031_p11, %p7285_p6  ;;  %p7040_p0 = por %p7039_p1, %p7038_p13 }
  0x4a   : > { %p7034_p3 = pneg %p7033_p12 }
  0x4c   : > { %p7041_p2 = pnand %p7040_p0, %p7034_p3 }
  0x4e   : > { %7044 = shalt.err (!%p7041_p2)
}
  0x4f   : > { %s7170_s20 = smov 128   ;;  %s7171_s21 = smov 8  }
  0x50   : > { %6337 = dma.hbm_to_vmem [thread:$0]  (!%p7277_p5), %s7904_s5, 8192, %s319_s8, [#allocation10], %s7170_s20, %s7170_s20, %s7171_s21  }
  0x51   : > { %s7172_s27 = smov [#allocation14]  }
  0x52   : > { %s343_s28 = sshll.u32 %s7172_s27, 4  ;;  %s344_s28 = int_to_ptr.vmem [resolvable:$true] %s343_s28 }
  0x53   : > { %s7056_s29 = scalar_lea.vmem %s344_s28, 32  ;;  %p7064_p9 = scmp.lt.s32.totalorder %s344_s28, %s344_s28 }
  0x54   : > { %p7057_p4 = scmp.ne.s32.totalorder %s344_s28, %s7056_s29  ;;  %p7065_p10 = scmp.lt.s32.totalorder %s7056_s29, %s7056_s29 }
  0x56   : > { %p7059_p7 = pnand %p7057_p4, %p7285_p6  ;;  %p7066_p11 = por %p7065_p10, %p7064_p9 }
  0x58   : > { %p7060_p8 = pneg %p7059_p7 }
  0x5a   : > { %p7067_p12 = pnand %p7066_p11, %p7060_p8 }
  0x5c   : > { %7070 = shalt.err (!%p7067_p12)
}
  0x5d   : > { %6343 = dma.hbm_to_vmem [thread:$0]  (!%p7277_p5), %s7906_s7, 32, %s344_s28, [#allocation13]  }
  0x5e   : > { %s36_s26 = sadd.s32 1, %s7157_s15  ;;  %s74_s10 = sadd.s32 1, %s7149_s13 }
  0x5f   : > { %p37_p6 = scmp.ge.s32.totalorder %s36_s26, 5  ;;  %p81_p3 = scmp.ne.s32.totalorder %s7149_s13, %s7145_s12 }
  0x60   : > { %p82_p13 = scmp.eq.s32.totalorder %s7161_s16, 0  ;;  %p87_p1 = scmp.ne.s32.totalorder %s7145_s12, %s7141_s11 }
  0x61   : > { %s7929_s26 = smov (%p37_p6, %s36_s26), 0  ;;  %p7917_p2 = scmp.ne.s32.totalorder %s7913_s17, 0 }
  0x62   : > { %p83_p0 = por %p82_p13, %p81_p3  ;;  %s71_s8 = ssub.s32 %s7157_s15, %s7929_s26 }
  0x63   : > { %p7347_p4 = por %p7917_p2, %p87_p1  ;;  %p6354_p7 = scmp.lt.s32.totalorder %s7161_s16, 5 }
  0x64   : > { %p72_p8 = scmp.eq.s32.totalorder %s71_s8, 0  ;;  %s370_s19 = sand.u32 1, %s7149_s13  }
  0x65   : > { %s6297_s20 = smul.u32 2560, %s370_s19  ;;  %p7359_p5 = pnand %p6354_p7, %p83_p0 }
  0x66   : > { %s7356_s21 = scalar_select %p72_p8, %s7149_s13, %s74_s10  }
  0x67   : > { %s6296_s22 = smul.u32 40960, %s7157_s15  ;;  %s374_s24 = scalar_lea.vmem [#allocation4], %s6297_s20 }
  0x68   : > { %s382_s27 = sshll.u32 %s374_s24, 4  ;;  %s7920_s1 = sld [smem:[#allocation19_spill]]  ;;  %s383_s27 = int_to_ptr.vmem [resolvable:$true] %s382_s27 }
  0x69   : > { %s371_s25 = scalar_lea.sflag [#allocation5], %s370_s19  ;;  %p7073_p9 = pneg %p7359_p5 }
  0x6a   : > { %s7084_s8 = scalar_lea.vmem %s383_s27, 40960  ;;  %s7173_s10 = smov [#allocation4]  }
  0x6b   : > { %p7085_p10 = scmp.ne.s32.totalorder %s383_s27, %s7084_s8  ;;  %s7089_s20 = sshll.u32 %s7173_s10, 4  ;;  %s7090_s20 = int_to_ptr.vmem [resolvable:$false] %s7089_s20 }
  0x6c   : > { %s7091_s24 = scalar_lea.vmem %s7090_s20, 81920  ;;  %p7092_p6 = scmp.lt.s32.totalorder %s383_s27, %s7090_s20 }
  0x6d   : > { %p7087_p11 = pnand %p7085_p10, %p7073_p9  ;;  %p7093_p3 = scmp.lt.s32.totalorder %s7091_s24, %s7084_s8 }
  0x6e   : > { %s381_s30 = scalar_lea.hbm %s7920_s1, %s6296_s22 }
  0x6f   : > { %p7088_p12 = pneg %p7087_p11  ;;  %p7094_p13 = por %p7093_p3, %p7092_p6 }
  0x71   : > { %p7095_p1 = pnand %p7094_p13, %p7088_p12 }
  0x73   : > { %7098 = shalt.err (!%p7095_p1)
}
  0x74   : > { %s7174_s28 = smov 512   ;;  %s7175_s22 = smov 32  }
  0x75   : > { %6347 = dma.hbm_to_vmem [thread:$0]  (!%p7359_p5), %s381_s30, 40960, %s383_s27, %s371_s25, %s7174_s28, %s7174_s28, %s7175_s22  }
  0x76   : > { %p7921_p0 = scmp.ne.s32.totalorder %s7914_s18, 0 }
  0x77   : > { %s396_s19 = sand.u32 (!%p7921_p0), 1, %s7145_s12  }
  0x78   : > { %394 = sbr.rel (%p7921_p0) target bundleno = 1636 (0x664), region = 56  ;;  %s397_s10 = scalar_lea.sflag (!%p7921_p0), [#allocation5], %s396_s19 }
  0x79   : > { %s6298_s29 = smul.u32 (!%p7921_p0), 2560, %s396_s19 }
  0x7b   : > { %s7373_s1 = scalar_lea.vmem (!%p7921_p0), [#allocation4], %s6298_s29 }
  0x7d   : > { %7124 = dma.done.wait (%p7347_p4), %s397_s10, 40960  }
  0x7e   : > { %7126 = vsyncadd (%p7347_p4), %s397_s10, 4294926336  ;;  %p7922_p2 = scmp.ne.s32.totalorder %s7913_s17, 0 }
  0x80   : > { %7128 = dma.done.wait (%p7922_p2), [#allocation7], 32896  }
  0x81   : > { %7130 = vsyncadd (%p7922_p2), [#allocation7], 4294934400 }
  0x82   : > { %7132 = dma.done.wait (%p7922_p2), [#allocation10], 8256  }
  0x83   : > { %7134 = vsyncadd (%p7922_p2), [#allocation10], 4294959040 }
  0x84   : > { %7136 = dma.done.wait (%p7922_p2), [#allocation13], 64  }
  0x85   : > { %7138 = vsyncadd (%p7922_p2), [#allocation13], 4294967232  ;;  %s467_s18 = smul.u32 5, %s7153_s14  ;;  %p5642_p7 = scmp.ne.s32.totalorder %s7153_s14, 0 }
  0x87   : > { %p470_p4 = scmp.lt.s32.totalorder %s467_s18, 24  ;;  %486 = sbr.rel (%p5642_p7) target bundleno = 145 (0x91), region = 88 }
  0x89   : > { %s7931_s18 = smov (!%p470_p4, %s467_s18), 24 }
  0x8a   : > { %s5641_s23 = sshll.u32 %s7931_s18, 2 }
  0x8b   : > { %s7395_s30 = scalar_lea.vmem %s7899_s0, %s5641_s23 }
  0x8c   : > { %v7176_v1 = vmov 0.0  }
  0x8d   : > { %487 = vst [vmem:[#allocation2 + $0x30] sm:$0xff] %v7176_v1  ;;  %488 = vst [vmem:[#allocation2] sm:$0xff] %v7176_v1 }
  0x8e   : > { %489 = vst [vmem:[#allocation2 + $0x18] sm:$0xff] %v7176_v1  ;;  %490 = vst [vmem:[#allocation2 + $0x10] sm:$0xff] %v7176_v1 }
  0x8f   : > { %491 = vst [vmem:[#allocation2 + $0x8] sm:$0xff] %v7176_v1  ;;  %492 = vst [vmem:[#allocation2 + $0x20] sm:$0xff] %v7176_v1 }
  0x90   : > { %493 = vst [vmem:[#allocation2 + $0x28] sm:$0xff] %v7176_v1  ;;  %494 = vst [vmem:[#allocation2 + $0x38] sm:$0xff] %v7176_v1 }
  0x91 PF: > { %v562_v2 = vld [vmem:[%s7373_s1 + $0x1c0] sm:$0xff]  ;;  %p5968_p8 = scmp.ne.s32.totalorder %s7153_s14, 4 }
  0x92   : > { %v566_v3 = vld [vmem:[%s7373_s1 + $0x1e0] sm:$0xff] }
  0x93   : > { %v690_v4 = vld [vmem:[%s7373_s1 + $0x5c0] sm:$0xff]  ;;  %v5705_v5 = vcombine.high %v562_v2, %v566_v3  ;;  %v5704_v7 = vcombine.low %v562_v2, %v566_v3 }
  0x94   : > { %v694_v6 = vld [vmem:[%s7373_s1 + $0x5e0] sm:$0xff] }
  0x95   : > { %v554_v8 = vld [vmem:[%s7373_s1 + $0x180] sm:$0xff]  ;;  %v5833_v10 = vcombine.high %v690_v4, %v694_v6  ;;  %v5832_v11 = vcombine.low %v690_v4, %v694_v6  ;;  %2444 = vmatprep.subr.bf16.mxu0 %v5705_v5 }
  0x96   : > { %v558_v9 = vld [vmem:[%s7373_s1 + $0x1a0] sm:$0xff]  ;;  %2445 = vmatpush1.bf16.msra.mxu0 %v5704_v7 }
  0x97   : > { %v5697_v12 = vcombine.high %v554_v8, %v558_v9  ;;  %v682_v13 = vld [vmem:[%s7373_s1 + $0x580] sm:$0xff]  ;;  %2485 = vmatprep.subr.bf16.mxu1 %v5833_v10  ;;  %v5696_v20 = vcombine.low %v554_v8, %v558_v9 }
  0x98   : > { %v686_v14 = vld [vmem:[%s7373_s1 + $0x5a0] sm:$0xff]  ;;  %2486 = vmatpush1.bf16.msra.mxu1 %v5832_v11 }
  0x99   : > { %v546_v15 = vld [vmem:[%s7373_s1 + $0x140] sm:$0xff]  ;;  %v5825_v16 = vcombine.high %v682_v13, %v686_v14  ;;  %2446 = vmatprep.subr.bf16.mxu0 %v5697_v12  ;;  %v5824_v21 = vcombine.low %v682_v13, %v686_v14 }
  0x9a   : > { %v550_v17 = vld [vmem:[%s7373_s1 + $0x160] sm:$0xff]  ;;  %2447 = vmatpush1.bf16.msra.mxu0 %v5696_v20 }
  0x9b   : > { %v674_v18 = vld [vmem:[%s7373_s1 + $0x540] sm:$0xff]  ;;  %v5689_v22 = vcombine.high %v546_v15, %v550_v17  ;;  %2487 = vmatprep.subr.bf16.mxu1 %v5825_v16  ;;  %v5688_v28 = vcombine.low %v546_v15, %v550_v17 }
  0x9c   : > { %v678_v19 = vld [vmem:[%s7373_s1 + $0x560] sm:$0xff]  ;;  %2488 = vmatpush1.bf16.msra.mxu1 %v5824_v21 }
  0x9d   : > { %v5817_v23 = vcombine.high %v674_v18, %v678_v19  ;;  %v538_v24 = vld [vmem:[%s7373_s1 + $0x100] sm:$0xff]  ;;  %2448 = vmatprep.subr.bf16.mxu0 %v5689_v22  ;;  %v5816_v29 = vcombine.low %v674_v18, %v678_v19 }
  0x9e   : > { %v542_v25 = vld [vmem:[%s7373_s1 + $0x120] sm:$0xff]  ;;  %2449 = vmatpush1.bf16.msra.mxu0 %v5688_v28 }
  0x9f   : > { %v666_v26 = vld [vmem:[%s7373_s1 + $0x500] sm:$0xff]  ;;  %v5681_v30 = vcombine.high %v538_v24, %v542_v25  ;;  %2489 = vmatprep.subr.bf16.mxu1 %v5817_v23  ;;  %v5680_v36 = vcombine.low %v538_v24, %v542_v25 }
  0xa0   : > { %v670_v27 = vld [vmem:[%s7373_s1 + $0x520] sm:$0xff]  ;;  %2490 = vmatpush1.bf16.msra.mxu1 %v5816_v29 }
  0xa1   : > { %v5809_v31 = vcombine.high %v666_v26, %v670_v27  ;;  %v530_v32 = vld [vmem:[%s7373_s1 + $0xc0] sm:$0xff]  ;;  %2450 = vmatprep.subr.bf16.mxu0 %v5681_v30  ;;  %v5808_v37 = vcombine.low %v666_v26, %v670_v27 }
  0xa2   : > { %v534_v33 = vld [vmem:[%s7373_s1 + $0xe0] sm:$0xff]  ;;  %2451 = vmatpush1.bf16.msra.mxu0 %v5680_v36 }
  0xa3   : > { %v658_v34 = vld [vmem:[%s7373_s1 + $0x4c0] sm:$0xff]  ;;  %v5673_v38 = vcombine.high %v530_v32, %v534_v33  ;;  %2491 = vmatprep.subr.bf16.mxu1 %v5809_v31  ;;  %v5672_v44 = vcombine.low %v530_v32, %v534_v33 }
  0xa4   : > { %v662_v35 = vld [vmem:[%s7373_s1 + $0x4e0] sm:$0xff]  ;;  %2492 = vmatpush1.bf16.msra.mxu1 %v5808_v37 }
  0xa5   : > { %v5801_v39 = vcombine.high %v658_v34, %v662_v35  ;;  %v522_v40 = vld [vmem:[%s7373_s1 + $0x80] sm:$0xff]  ;;  %2452 = vmatprep.subr.bf16.mxu0 %v5673_v38  ;;  %v5800_v45 = vcombine.low %v658_v34, %v662_v35 }
  0xa6   : > { %v526_v41 = vld [vmem:[%s7373_s1 + $0xa0] sm:$0xff]  ;;  %2453 = vmatpush1.bf16.msra.mxu0 %v5672_v44 }
  0xa7   : > { %v650_v42 = vld [vmem:[%s7373_s1 + $0x480] sm:$0xff]  ;;  %v5665_v46 = vcombine.high %v522_v40, %v526_v41  ;;  %2493 = vmatprep.subr.bf16.mxu1 %v5801_v39  ;;  %v5664_v52 = vcombine.low %v522_v40, %v526_v41 }
  0xa8   : > { %v654_v43 = vld [vmem:[%s7373_s1 + $0x4a0] sm:$0xff]  ;;  %2494 = vmatpush1.bf16.msra.mxu1 %v5800_v45 }
  0xa9   : > { %v5793_v47 = vcombine.high %v650_v42, %v654_v43  ;;  %v514_v48 = vld [vmem:[%s7373_s1 + $0x40] sm:$0xff]  ;;  %2454 = vmatprep.subr.bf16.mxu0 %v5665_v46  ;;  %v5792_v53 = vcombine.low %v650_v42, %v654_v43 }
  0xaa   : > { %v518_v49 = vld [vmem:[%s7373_s1 + $0x60] sm:$0xff]  ;;  %2455 = vmatpush1.bf16.msra.mxu0 %v5664_v52 }
  0xab   : > { %v642_v50 = vld [vmem:[%s7373_s1 + $0x440] sm:$0xff]  ;;  %v5657_v54 = vcombine.high %v514_v48, %v518_v49  ;;  %2495 = vmatprep.subr.bf16.mxu1 %v5793_v47  ;;  %v5656_v0 = vcombine.low %v514_v48, %v518_v49 }
  0xac   : > { %v646_v51 = vld [vmem:[%s7373_s1 + $0x460] sm:$0xff]  ;;  %2496 = vmatpush1.bf16.msra.mxu1 %v5792_v53 }
  0xad   : > { %v7427_v55 = vld [vmem:[%s7395_s30] sm:$0xff]  ;;  %v7430_v56 = vld [vmem:[%s7395_s30 + $0x8] sm:$0xff]  ;;  %v5785_v57 = vcombine.high %v642_v50, %v646_v51  ;;  %2456 = vmatprep.subr.bf16.mxu0 %v5657_v54  ;;  %v5784_v1 = vcombine.low %v642_v50, %v646_v51 }
  0xae   : > { %v506_v58 = vld [vmem:[%s7373_s1] sm:$0xff]  ;;  %v7436_v60 = vcombine.high %v7427_v55, %v7427_v55  ;;  %v7440_v61 = vcombine.high %v7430_v56, %v7430_v56  ;;  %2457 = vmatpush1.bf16.msra.mxu0 %v5656_v0 }
  0xaf   : > { %v510_v59 = vld [vmem:[%s7373_s1 + $0x20] sm:$0xff]  ;;  %2497 = vmatprep.subr.bf16.mxu1 %v5785_v57 }
  0xb0   : > { %v634_v62 = vld [vmem:[%s7373_s1 + $0x400] sm:$0xff]  ;;  %2476 = vmatprep.mubr.bf16.mxu0 %v7436_v60  ;;  %v5649_v2 = vcombine.high %v506_v58, %v510_v59  ;;  %2517 = vmatprep.mubr.bf16.mxu1 %v7440_v61  ;;  %v5648_v8 = vcombine.low %v506_v58, %v510_v59 }
  0xb1   : > { %v638_v63 = vld [vmem:[%s7373_s1 + $0x420] sm:$0xff]  ;;  %2498 = vmatpush1.bf16.msra.mxu1 %v5784_v1 }
  0xb2   : > { %v5777_v3 = vcombine.high %v634_v62, %v638_v63  ;;  %v626_v4 = vld [vmem:[%s7373_s1 + $0x3c0] sm:$0xff]  ;;  %2458 = vmatprep.subr.bf16.mxu0 %v5649_v2  ;;  %v5776_v9 = vcombine.low %v634_v62, %v638_v63 }
  0xb3   : > { %v630_v5 = vld [vmem:[%s7373_s1 + $0x3e0] sm:$0xff]  ;;  %2459 = vmatpush1.bf16.msra.mxu0 %v5648_v8 }
  0xb4   : > { %v754_v6 = vld [vmem:[%s7373_s1 + $0x7c0] sm:$0xff]  ;;  %v5769_v10 = vcombine.high %v626_v4, %v630_v5  ;;  %2499 = vmatprep.subr.bf16.mxu1 %v5777_v3  ;;  %v5768_v16 = vcombine.low %v626_v4, %v630_v5 }
  0xb5   : > { %v758_v7 = vld [vmem:[%s7373_s1 + $0x7e0] sm:$0xff]  ;;  %2500 = vmatpush1.bf16.msra.mxu1 %v5776_v9 }
  0xb6   : > { %v5897_v11 = vcombine.high %v754_v6, %v758_v7  ;;  %v618_v12 = vld [vmem:[%s7373_s1 + $0x380] sm:$0xff]  ;;  %2460 = vmatprep.subr.bf16.mxu0 %v5769_v10  ;;  %v5896_v17 = vcombine.low %v754_v6, %v758_v7  ;;  %v563_v10 = vld [vmem:[%s7373_s1 + $0x1c8] sm:$0xff] }
  0xb7   : > { %v622_v13 = vld [vmem:[%s7373_s1 + $0x3a0] sm:$0xff]  ;;  %2461 = vmatpush2.bf16.msra.mxu0 %v5768_v16 }
  0xb8   : > { %v746_v14 = vld [vmem:[%s7373_s1 + $0x780] sm:$0xff]  ;;  %v5761_v18 = vcombine.high %v618_v12, %v622_v13  ;;  %2501 = vmatprep.subr.bf16.mxu1 %v5897_v11  ;;  %v5760_v24 = vcombine.low %v618_v12, %v622_v13  ;;  %v567_v11 = vld [vmem:[%s7373_s1 + $0x1e8] sm:$0xff] }
  0xb9   : > { %v750_v15 = vld [vmem:[%s7373_s1 + $0x7a0] sm:$0xff]  ;;  %2502 = vmatpush2.bf16.msra.mxu1 %v5896_v17 }
  0xba   : > { %v5889_v19 = vcombine.high %v746_v14, %v750_v15  ;;  %v610_v20 = vld [vmem:[%s7373_s1 + $0x340] sm:$0xff]  ;;  %2462 = vmatprep.subr.bf16.mxu0 %v5761_v18  ;;  %v5888_v25 = vcombine.low %v746_v14, %v750_v15  ;;  %v5707_v15 = vcombine.high %v563_v10, %v567_v11  ;;  %v7486_v18 = vcombine.low %v7427_v55, %v7427_v55 }
  0xbb   : > { %v614_v21 = vld [vmem:[%s7373_s1 + $0x360] sm:$0xff]  ;;  %2463 = vmatpush2.bf16.msra.mxu0 %v5760_v24 }
  0xbc   : > { %v738_v22 = vld [vmem:[%s7373_s1 + $0x740] sm:$0xff]  ;;  %v5753_v26 = vcombine.high %v610_v20, %v614_v21  ;;  %2503 = vmatprep.subr.bf16.mxu1 %v5889_v19  ;;  %v5752_v32 = vcombine.low %v610_v20, %v614_v21  ;;  %v555_v19 = vld [vmem:[%s7373_s1 + $0x188] sm:$0xff]  ;;  %v7492_v21 = vcombine.low %v7430_v56, %v7430_v56 }
  0xbd   : > { %v742_v23 = vld [vmem:[%s7373_s1 + $0x760] sm:$0xff]  ;;  %2504 = vmatpush2.bf16.msra.mxu1 %v5888_v25  ;;  %v559_v20 = vld [vmem:[%s7373_s1 + $0x1a8] sm:$0xff] }
  0xbe   : > { %v5881_v27 = vcombine.high %v738_v22, %v742_v23  ;;  %v602_v28 = vld [vmem:[%s7373_s1 + $0x300] sm:$0xff]  ;;  %2464 = vmatprep.subr.bf16.mxu0 %v5753_v26  ;;  %v5880_v33 = vcombine.low %v738_v22, %v742_v23  ;;  %v5706_v23 = vcombine.low %v563_v10, %v567_v11  ;;  %v5699_v25 = vcombine.high %v555_v19, %v559_v20 }
  0xbf   : > { %v606_v29 = vld [vmem:[%s7373_s1 + $0x320] sm:$0xff]  ;;  %2465 = vmatpush2.bf16.msra.mxu0 %v5752_v32 }
  0xc0   : > { %v730_v30 = vld [vmem:[%s7373_s1 + $0x700] sm:$0xff]  ;;  %v5745_v34 = vcombine.high %v602_v28, %v606_v29  ;;  %2505 = vmatprep.subr.bf16.mxu1 %v5881_v27  ;;  %v5744_v40 = vcombine.low %v602_v28, %v606_v29  ;;  %v547_v27 = vld [vmem:[%s7373_s1 + $0x148] sm:$0xff]  ;;  %v5698_v29 = vcombine.low %v555_v19, %v559_v20 }
  0xc1   : > { %v734_v31 = vld [vmem:[%s7373_s1 + $0x720] sm:$0xff]  ;;  %2506 = vmatpush2.bf16.msra.mxu1 %v5880_v33  ;;  %v551_v28 = vld [vmem:[%s7373_s1 + $0x168] sm:$0xff] }
  0xc2   : > { %v5873_v35 = vcombine.high %v730_v30, %v734_v31  ;;  %v594_v36 = vld [vmem:[%s7373_s1 + $0x2c0] sm:$0xff]  ;;  %2466 = vmatprep.subr.bf16.mxu0 %v5745_v34  ;;  %v5872_v41 = vcombine.low %v730_v30, %v734_v31  ;;  %v5691_v31 = vcombine.high %v547_v27, %v551_v28  ;;  %v7177_v34 = vmov 0  }
  0xc3   : > { %v598_v37 = vld [vmem:[%s7373_s1 + $0x2e0] sm:$0xff]  ;;  %2467 = vmatpush2.bf16.msra.mxu0 %v5744_v40 }
  0xc4   : > { %v722_v38 = vld [vmem:[%s7373_s1 + $0x6c0] sm:$0xff]  ;;  %v5737_v42 = vcombine.high %v594_v36, %v598_v37  ;;  %2507 = vmatprep.subr.bf16.mxu1 %v5873_v35  ;;  %v5736_v48 = vcombine.low %v594_v36, %v598_v37  ;;  %v539_v35 = vld [vmem:[%s7373_s1 + $0x108] sm:$0xff] }
  0xc5   : > { %v726_v39 = vld [vmem:[%s7373_s1 + $0x6e0] sm:$0xff]  ;;  %2508 = vmatpush2.bf16.msra.mxu1 %v5872_v41  ;;  %v543_v36 = vld [vmem:[%s7373_s1 + $0x128] sm:$0xff] }
  0xc6   : > { %v5865_v43 = vcombine.high %v722_v38, %v726_v39  ;;  %v586_v44 = vld [vmem:[%s7373_s1 + $0x280] sm:$0xff]  ;;  %2468 = vmatprep.subr.bf16.mxu0 %v5737_v42  ;;  %v5864_v49 = vcombine.low %v722_v38, %v726_v39  ;;  %v5690_v38 = vcombine.low %v547_v27, %v551_v28  ;;  %v5683_v40 = vcombine.high %v539_v35, %v543_v36 }
  0xc7   : > { %v590_v45 = vld [vmem:[%s7373_s1 + $0x2a0] sm:$0xff]  ;;  %2469 = vmatpush2.bf16.msra.mxu0 %v5736_v48 }
  0xc8   : > { %v714_v46 = vld [vmem:[%s7373_s1 + $0x680] sm:$0xff]  ;;  %v5729_v50 = vcombine.high %v586_v44, %v590_v45  ;;  %2509 = vmatprep.subr.bf16.mxu1 %v5865_v43  ;;  %v5728_v58 = vcombine.low %v586_v44, %v590_v45  ;;  %v531_v43 = vld [vmem:[%s7373_s1 + $0xc8] sm:$0xff] }
  0xc9   : > { %v718_v47 = vld [vmem:[%s7373_s1 + $0x6a0] sm:$0xff]  ;;  %2510 = vmatpush2.bf16.msra.mxu1 %v5864_v49  ;;  %v535_v44 = vld [vmem:[%s7373_s1 + $0xe8] sm:$0xff] }
  0xca   : > { %v5857_v51 = vcombine.high %v714_v46, %v718_v47  ;;  %v578_v52 = vld [vmem:[%s7373_s1 + $0x240] sm:$0xff]  ;;  %2470 = vmatprep.subr.bf16.mxu0 %v5729_v50  ;;  %v5856_v59 = vcombine.low %v714_v46, %v718_v47  ;;  %v5682_v46 = vcombine.low %v539_v35, %v543_v36  ;;  %v5675_v48 = vcombine.high %v531_v43, %v535_v44 }
  0xcb   : > { %v582_v53 = vld [vmem:[%s7373_s1 + $0x260] sm:$0xff]  ;;  %2471 = vmatpush2.bf16.msra.mxu0 %v5728_v58 }
  0xcc   : > { %v706_v54 = vld [vmem:[%s7373_s1 + $0x640] sm:$0xff]  ;;  %v5721_v62 = vcombine.high %v578_v52, %v582_v53  ;;  %2511 = vmatprep.subr.bf16.mxu1 %v5857_v51  ;;  %v5720_v4 = vcombine.low %v578_v52, %v582_v53  ;;  %v523_v51 = vld [vmem:[%s7373_s1 + $0x88] sm:$0xff] }
  0xcd   : > { %v710_v57 = vld [vmem:[%s7373_s1 + $0x660] sm:$0xff]  ;;  %2512 = vmatpush2.bf16.msra.mxu1 %v5856_v59  ;;  %v527_v52 = vld [vmem:[%s7373_s1 + $0xa8] sm:$0xff] }
  0xce   : > { %v5849_v63 = vcombine.high %v706_v54, %v710_v57  ;;  %v570_v0 = vld [vmem:[%s7373_s1 + $0x200] sm:$0xff]  ;;  %2472 = vmatprep.subr.bf16.mxu0 %v5721_v62  ;;  %v5848_v5 = vcombine.low %v706_v54, %v710_v57  ;;  %v5674_v54 = vcombine.low %v531_v43, %v535_v44  ;;  %v5667_v58 = vcombine.high %v523_v51, %v527_v52 }
  0xcf   : > { %v574_v1 = vld [vmem:[%s7373_s1 + $0x220] sm:$0xff]  ;;  %2473 = vmatpush2.bf16.msra.mxu0 %v5720_v4 }
  0xd0   : > { %v698_v2 = vld [vmem:[%s7373_s1 + $0x600] sm:$0xff]  ;;  %v5713_v6 = vcombine.high %v570_v0, %v574_v1  ;;  %2513 = vmatprep.subr.bf16.mxu1 %v5849_v63  ;;  %v5712_v12 = vcombine.low %v570_v0, %v574_v1  ;;  %v515_v63 = vld [vmem:[%s7373_s1 + $0x48] sm:$0xff] }
  0xd1   : > { %v702_v3 = vld [vmem:[%s7373_s1 + $0x620] sm:$0xff]  ;;  %2514 = vmatpush2.bf16.msra.mxu1 %v5848_v5  ;;  %v519_v0 = vld [vmem:[%s7373_s1 + $0x68] sm:$0xff] }
  0xd2   : > { %v5841_v7 = vcombine.high %v698_v2, %v702_v3  ;;  %v818_v8 = vld [vmem:[%s7373_s1 + $0x9c0] sm:$0xff]  ;;  %2474 = vmatprep.subr.bf16.mxu0 %v5713_v6  ;;  %v5840_v13 = vcombine.low %v698_v2, %v702_v3  ;;  %v5666_v2 = vcombine.low %v523_v51, %v527_v52  ;;  %v5659_v4 = vcombine.high %v515_v63, %v519_v0 }
  0xd3   : > { %v822_v9 = vld [vmem:[%s7373_s1 + $0x9e0] sm:$0xff]  ;;  %2475 = vmatpush2.bf16.msra.mxu0 %v5712_v12  ;;  %v5658_v10 = vcombine.low %v515_v63, %v519_v0 }
  0xd4   : > { %v5961_v14 = vcombine.high %v818_v8, %v822_v9  ;;  %2515 = vmatprep.subr.bf16.mxu1 %v5841_v7  ;;  %v810_v16 = vld [vmem:[%s7373_s1 + $0x980] sm:$0xff]  ;;  %v5960_v22 = vcombine.low %v818_v8, %v822_v9  ;;  %v507_v7 = vld [vmem:[%s7373_s1 + $0x8] sm:$0xff] }
  0xd5   : > { %v814_v17 = vld [vmem:[%s7373_s1 + $0x9a0] sm:$0xff]  ;;  %2516 = vmatpush2.bf16.msra.mxu1 %v5840_v13  ;;  %v511_v8 = vld [vmem:[%s7373_s1 + $0x28] sm:$0xff] }
  0xd6   : > { %2526 = vmatprep.subr.bf16.mxu0 %v5961_v14  ;;  %v5953_v24 = vcombine.high %v810_v16, %v814_v17  ;;  %2567 = vmatprep.subr.bf16.mxu1 %v5707_v15  ;;  %v802_v26 = vld [vmem:[%s7373_s1 + $0x940] sm:$0xff]  ;;  %v5952_v56 = vcombine.low %v810_v16, %v814_v17  ;;  %v5651_v12 = vcombine.high %v507_v7, %v511_v8  ;;  %v691_v13 = vld [vmem:[%s7373_s1 + $0x5c8] sm:$0xff] }
  0xd7   : > { %v806_v55 = vld [vmem:[%s7373_s1 + $0x960] sm:$0xff]  ;;  %2477 = vmatmul.mubr.bf16.vlgmr.msra.gmra.mxu0 %v7486_v18  ;;  %v695_v14 = vld [vmem:[%s7373_s1 + $0x5e8] sm:$0xff]  ;;  %v5650_v19 = vcombine.low %v507_v7, %v511_v8 }
  0xd8   : > { %2518 = vmatmul.mubr.bf16.vlgmr.msra.gmra.mxu1 %v7492_v21  ;;  %2527 = vmatpush1.bf16.msra.mxu0 %v5960_v22  ;;  %v5945_v30 = vcombine.high %v802_v26, %v806_v55  ;;  %v794_v32 = vld [vmem:[%s7373_s1 + $0x900] sm:$0xff]  ;;  %v5944_v37 = vcombine.low %v802_v26, %v806_v55  ;;  %v627_v15 = vld [vmem:[%s7373_s1 + $0x3c8] sm:$0xff]  ;;  %v5835_v20 = vcombine.high %v691_v13, %v695_v14 }
  0xd9   : > { %2568 = vmatpush1.bf16.msra.mxu1 %v5706_v23  ;;  %2528 = vmatprep.subr.bf16.mxu0 %v5953_v24  ;;  %v798_v33 = vld [vmem:[%s7373_s1 + $0x920] sm:$0xff]  ;;  %v631_v16 = vld [vmem:[%s7373_s1 + $0x3e8] sm:$0xff]  ;;  %v5834_v27 = vcombine.low %v691_v13, %v695_v14 }
  0xda   : > { %2569 = vmatprep.subr.bf16.mxu1 %v5699_v25  ;;  %2558 = vmatprep.mubr.bf16.mxu0 %v7177_v34  ;;  %v5937_v39 = vcombine.high %v794_v32, %v798_v33  ;;  %v786_v41 = vld [vmem:[%s7373_s1 + $0x8c0] sm:$0xff]  ;;  %v5936_v45 = vcombine.low %v794_v32, %v798_v33  ;;  %v5771_v22 = vcombine.high %v627_v15, %v631_v16  ;;  %v683_v23 = vld [vmem:[%s7373_s1 + $0x588] sm:$0xff] }
  0xdb   : > { %2599 = vmatprep.mubr.bf16.mxu1 %v7436_v60  ;;  %v790_v42 = vld [vmem:[%s7373_s1 + $0x8e0] sm:$0xff]  ;;  %v687_v24 = vld [vmem:[%s7373_s1 + $0x5a8] sm:$0xff]  ;;  %v5770_v28 = vcombine.low %v627_v15, %v631_v16 }
  0xdc   : > { %2529 = vmatpush1.bf16.msra.mxu0 %v5952_v56  ;;  %v5929_v47 = vcombine.high %v786_v41, %v790_v42  ;;  %v778_v49 = vld [vmem:[%s7373_s1 + $0x880] sm:$0xff]  ;;  %v5928_v53 = vcombine.low %v786_v41, %v790_v42  ;;  %v7529_v25 = vld [vmem:[%s7395_s30 + $0x10] ss:$0 sps:$4 sm:$0xff]   ;;  %v5827_v56 = vcombine.high %v683_v23, %v687_v24  ;;  %v5826_v35 = vcombine.low %v683_v23, %v687_v24 }
  0xdd   : > { %2570 = vmatpush1.bf16.msra.mxu1 %v5698_v29  ;;  %2530 = vmatprep.subr.bf16.mxu0 %v5945_v30  ;;  %v782_v50 = vld [vmem:[%s7373_s1 + $0x8a0] sm:$0xff]  ;;  %v619_v26 = vld [vmem:[%s7373_s1 + $0x388] sm:$0xff] }
  0xde   : > { %2571 = vmatprep.subr.bf16.mxu1 %v5691_v31  ;;  %v5921_v57 = vcombine.high %v778_v49, %v782_v50  ;;  %v770_v59 = vld [vmem:[%s7373_s1 + $0x840] sm:$0xff]  ;;  %v5920_v1 = vcombine.low %v778_v49, %v782_v50  ;;  %v623_v55 = vld [vmem:[%s7373_s1 + $0x3a8] sm:$0xff] }
  0xdf   : > { %v774_v62 = vld [vmem:[%s7373_s1 + $0x860] sm:$0xff]  ;;  %v5763_v29 = vcombine.high %v619_v26, %v623_v55  ;;  %v675_v30 = vld [vmem:[%s7373_s1 + $0x548] sm:$0xff]  ;;  %v5762_v36 = vcombine.low %v619_v26, %v623_v55 }
  0xe0   : > { %2531 = vmatpush1.bf16.msra.mxu0 %v5944_v37  ;;  %v5913_v3 = vcombine.high %v770_v59, %v774_v62  ;;  %v762_v5 = vld [vmem:[%s7373_s1 + $0x800] sm:$0xff]  ;;  %v5912_v9 = vcombine.low %v770_v59, %v774_v62  ;;  %v679_v31 = vld [vmem:[%s7373_s1 + $0x568] sm:$0xff] }
  0xe1   : > { %2572 = vmatpush1.bf16.msra.mxu1 %v5690_v38  ;;  %2532 = vmatprep.subr.bf16.mxu0 %v5937_v39  ;;  %v766_v6 = vld [vmem:[%s7373_s1 + $0x820] sm:$0xff]  ;;  %v611_v32 = vld [vmem:[%s7373_s1 + $0x348] sm:$0xff]  ;;  %v5819_v37 = vcombine.high %v675_v30, %v679_v31  ;;  %v5818_v43 = vcombine.low %v675_v30, %v679_v31 }
  0xe2   : > { %2573 = vmatprep.subr.bf16.mxu1 %v5683_v40  ;;  %v5905_v11 = vcombine.high %v762_v5, %v766_v6  ;;  %v5904_v17 = vcombine.low %v762_v5, %v766_v6  ;;  %v615_v33 = vld [vmem:[%s7373_s1 + $0x368] sm:$0xff] }
  0xe3   : > { %v5755_v38 = vcombine.high %v611_v32, %v615_v33  ;;  %v667_v39 = vld [vmem:[%s7373_s1 + $0x508] sm:$0xff]  ;;  %v5754_v44 = vcombine.low %v611_v32, %v615_v33 }
  0xe4   : > { %2533 = vmatpush1.bf16.msra.mxu0 %v5936_v45  ;;  %v671_v40 = vld [vmem:[%s7373_s1 + $0x528] sm:$0xff] }
  0xe5   : > { %2574 = vmatpush1.bf16.msra.mxu1 %v5682_v46  ;;  %2534 = vmatprep.subr.bf16.mxu0 %v5929_v47  ;;  %v603_v41 = vld [vmem:[%s7373_s1 + $0x308] sm:$0xff]  ;;  %v5811_v45 = vcombine.high %v667_v39, %v671_v40  ;;  %v5810_v51 = vcombine.low %v667_v39, %v671_v40 }
  0xe6   : > { %2575 = vmatprep.subr.bf16.mxu1 %v5675_v48  ;;  %v607_v42 = vld [vmem:[%s7373_s1 + $0x328] sm:$0xff] }
  0xe7   : > { %v5747_v46 = vcombine.high %v603_v41, %v607_v42  ;;  %v659_v47 = vld [vmem:[%s7373_s1 + $0x4c8] sm:$0xff]  ;;  %v5746_v52 = vcombine.low %v603_v41, %v607_v42 }
  0xe8   : > { %2535 = vmatpush1.bf16.msra.mxu0 %v5928_v53  ;;  %v663_v48 = vld [vmem:[%s7373_s1 + $0x4e8] sm:$0xff] }
  0xe9   : > { %2576 = vmatpush1.bf16.msra.mxu1 %v5674_v54  ;;  %2536 = vmatprep.subr.bf16.mxu0 %v5921_v57  ;;  %v595_v49 = vld [vmem:[%s7373_s1 + $0x2c8] sm:$0xff]  ;;  %v5803_v53 = vcombine.high %v659_v47, %v663_v48  ;;  %v5802_v63 = vcombine.low %v659_v47, %v663_v48 }
  0xea   : > { %2577 = vmatprep.subr.bf16.mxu1 %v5667_v58  ;;  %v599_v50 = vld [vmem:[%s7373_s1 + $0x2e8] sm:$0xff] }
  0xeb   : > { %v5739_v54 = vcombine.high %v595_v49, %v599_v50  ;;  %v651_v57 = vld [vmem:[%s7373_s1 + $0x488] sm:$0xff]  ;;  %v5738_v0 = vcombine.low %v595_v49, %v599_v50 }
  0xec   : > { %2537 = vmatpush1.bf16.msra.mxu0 %v5920_v1  ;;  %v655_v58 = vld [vmem:[%s7373_s1 + $0x4a8] sm:$0xff] }
  0xed   : > { %2578 = vmatpush1.bf16.msra.mxu1 %v5666_v2  ;;  %2538 = vmatprep.subr.bf16.mxu0 %v5913_v3  ;;  %v587_v59 = vld [vmem:[%s7373_s1 + $0x288] sm:$0xff]  ;;  %v5795_v1 = vcombine.high %v651_v57, %v655_v58  ;;  %v5794_v7 = vcombine.low %v651_v57, %v655_v58 }
  0xee   : > { %2579 = vmatprep.subr.bf16.mxu1 %v5659_v4  ;;  %v591_v62 = vld [vmem:[%s7373_s1 + $0x2a8] sm:$0xff] }
  0xef   : > { %v5731_v2 = vcombine.high %v587_v59, %v591_v62  ;;  %v643_v3 = vld [vmem:[%s7373_s1 + $0x448] sm:$0xff]  ;;  %v5730_v8 = vcombine.low %v587_v59, %v591_v62 }
  0xf0   : > { %2539 = vmatpush1.bf16.msra.mxu0 %v5912_v9  ;;  %v647_v4 = vld [vmem:[%s7373_s1 + $0x468] sm:$0xff] }
  0xf1   : > { %2580 = vmatpush1.bf16.msra.mxu1 %v5658_v10  ;;  %2540 = vmatprep.subr.bf16.mxu0 %v5905_v11  ;;  %v579_v5 = vld [vmem:[%s7373_s1 + $0x248] sm:$0xff]  ;;  %v5787_v9 = vcombine.high %v643_v3, %v647_v4  ;;  %v5786_v15 = vcombine.low %v643_v3, %v647_v4 }
  0xf2   : > { %2581 = vmatprep.subr.bf16.mxu1 %v5651_v12  ;;  %v583_v6 = vld [vmem:[%s7373_s1 + $0x268] sm:$0xff] }
  0xf3   : > { %v5723_v10 = vcombine.high %v579_v5, %v583_v6  ;;  %v635_v11 = vld [vmem:[%s7373_s1 + $0x408] sm:$0xff]  ;;  %v5722_v16 = vcombine.low %v579_v5, %v583_v6 }
  0xf4   : > { %2541 = vmatpush1.bf16.msra.mxu0 %v5904_v17  ;;  %v639_v12 = vld [vmem:[%s7373_s1 + $0x428] sm:$0xff] }
  0xf5   : > { %2582 = vmatpush1.bf16.msra.mxu1 %v5650_v19  ;;  %2608 = vmatprep.subr.bf16.mxu0 %v5835_v20  ;;  %v571_v13 = vld [vmem:[%s7373_s1 + $0x208] sm:$0xff]  ;;  %v5779_v17 = vcombine.high %v635_v11, %v639_v12  ;;  %v5778_v26 = vcombine.low %v635_v11, %v639_v12 }
  0xf6   : > { %2583 = vmatprep.subr.bf16.mxu1 %v5771_v22  ;;  %v575_v14 = vld [vmem:[%s7373_s1 + $0x228] sm:$0xff] }
  0xf7   : > { %2559 = vmatmul.mubr.bf16.vlgmr.msra.gmra.mxu0 %v7529_v25  ;;  %v5715_v19 = vcombine.high %v571_v13, %v575_v14  ;;  %v755_v20 = vld [vmem:[%s7373_s1 + $0x7c8] sm:$0xff]  ;;  %v5714_v55 = vcombine.low %v571_v13, %v575_v14 }
  0xf8   : > { %2609 = vmatpush1.bf16.msra.mxu0 %v5834_v27  ;;  %2640 = vmatprep.mubr.bf16.mxu0 %v7440_v61  ;;  %v759_v22 = vld [vmem:[%s7373_s1 + $0x7e8] sm:$0xff] }
  0xf9   : > { %2584 = vmatpush2.bf16.msra.mxu1 %v5770_v28  ;;  %2610 = vmatprep.subr.bf16.mxu0 %v5827_v56  ;;  %v819_v23 = vld [vmem:[%s7373_s1 + $0x9c8] sm:$0xff]  ;;  %v5899_v27 = vcombine.high %v755_v20, %v759_v22  ;;  %v5898_v32 = vcombine.low %v755_v20, %v759_v22 }
  0xfa   : > { %2585 = vmatprep.subr.bf16.mxu1 %v5763_v29  ;;  %v823_v24 = vld [vmem:[%s7373_s1 + $0x9e8] sm:$0xff] }
  0xfb   : > { %v5963_v28 = vcombine.high %v819_v23, %v823_v24  ;;  %v747_v56 = vld [vmem:[%s7373_s1 + $0x788] sm:$0xff]  ;;  %v5962_v33 = vcombine.low %v819_v23, %v823_v24 }
  0xfc   : > { %2611 = vmatpush1.bf16.msra.mxu0 %v5826_v35  ;;  %v751_v29 = vld [vmem:[%s7373_s1 + $0x7a8] sm:$0xff] }
  0xfd   : > { %2586 = vmatpush2.bf16.msra.mxu1 %v5762_v36  ;;  %2612 = vmatprep.subr.bf16.mxu0 %v5819_v37  ;;  %v811_v30 = vld [vmem:[%s7373_s1 + $0x988] sm:$0xff]  ;;  %v5891_v35 = vcombine.high %v747_v56, %v751_v29  ;;  %v5890_v41 = vcombine.low %v747_v56, %v751_v29  ;;  %v692_v56 = vld [vmem:[%s7373_s1 + $0x5d0] sm:$0xff] }
  0xfe   : > { %2587 = vmatprep.subr.bf16.mxu1 %v5755_v38  ;;  %v815_v31 = vld [vmem:[%s7373_s1 + $0x9a8] sm:$0xff]  ;;  %v696_v29 = vld [vmem:[%s7373_s1 + $0x5f0] sm:$0xff] }
  0xff   : > { %v5955_v36 = vcombine.high %v811_v30, %v815_v31  ;;  %v739_v37 = vld [vmem:[%s7373_s1 + $0x748] sm:$0xff]  ;;  %v5954_v42 = vcombine.low %v811_v30, %v815_v31 }
 0x100   : > { %2613 = vmatpush1.bf16.msra.mxu0 %v5818_v43  ;;  %v743_v38 = vld [vmem:[%s7373_s1 + $0x768] sm:$0xff] }
 0x101   : > { %2588 = vmatpush2.bf16.msra.mxu1 %v5754_v44  ;;  %2614 = vmatprep.subr.bf16.mxu0 %v5811_v45  ;;  %v803_v39 = vld [vmem:[%s7373_s1 + $0x948] sm:$0xff]  ;;  %v5883_v43 = vcombine.high %v739_v37, %v743_v38  ;;  %v5882_v49 = vcombine.low %v739_v37, %v743_v38  ;;  %v684_v37 = vld [vmem:[%s7373_s1 + $0x590] sm:$0xff] }
 0x102   : > { %2589 = vmatprep.subr.bf16.mxu1 %v5747_v46  ;;  %v807_v40 = vld [vmem:[%s7373_s1 + $0x968] sm:$0xff]  ;;  %v688_v38 = vld [vmem:[%s7373_s1 + $0x5b0] sm:$0xff] }
 0x103   : > { %v5947_v44 = vcombine.high %v803_v39, %v807_v40  ;;  %v731_v45 = vld [vmem:[%s7373_s1 + $0x708] sm:$0xff]  ;;  %v5946_v50 = vcombine.low %v803_v39, %v807_v40  ;;  %v5836_v40 = vcombine.low %v692_v56, %v696_v29 }
 0x104   : > { %2615 = vmatpush1.bf16.msra.mxu0 %v5810_v51  ;;  %v735_v46 = vld [vmem:[%s7373_s1 + $0x728] sm:$0xff] }
 0x105   : > { %2590 = vmatpush2.bf16.msra.mxu1 %v5746_v52  ;;  %2616 = vmatprep.subr.bf16.mxu0 %v5803_v53  ;;  %v795_v47 = vld [vmem:[%s7373_s1 + $0x908] sm:$0xff]  ;;  %v5875_v51 = vcombine.high %v731_v45, %v735_v46  ;;  %v5874_v59 = vcombine.low %v731_v45, %v735_v46  ;;  %v676_v45 = vld [vmem:[%s7373_s1 + $0x550] sm:$0xff] }
 0x106   : > { %2591 = vmatprep.subr.bf16.mxu1 %v5739_v54  ;;  %v799_v48 = vld [vmem:[%s7373_s1 + $0x928] sm:$0xff]  ;;  %v680_v46 = vld [vmem:[%s7373_s1 + $0x570] sm:$0xff] }
 0x107   : > { %v5939_v52 = vcombine.high %v795_v47, %v799_v48  ;;  %v723_v53 = vld [vmem:[%s7373_s1 + $0x6c8] sm:$0xff]  ;;  %v5938_v62 = vcombine.low %v795_v47, %v799_v48  ;;  %v5828_v48 = vcombine.low %v684_v37, %v688_v38 }
 0x108   : > { %2617 = vmatpush1.bf16.msra.mxu0 %v5802_v63  ;;  %v727_v54 = vld [vmem:[%s7373_s1 + $0x6e8] sm:$0xff] }
 0x109   : > { %2592 = vmatpush2.bf16.msra.mxu1 %v5738_v0  ;;  %2618 = vmatprep.subr.bf16.mxu0 %v5795_v1  ;;  %v787_v57 = vld [vmem:[%s7373_s1 + $0x8c8] sm:$0xff]  ;;  %v5867_v63 = vcombine.high %v723_v53, %v727_v54  ;;  %v5866_v5 = vcombine.low %v723_v53, %v727_v54  ;;  %v668_v53 = vld [vmem:[%s7373_s1 + $0x510] sm:$0xff] }
 0x10a   : > { %2593 = vmatprep.subr.bf16.mxu1 %v5731_v2  ;;  %v791_v58 = vld [vmem:[%s7373_s1 + $0x8e8] sm:$0xff]  ;;  %v672_v54 = vld [vmem:[%s7373_s1 + $0x530] sm:$0xff] }
 0x10b   : > { %v5931_v0 = vcombine.high %v787_v57, %v791_v58  ;;  %v715_v1 = vld [vmem:[%s7373_s1 + $0x688] sm:$0xff]  ;;  %v5930_v6 = vcombine.low %v787_v57, %v791_v58  ;;  %v5820_v58 = vcombine.low %v676_v45, %v680_v46 }
 0x10c   : > { %2619 = vmatpush1.bf16.msra.mxu0 %v5794_v7  ;;  %v719_v2 = vld [vmem:[%s7373_s1 + $0x6a8] sm:$0xff] }
 0x10d   : > { %2594 = vmatpush2.bf16.msra.mxu1 %v5730_v8  ;;  %2620 = vmatprep.subr.bf16.mxu0 %v5787_v9  ;;  %v779_v3 = vld [vmem:[%s7373_s1 + $0x888] sm:$0xff]  ;;  %v5859_v7 = vcombine.high %v715_v1, %v719_v2  ;;  %v5858_v13 = vcombine.low %v715_v1, %v719_v2  ;;  %v660_v1 = vld [vmem:[%s7373_s1 + $0x4d0] sm:$0xff] }
 0x10e   : > { %2595 = vmatprep.subr.bf16.mxu1 %v5723_v10  ;;  %v783_v4 = vld [vmem:[%s7373_s1 + $0x8a8] sm:$0xff]  ;;  %v664_v2 = vld [vmem:[%s7373_s1 + $0x4f0] sm:$0xff] }
 0x10f   : > { %v5923_v8 = vcombine.high %v779_v3, %v783_v4  ;;  %v707_v9 = vld [vmem:[%s7373_s1 + $0x648] sm:$0xff]  ;;  %v5922_v14 = vcombine.low %v779_v3, %v783_v4  ;;  %v5812_v4 = vcombine.low %v668_v53, %v672_v54 }
 0x110   : > { %2621 = vmatpush1.bf16.msra.mxu0 %v5786_v15  ;;  %v711_v10 = vld [vmem:[%s7373_s1 + $0x668] sm:$0xff] }
 0x111   : > { %2596 = vmatpush2.bf16.msra.mxu1 %v5722_v16  ;;  %2622 = vmatprep.subr.bf16.mxu0 %v5779_v17  ;;  %v771_v11 = vld [vmem:[%s7373_s1 + $0x848] sm:$0xff]  ;;  %v5851_v15 = vcombine.high %v707_v9, %v711_v10  ;;  %v5850_v23 = vcombine.low %v707_v9, %v711_v10  ;;  %v652_v9 = vld [vmem:[%s7373_s1 + $0x490] sm:$0xff] }
 0x112   : > { %2597 = vmatprep.subr.bf16.mxu1 %v5715_v19  ;;  %v775_v12 = vld [vmem:[%s7373_s1 + $0x868] sm:$0xff]  ;;  %v656_v10 = vld [vmem:[%s7373_s1 + $0x4b0] sm:$0xff] }
 0x113   : > { %v5915_v16 = vcombine.high %v771_v11, %v775_v12  ;;  %v699_v17 = vld [vmem:[%s7373_s1 + $0x608] sm:$0xff]  ;;  %v5914_v24 = vcombine.low %v771_v11, %v775_v12  ;;  %v5804_v12 = vcombine.low %v660_v1, %v664_v2 }
 0x114   : > { %2623 = vmatpush1.bf16.msra.mxu0 %v5778_v26  ;;  %v703_v19 = vld [vmem:[%s7373_s1 + $0x628] sm:$0xff] }
 0x115   : > { %2598 = vmatpush2.bf16.msra.mxu1 %v5714_v55  ;;  %2624 = vmatprep.subr.bf16.mxu0 %v5899_v27  ;;  %v763_v20 = vld [vmem:[%s7373_s1 + $0x808] sm:$0xff]  ;;  %v5843_v26 = vcombine.high %v699_v17, %v703_v19  ;;  %v564_v27 = vld [vmem:[%s7373_s1 + $0x1d0] sm:$0xff]  ;;  %v5842_v30 = vcombine.low %v699_v17, %v703_v19 }
 0x116   : > { %2649 = vmatprep.subr.bf16.mxu1 %v5963_v28  ;;  %v767_v22 = vld [vmem:[%s7373_s1 + $0x828] sm:$0xff]  ;;  %v568_v28 = vld [vmem:[%s7373_s1 + $0x1f0] sm:$0xff] }
 0x117   : > { %v5907_v55 = vcombine.high %v763_v20, %v767_v22  ;;  %v5906_v31 = vcombine.low %v763_v20, %v767_v22  ;;  %v5708_v39 = vcombine.low %v564_v27, %v568_v28  ;;  %v644_v17 = vld [vmem:[%s7373_s1 + $0x450] sm:$0xff]  ;;  %v5796_v22 = vcombine.low %v652_v9, %v656_v10 }
 0x118   : > { %2600 = vmatmul.mubr.bf16.vlgmr.msra.gmra.mxu1 %v7486_v18  ;;  %2625 = vmatpush2.bf16.msra.mxu0 %v5898_v32  ;;  %v5709_v32 = vcombine.high %v564_v27, %v568_v28  ;;  %v648_v19 = vld [vmem:[%s7373_s1 + $0x470] sm:$0xff] }
 0x119   : > { %2650 = vmatpush1.bf16.msra.mxu1 %v5962_v33  ;;  %2626 = vmatprep.subr.bf16.mxu0 %v5891_v35  ;;  %v5837_v33 = vcombine.high %v692_v56, %v696_v29  ;;  %v556_v35 = vld [vmem:[%s7373_s1 + $0x190] sm:$0xff]  ;;  %v5788_v29 = vcombine.low %v644_v17, %v648_v19 }
 0x11a   : > { %2651 = vmatprep.subr.bf16.mxu1 %v5955_v36  ;;  %2681 = vmatprep.mubr.bf16.mxu1 %v7177_v34  ;;  %v560_v36 = vld [vmem:[%s7373_s1 + $0x1b0] sm:$0xff] }
 0x11b   : > { %v5700_v47 = vcombine.low %v556_v35, %v560_v36  ;;  %v636_v27 = vld [vmem:[%s7373_s1 + $0x410] sm:$0xff] }
 0x11c   : > { %2627 = vmatpush2.bf16.msra.mxu0 %v5890_v41  ;;  %v5701_v41 = vcombine.high %v556_v35, %v560_v36  ;;  %v640_v28 = vld [vmem:[%s7373_s1 + $0x430] sm:$0xff] }
 0x11d   : > { %2652 = vmatpush1.bf16.msra.mxu1 %v5954_v42  ;;  %2628 = vmatprep.subr.bf16.mxu0 %v5883_v43  ;;  %v5829_v42 = vcombine.high %v684_v37, %v688_v38  ;;  %v548_v43 = vld [vmem:[%s7373_s1 + $0x150] sm:$0xff]  ;;  %v5780_v38 = vcombine.low %v636_v27, %v640_v28 }
 0x11e   : > { %2653 = vmatprep.subr.bf16.mxu1 %v5947_v44  ;;  %v552_v44 = vld [vmem:[%s7373_s1 + $0x170] sm:$0xff] }
 0x11f   : > { %v5692_v57 = vcombine.low %v548_v43, %v552_v44  ;;  %v756_v35 = vld [vmem:[%s7373_s1 + $0x7d0] sm:$0xff] }
 0x120   : > { %2629 = vmatpush2.bf16.msra.mxu0 %v5882_v49  ;;  %v5693_v49 = vcombine.high %v548_v43, %v552_v44  ;;  %v760_v36 = vld [vmem:[%s7373_s1 + $0x7f0] sm:$0xff] }
 0x121   : > { %2654 = vmatpush1.bf16.msra.mxu1 %v5946_v50  ;;  %2630 = vmatprep.subr.bf16.mxu0 %v5875_v51  ;;  %v5821_v50 = vcombine.high %v676_v45, %v680_v46  ;;  %v540_v51 = vld [vmem:[%s7373_s1 + $0x110] sm:$0xff]  ;;  %v5900_v46 = vcombine.low %v756_v35, %v760_v36 }
 0x122   : > { %2655 = vmatprep.subr.bf16.mxu1 %v5939_v52  ;;  %v544_v52 = vld [vmem:[%s7373_s1 + $0x130] sm:$0xff] }
 0x123   : > { %v5684_v3 = vcombine.low %v540_v51, %v544_v52  ;;  %v748_v43 = vld [vmem:[%s7373_s1 + $0x790] sm:$0xff] }
 0x124   : > { %2631 = vmatpush2.bf16.msra.mxu0 %v5874_v59  ;;  %v5685_v59 = vcombine.high %v540_v51, %v544_v52  ;;  %v752_v44 = vld [vmem:[%s7373_s1 + $0x7b0] sm:$0xff] }
 0x125   : > { %2656 = vmatpush1.bf16.msra.mxu1 %v5938_v62  ;;  %2632 = vmatprep.subr.bf16.mxu0 %v5867_v63  ;;  %v5813_v62 = vcombine.high %v668_v53, %v672_v54  ;;  %v532_v63 = vld [vmem:[%s7373_s1 + $0xd0] sm:$0xff]  ;;  %v5892_v54 = vcombine.low %v748_v43, %v752_v44 }
 0x126   : > { %2657 = vmatprep.subr.bf16.mxu1 %v5931_v0  ;;  %v536_v0 = vld [vmem:[%s7373_s1 + $0xf0] sm:$0xff] }
 0x127   : > { %v5676_v11 = vcombine.low %v532_v63, %v536_v0  ;;  %v740_v51 = vld [vmem:[%s7373_s1 + $0x750] sm:$0xff] }
 0x128   : > { %2633 = vmatpush2.bf16.msra.mxu0 %v5866_v5  ;;  %v5677_v5 = vcombine.high %v532_v63, %v536_v0  ;;  %v744_v52 = vld [vmem:[%s7373_s1 + $0x770] sm:$0xff] }
 0x129   : > { %2658 = vmatpush1.bf16.msra.mxu1 %v5930_v6  ;;  %2634 = vmatprep.subr.bf16.mxu0 %v5859_v7  ;;  %v5805_v6 = vcombine.high %v660_v1, %v664_v2  ;;  %v524_v7 = vld [vmem:[%s7373_s1 + $0x90] sm:$0xff]  ;;  %v5884_v2 = vcombine.low %v740_v51, %v744_v52 }
 0x12a   : > { %2659 = vmatprep.subr.bf16.mxu1 %v5923_v8  ;;  %v528_v8 = vld [vmem:[%s7373_s1 + $0xb0] sm:$0xff] }
 0x12b   : > { %v5668_v20 = vcombine.low %v524_v7, %v528_v8  ;;  %v732_v63 = vld [vmem:[%s7373_s1 + $0x710] sm:$0xff] }
 0x12c   : > { %2635 = vmatpush2.bf16.msra.mxu0 %v5858_v13  ;;  %v5669_v13 = vcombine.high %v524_v7, %v528_v8  ;;  %v736_v0 = vld [vmem:[%s7373_s1 + $0x730] sm:$0xff] }
 0x12d   : > { %2660 = vmatpush1.bf16.msra.mxu1 %v5922_v14  ;;  %2636 = vmatprep.subr.bf16.mxu0 %v5851_v15  ;;  %v5797_v14 = vcombine.high %v652_v9, %v656_v10  ;;  %v516_v15 = vld [vmem:[%s7373_s1 + $0x50] sm:$0xff]  ;;  %v5876_v10 = vcombine.low %v732_v63, %v736_v0 }
 0x12e   : > { %2661 = vmatprep.subr.bf16.mxu1 %v5915_v16  ;;  %v520_v16 = vld [vmem:[%s7373_s1 + $0x70] sm:$0xff] }
 0x12f   : > { %v5660_v56 = vcombine.low %v516_v15, %v520_v16  ;;  %v724_v7 = vld [vmem:[%s7373_s1 + $0x6d0] sm:$0xff] }
 0x130   : > { %2637 = vmatpush2.bf16.msra.mxu0 %v5850_v23  ;;  %v5661_v23 = vcombine.high %v516_v15, %v520_v16  ;;  %v728_v8 = vld [vmem:[%s7373_s1 + $0x6f0] sm:$0xff] }
 0x131   : > { %2662 = vmatpush1.bf16.msra.mxu1 %v5914_v24  ;;  %2638 = vmatprep.subr.bf16.mxu0 %v5843_v26  ;;  %v5789_v24 = vcombine.high %v644_v17, %v648_v19  ;;  %v508_v26 = vld [vmem:[%s7373_s1 + $0x10] sm:$0xff]  ;;  %v5868_v19 = vcombine.low %v724_v7, %v728_v8 }
 0x132   : > { %2663 = vmatprep.subr.bf16.mxu1 %v5907_v55  ;;  %v512_v55 = vld [vmem:[%s7373_s1 + $0x30] sm:$0xff] }
 0x133   : > { %v5652_v37 = vcombine.low %v508_v26, %v512_v55  ;;  %v716_v15 = vld [vmem:[%s7373_s1 + $0x690] sm:$0xff] }
 0x134   : > { %2639 = vmatpush2.bf16.msra.mxu0 %v5842_v30  ;;  %v5653_v30 = vcombine.high %v508_v26, %v512_v55  ;;  %v720_v16 = vld [vmem:[%s7373_s1 + $0x6b0] sm:$0xff] }
 0x135   : > { %2664 = vmatpush1.bf16.msra.mxu1 %v5906_v31  ;;  %2690 = vmatprep.subr.bf16.mxu0 %v5709_v32  ;;  %v5781_v31 = vcombine.high %v636_v27, %v640_v28  ;;  %v628_v32 = vld [vmem:[%s7373_s1 + $0x3d0] sm:$0xff]  ;;  %v5860_v28 = vcombine.low %v716_v15, %v720_v16 }
 0x136   : > { %2731 = vmatprep.subr.bf16.mxu1 %v5837_v33  ;;  %v632_v33 = vld [vmem:[%s7373_s1 + $0x3f0] sm:$0xff] }
 0x137   : > { %2641 = vmatmul.mubr.bf16.vlgmr.msra.gmra.mxu0 %v7492_v21  ;;  %v5772_v45 = vcombine.low %v628_v32, %v632_v33  ;;  %v708_v26 = vld [vmem:[%s7373_s1 + $0x650] sm:$0xff] }
 0x138   : > { %2682 = vmatmul.mubr.bf16.vlgmr.msra.gmra.mxu1 %v7529_v25  ;;  %2691 = vmatpush1.bf16.msra.mxu0 %v5708_v39  ;;  %v5773_v39 = vcombine.high %v628_v32, %v632_v33  ;;  %v712_v55 = vld [vmem:[%s7373_s1 + $0x670] sm:$0xff] }
 0x139   : > { %2732 = vmatpush1.bf16.msra.mxu1 %v5836_v40  ;;  %2692 = vmatprep.subr.bf16.mxu0 %v5701_v41  ;;  %v5901_v40 = vcombine.high %v756_v35, %v760_v36  ;;  %v620_v41 = vld [vmem:[%s7373_s1 + $0x390] sm:$0xff]  ;;  %v5852_v36 = vcombine.low %v708_v26, %v712_v55 }
 0x13a   : > { %2733 = vmatprep.subr.bf16.mxu1 %v5829_v42  ;;  %2722 = vmatprep.mubr.bf16.mxu0 %v7436_v60  ;;  %v624_v42 = vld [vmem:[%s7373_s1 + $0x3b0] sm:$0xff] }
 0x13b   : > { %2763 = vmatprep.mubr.bf16.mxu1 %v7440_v61  ;;  %v5764_v53 = vcombine.low %v620_v41, %v624_v42  ;;  %v700_v32 = vld [vmem:[%s7373_s1 + $0x610] sm:$0xff] }
 0x13c   : > { %2693 = vmatpush1.bf16.msra.mxu0 %v5700_v47  ;;  %v5765_v47 = vcombine.high %v620_v41, %v624_v42  ;;  %v704_v33 = vld [vmem:[%s7373_s1 + $0x630] sm:$0xff]  ;;  %v565_v41 = vld [vmem:[%s7373_s1 + $0x1d8] sm:$0xff] }
 0x13d   : > { %2734 = vmatpush1.bf16.msra.mxu1 %v5828_v48  ;;  %2694 = vmatprep.subr.bf16.mxu0 %v5693_v49  ;;  %v5893_v48 = vcombine.high %v748_v43, %v752_v44  ;;  %v612_v49 = vld [vmem:[%s7373_s1 + $0x350] sm:$0xff]  ;;  %v569_v42 = vld [vmem:[%s7373_s1 + $0x1f8] sm:$0xff]  ;;  %v5844_v44 = vcombine.low %v700_v32, %v704_v33 }
 0x13e   : > { %2735 = vmatprep.subr.bf16.mxu1 %v5821_v50  ;;  %v616_v50 = vld [vmem:[%s7373_s1 + $0x370] sm:$0xff] }
 0x13f   : > { %v5756_v1 = vcombine.low %v612_v49, %v616_v50 }
 0x140   : > { %2695 = vmatpush1.bf16.msra.mxu0 %v5692_v57  ;;  %v5757_v57 = vcombine.high %v612_v49, %v616_v50  ;;  %v557_v49 = vld [vmem:[%s7373_s1 + $0x198] sm:$0xff] }
 0x141   : > { %2736 = vmatpush1.bf16.msra.mxu1 %v5820_v58  ;;  %2696 = vmatprep.subr.bf16.mxu0 %v5685_v59  ;;  %v5885_v58 = vcombine.high %v740_v51, %v744_v52  ;;  %v604_v59 = vld [vmem:[%s7373_s1 + $0x310] sm:$0xff]  ;;  %v561_v50 = vld [vmem:[%s7373_s1 + $0x1b8] sm:$0xff]  ;;  %v5710_v52 = vcombine.low %v565_v41, %v569_v42 }
 0x142   : > { %2737 = vmatprep.subr.bf16.mxu1 %v5813_v62  ;;  %v608_v62 = vld [vmem:[%s7373_s1 + $0x330] sm:$0xff] }
 0x143   : > { %v5748_v9 = vcombine.low %v604_v59, %v608_v62 }
 0x144   : > { %2697 = vmatpush1.bf16.msra.mxu0 %v5684_v3  ;;  %v5749_v3 = vcombine.high %v604_v59, %v608_v62  ;;  %v549_v59 = vld [vmem:[%s7373_s1 + $0x158] sm:$0xff] }
 0x145   : > { %2738 = vmatpush1.bf16.msra.mxu1 %v5812_v4  ;;  %2698 = vmatprep.subr.bf16.mxu0 %v5677_v5  ;;  %v5877_v4 = vcombine.high %v732_v63, %v736_v0  ;;  %v596_v5 = vld [vmem:[%s7373_s1 + $0x2d0] sm:$0xff]  ;;  %v553_v62 = vld [vmem:[%s7373_s1 + $0x178] sm:$0xff]  ;;  %v5702_v0 = vcombine.low %v557_v49, %v561_v50 }
 0x146   : > { %2739 = vmatprep.subr.bf16.mxu1 %v5805_v6  ;;  %v600_v6 = vld [vmem:[%s7373_s1 + $0x2f0] sm:$0xff] }
 0x147   : > { %v5740_v17 = vcombine.low %v596_v5, %v600_v6 }
 0x148   : > { %2699 = vmatpush1.bf16.msra.mxu0 %v5676_v11  ;;  %v5741_v11 = vcombine.high %v596_v5, %v600_v6  ;;  %v541_v5 = vld [vmem:[%s7373_s1 + $0x118] sm:$0xff] }
 0x149   : > { %2740 = vmatpush1.bf16.msra.mxu1 %v5804_v12  ;;  %2700 = vmatprep.subr.bf16.mxu0 %v5669_v13  ;;  %v5869_v12 = vcombine.high %v724_v7, %v728_v8  ;;  %v588_v13 = vld [vmem:[%s7373_s1 + $0x290] sm:$0xff]  ;;  %v545_v6 = vld [vmem:[%s7373_s1 + $0x138] sm:$0xff]  ;;  %v5694_v8 = vcombine.low %v549_v59, %v553_v62 }
 0x14a   : > { %2741 = vmatprep.subr.bf16.mxu1 %v5797_v14  ;;  %v592_v14 = vld [vmem:[%s7373_s1 + $0x2b0] sm:$0xff] }
 0x14b   : > { %v5732_v27 = vcombine.low %v588_v13, %v592_v14 }
 0x14c   : > { %2701 = vmatpush1.bf16.msra.mxu0 %v5668_v20  ;;  %v5733_v20 = vcombine.high %v588_v13, %v592_v14  ;;  %v533_v13 = vld [vmem:[%s7373_s1 + $0xd8] sm:$0xff] }
 0x14d   : > { %2742 = vmatpush1.bf16.msra.mxu1 %v5796_v22  ;;  %2702 = vmatprep.subr.bf16.mxu0 %v5661_v23  ;;  %v5861_v22 = vcombine.high %v716_v15, %v720_v16  ;;  %v580_v23 = vld [vmem:[%s7373_s1 + $0x250] sm:$0xff]  ;;  %v537_v14 = vld [vmem:[%s7373_s1 + $0xf8] sm:$0xff] }
 0x14e   : > { %2743 = vmatprep.subr.bf16.mxu1 %v5789_v24  ;;  %v584_v24 = vld [vmem:[%s7373_s1 + $0x270] sm:$0xff] }
 0x14f   : > { %v5724_v35 = vcombine.low %v580_v23, %v584_v24 }
 0x150   : > { %2703 = vmatpush1.bf16.msra.mxu0 %v5660_v56  ;;  %v5725_v56 = vcombine.high %v580_v23, %v584_v24  ;;  %v529_v23 = vld [vmem:[%s7373_s1 + $0xb8] sm:$0xff] }
 0x151   : > { %2744 = vmatpush1.bf16.msra.mxu1 %v5788_v29  ;;  %2704 = vmatprep.subr.bf16.mxu0 %v5653_v30  ;;  %v5853_v29 = vcombine.high %v708_v26, %v712_v55  ;;  %v572_v30 = vld [vmem:[%s7373_s1 + $0x210] sm:$0xff]  ;;  %v5678_v26 = vcombine.low %v533_v13, %v537_v14 }
 0x152   : > { %2745 = vmatprep.subr.bf16.mxu1 %v5781_v31  ;;  %v576_v31 = vld [vmem:[%s7373_s1 + $0x230] sm:$0xff] }
 0x153   : > { %v5716_v43 = vcombine.low %v572_v30, %v576_v31 }
 0x154   : > { %2705 = vmatpush1.bf16.msra.mxu0 %v5652_v37  ;;  %v5717_v37 = vcombine.high %v572_v30, %v576_v31  ;;  %v521_v30 = vld [vmem:[%s7373_s1 + $0x78] sm:$0xff] }
 0x155   : > { %2746 = vmatpush1.bf16.msra.mxu1 %v5780_v38  ;;  %2706 = vmatprep.subr.bf16.mxu0 %v5773_v39  ;;  %v5845_v38 = vcombine.high %v700_v32, %v704_v33  ;;  %v820_v39 = vld [vmem:[%s7373_s1 + $0x9d0] sm:$0xff] }
 0x156   : > { %2747 = vmatprep.subr.bf16.mxu1 %v5901_v40  ;;  %v824_v40 = vld [vmem:[%s7373_s1 + $0x9f0] sm:$0xff] }
 0x157   : > { %v5964_v51 = vcombine.low %v820_v39, %v824_v40 }
 0x158   : > { %2707 = vmatpush2.bf16.msra.mxu0 %v5772_v45  ;;  %v5965_v45 = vcombine.high %v820_v39, %v824_v40  ;;  %v513_v39 = vld [vmem:[%s7373_s1 + $0x38] sm:$0xff] }
 0x159   : > { %2748 = vmatpush2.bf16.msra.mxu1 %v5900_v46  ;;  %2708 = vmatprep.subr.bf16.mxu0 %v5765_v47  ;;  %v5711_v46 = vcombine.high %v565_v41, %v569_v42  ;;  %v812_v47 = vld [vmem:[%s7373_s1 + $0x990] sm:$0xff] }
 0x15a   : > { %2749 = vmatprep.subr.bf16.mxu1 %v5893_v48  ;;  %v816_v48 = vld [vmem:[%s7373_s1 + $0x9b0] sm:$0xff] }
 0x15b   : > { %v5956_v63 = vcombine.low %v812_v47, %v816_v48 }
 0x15c   : > { %2709 = vmatpush2.bf16.msra.mxu0 %v5764_v53  ;;  %v5957_v53 = vcombine.high %v812_v47, %v816_v48  ;;  %v633_v47 = vld [vmem:[%s7373_s1 + $0x3f8] sm:$0xff] }
 0x15d   : > { %2750 = vmatpush2.bf16.msra.mxu1 %v5892_v54  ;;  %2710 = vmatprep.subr.bf16.mxu0 %v5757_v57  ;;  %v5703_v54 = vcombine.high %v557_v49, %v561_v50  ;;  %v804_v57 = vld [vmem:[%s7373_s1 + $0x950] sm:$0xff] }
 0x15e   : > { %2751 = vmatprep.subr.bf16.mxu1 %v5885_v58  ;;  %v808_v58 = vld [vmem:[%s7373_s1 + $0x970] sm:$0xff] }
 0x15f   : > { %v5948_v7 = vcombine.low %v804_v57, %v808_v58 }
 0x160   : > { %2711 = vmatpush2.bf16.msra.mxu0 %v5756_v1  ;;  %v5949_v1 = vcombine.high %v804_v57, %v808_v58  ;;  %v625_v57 = vld [vmem:[%s7373_s1 + $0x3b8] sm:$0xff] }
 0x161   : > { %2752 = vmatpush2.bf16.msra.mxu1 %v5884_v2  ;;  %2712 = vmatprep.subr.bf16.mxu0 %v5749_v3  ;;  %v5695_v2 = vcombine.high %v549_v59, %v553_v62  ;;  %v796_v3 = vld [vmem:[%s7373_s1 + $0x910] sm:$0xff] }
 0x162   : > { %2753 = vmatprep.subr.bf16.mxu1 %v5877_v4  ;;  %v800_v4 = vld [vmem:[%s7373_s1 + $0x930] sm:$0xff] }
 0x163   : > { %v5940_v15 = vcombine.low %v796_v3, %v800_v4 }
 0x164   : > { %2713 = vmatpush2.bf16.msra.mxu0 %v5748_v9  ;;  %v5941_v9 = vcombine.high %v796_v3, %v800_v4  ;;  %v613_v3 = vld [vmem:[%s7373_s1 + $0x358] sm:$0xff] }
 0x165   : > { %2754 = vmatpush2.bf16.msra.mxu1 %v5876_v10  ;;  %2714 = vmatprep.subr.bf16.mxu0 %v5741_v11  ;;  %v5687_v10 = vcombine.high %v541_v5, %v545_v6  ;;  %v788_v11 = vld [vmem:[%s7373_s1 + $0x8d0] sm:$0xff]  ;;  %v617_v4 = vld [vmem:[%s7373_s1 + $0x378] sm:$0xff] }
 0x166   : > { %2755 = vmatprep.subr.bf16.mxu1 %v5869_v12  ;;  %v792_v12 = vld [vmem:[%s7373_s1 + $0x8f0] sm:$0xff] }
 0x167   : > { %v5933_v16 = vcombine.high %v788_v11, %v792_v12  ;;  %v5932_v24 = vcombine.low %v788_v11, %v792_v12  ;;  %v669_v11 = vld [vmem:[%s7373_s1 + $0x518] sm:$0xff] }
 0x168   : > { %2715 = vmatpush2.bf16.msra.mxu0 %v5740_v17  ;;  %v5679_v17 = vcombine.high %v533_v13, %v537_v14  ;;  %v673_v12 = vld [vmem:[%s7373_s1 + $0x538] sm:$0xff] }
 0x169   : > { %2756 = vmatpush2.bf16.msra.mxu1 %v5868_v19  ;;  %2716 = vmatprep.subr.bf16.mxu0 %v5733_v20  ;;  %v780_v19 = vld [vmem:[%s7373_s1 + $0x890] sm:$0xff]  ;;  %v605_v14 = vld [vmem:[%s7373_s1 + $0x318] sm:$0xff] }
 0x16a   : > { %2757 = vmatprep.subr.bf16.mxu1 %v5861_v22  ;;  %v784_v20 = vld [vmem:[%s7373_s1 + $0x8b0] sm:$0xff]  ;;  %v525_v22 = vld [vmem:[%s7373_s1 + $0x98] sm:$0xff] }
 0x16b   : > { %v5925_v55 = vcombine.high %v780_v19, %v784_v20  ;;  %v5924_v31 = vcombine.low %v780_v19, %v784_v20  ;;  %v5670_v32 = vcombine.low %v525_v22, %v529_v23  ;;  %v5815_v19 = vcombine.high %v669_v11, %v673_v12 }
 0x16c   : > { %2717 = vmatpush2.bf16.msra.mxu0 %v5732_v27  ;;  %v5671_v27 = vcombine.high %v525_v22, %v529_v23  ;;  %v661_v23 = vld [vmem:[%s7373_s1 + $0x4d8] sm:$0xff] }
 0x16d   : > { %2758 = vmatpush2.bf16.msra.mxu1 %v5860_v28  ;;  %2718 = vmatprep.subr.bf16.mxu0 %v5725_v56  ;;  %v772_v28 = vld [vmem:[%s7373_s1 + $0x850] sm:$0xff] }
 0x16e   : > { %2759 = vmatprep.subr.bf16.mxu1 %v5853_v29  ;;  %v776_v56 = vld [vmem:[%s7373_s1 + $0x870] sm:$0xff]  ;;  %v517_v29 = vld [vmem:[%s7373_s1 + $0x58] sm:$0xff] }
 0x16f   : > { %v5917_v33 = vcombine.high %v772_v28, %v776_v56  ;;  %v5916_v40 = vcombine.low %v772_v28, %v776_v56  ;;  %v5662_v41 = vcombine.low %v517_v29, %v521_v30 }
 0x170   : > { %2719 = vmatpush2.bf16.msra.mxu0 %v5724_v35  ;;  %v5663_v35 = vcombine.high %v517_v29, %v521_v30  ;;  %v653_v30 = vld [vmem:[%s7373_s1 + $0x498] sm:$0xff] }
 0x171   : > { %2760 = vmatpush2.bf16.msra.mxu1 %v5852_v36  ;;  %2720 = vmatprep.subr.bf16.mxu0 %v5717_v37  ;;  %v764_v36 = vld [vmem:[%s7373_s1 + $0x810] sm:$0xff] }
 0x172   : > { %2761 = vmatprep.subr.bf16.mxu1 %v5845_v38  ;;  %v768_v37 = vld [vmem:[%s7373_s1 + $0x830] sm:$0xff]  ;;  %v509_v38 = vld [vmem:[%s7373_s1 + $0x18] sm:$0xff] }
 0x173   : > { %v5909_v42 = vcombine.high %v764_v36, %v768_v37  ;;  %v5908_v48 = vcombine.low %v764_v36, %v768_v37  ;;  %v5654_v49 = vcombine.low %v509_v38, %v513_v39 }
 0x174   : > { %2721 = vmatpush2.bf16.msra.mxu0 %v5716_v43  ;;  %v5655_v43 = vcombine.high %v509_v38, %v513_v39  ;;  %v645_v39 = vld [vmem:[%s7373_s1 + $0x458] sm:$0xff] }
 0x175   : > { %2762 = vmatpush2.bf16.msra.mxu1 %v5844_v44  ;;  %2772 = vmatprep.subr.bf16.mxu0 %v5965_v45  ;;  %v693_v44 = vld [vmem:[%s7373_s1 + $0x5d8] sm:$0xff] }
 0x176   : > { %2813 = vmatprep.subr.bf16.mxu1 %v5711_v46  ;;  %v697_v45 = vld [vmem:[%s7373_s1 + $0x5f8] sm:$0xff] }
 0x177   : > { %2723 = vmatmul.mubr.bf16.vlgmr.msra.gmra.mxu0 %v7486_v18  ;;  %v629_v46 = vld [vmem:[%s7373_s1 + $0x3d8] sm:$0xff]  ;;  %v5839_v50 = vcombine.high %v693_v44, %v697_v45  ;;  %v5838_v58 = vcombine.low %v693_v44, %v697_v45 }
 0x178   : > { %2764 = vmatmul.mubr.bf16.vlgmr.msra.gmra.mxu1 %v7492_v21  ;;  %2773 = vmatpush1.bf16.msra.mxu0 %v5964_v51  ;;  %v5775_v51 = vcombine.high %v629_v46, %v633_v47  ;;  %v5774_v59 = vcombine.low %v629_v46, %v633_v47  ;;  %v637_v47 = vld [vmem:[%s7373_s1 + $0x418] sm:$0xff] }
 0x179   : > { %2814 = vmatpush1.bf16.msra.mxu1 %v5710_v52  ;;  %2774 = vmatprep.subr.bf16.mxu0 %v5957_v53  ;;  %v685_v52 = vld [vmem:[%s7373_s1 + $0x598] sm:$0xff] }
 0x17a   : > { %2815 = vmatprep.subr.bf16.mxu1 %v5703_v54  ;;  %2804 = vmatprep.mubr.bf16.mxu0 %v7177_v34  ;;  %v689_v53 = vld [vmem:[%s7373_s1 + $0x5b8] sm:$0xff] }
 0x17b   : > { %2845 = vmatprep.mubr.bf16.mxu1 %v7436_v60  ;;  %v5686_v60 = vcombine.low %v541_v5, %v545_v6  ;;  %v621_v54 = vld [vmem:[%s7373_s1 + $0x398] sm:$0xff]  ;;  %v5831_v62 = vcombine.high %v685_v52, %v689_v53  ;;  %v5830_v6 = vcombine.low %v685_v52, %v689_v53 }
 0x17c   : > { %2775 = vmatpush1.bf16.msra.mxu0 %v5956_v63  ;;  %v5767_v63 = vcombine.high %v621_v54, %v625_v57 }
 0x17d   : > { %2816 = vmatpush1.bf16.msra.mxu1 %v5702_v0  ;;  %2776 = vmatprep.subr.bf16.mxu0 %v5949_v1  ;;  %v677_v0 = vld [vmem:[%s7373_s1 + $0x558] sm:$0xff] }
 0x17e   : > { %2817 = vmatprep.subr.bf16.mxu1 %v5695_v2  ;;  %v681_v1 = vld [vmem:[%s7373_s1 + $0x578] sm:$0xff] }
 0x180   : > { %2777 = vmatpush1.bf16.msra.mxu0 %v5948_v7 }
 0x181   : > { %2818 = vmatpush1.bf16.msra.mxu1 %v5694_v8  ;;  %2778 = vmatprep.subr.bf16.mxu0 %v5941_v9  ;;  %v5766_v8 = vcombine.low %v621_v54, %v625_v57  ;;  %v5823_v9 = vcombine.high %v677_v0, %v681_v1  ;;  %v757_v57 = vld [vmem:[%s7373_s1 + $0x7d8] sm:$0xff] }
 0x182   : > { %2819 = vmatprep.subr.bf16.mxu1 %v5687_v10 }
 0x184   : > { %2779 = vmatpush1.bf16.msra.mxu0 %v5940_v15  ;;  %v609_v15 = vld [vmem:[%s7373_s1 + $0x338] sm:$0xff] }
 0x185   : > { %2820 = vmatpush1.bf16.msra.mxu1 %v5686_v60  ;;  %2780 = vmatprep.subr.bf16.mxu0 %v5933_v16  ;;  %v5822_v60 = vcombine.low %v677_v0, %v681_v1  ;;  %v5751_v22 = vcombine.high %v605_v14, %v609_v15  ;;  %v5750_v28 = vcombine.low %v605_v14, %v609_v15  ;;  %v741_v15 = vld [vmem:[%s7373_s1 + $0x758] sm:$0xff] }
 0x186   : > { %2821 = vmatprep.subr.bf16.mxu1 %v5679_v17  ;;  %v5758_v17 = vcombine.low %v613_v3, %v617_v4 }
 0x188   : > { %2781 = vmatpush1.bf16.msra.mxu0 %v5932_v24  ;;  %v665_v24 = vld [vmem:[%s7373_s1 + $0x4f8] sm:$0xff] }
 0x189   : > { %2822 = vmatpush1.bf16.msra.mxu1 %v5678_v26  ;;  %2782 = vmatprep.subr.bf16.mxu0 %v5925_v55  ;;  %v597_v26 = vld [vmem:[%s7373_s1 + $0x2d8] sm:$0xff]  ;;  %v5807_v56 = vcombine.high %v661_v23, %v665_v24 }
 0x18a   : > { %2823 = vmatprep.subr.bf16.mxu1 %v5671_v27  ;;  %v601_v55 = vld [vmem:[%s7373_s1 + $0x2f8] sm:$0xff]  ;;  %v5814_v27 = vcombine.low %v669_v11, %v673_v12 }
 0x18b   : > { %v5743_v29 = vcombine.high %v597_v26, %v601_v55  ;;  %v5742_v36 = vcombine.low %v597_v26, %v601_v55 }
 0x18c   : > { %2783 = vmatpush1.bf16.msra.mxu0 %v5924_v31  ;;  %v657_v31 = vld [vmem:[%s7373_s1 + $0x4b8] sm:$0xff] }
 0x18d   : > { %2824 = vmatpush1.bf16.msra.mxu1 %v5670_v32  ;;  %2784 = vmatprep.subr.bf16.mxu0 %v5917_v33  ;;  %v589_v32 = vld [vmem:[%s7373_s1 + $0x298] sm:$0xff]  ;;  %v5799_v37 = vcombine.high %v653_v30, %v657_v31 }
 0x18e   : > { %2825 = vmatprep.subr.bf16.mxu1 %v5663_v35  ;;  %v593_v33 = vld [vmem:[%s7373_s1 + $0x2b8] sm:$0xff]  ;;  %v5806_v35 = vcombine.low %v661_v23, %v665_v24 }
 0x18f   : > { %v5735_v38 = vcombine.high %v589_v32, %v593_v33  ;;  %v5734_v44 = vcombine.low %v589_v32, %v593_v33 }
 0x190   : > { %2785 = vmatpush1.bf16.msra.mxu0 %v5916_v40  ;;  %v649_v40 = vld [vmem:[%s7373_s1 + $0x478] sm:$0xff] }
 0x191   : > { %2826 = vmatpush1.bf16.msra.mxu1 %v5662_v41  ;;  %2786 = vmatprep.subr.bf16.mxu0 %v5909_v42  ;;  %v581_v41 = vld [vmem:[%s7373_s1 + $0x258] sm:$0xff]  ;;  %v5791_v45 = vcombine.high %v645_v39, %v649_v40 }
 0x192   : > { %2827 = vmatprep.subr.bf16.mxu1 %v5655_v43  ;;  %v585_v42 = vld [vmem:[%s7373_s1 + $0x278] sm:$0xff]  ;;  %v5798_v43 = vcombine.low %v653_v30, %v657_v31 }
 0x193   : > { %v5727_v46 = vcombine.high %v581_v41, %v585_v42  ;;  %v5726_v52 = vcombine.low %v581_v41, %v585_v42 }
 0x194   : > { %2787 = vmatpush1.bf16.msra.mxu0 %v5908_v48  ;;  %v641_v48 = vld [vmem:[%s7373_s1 + $0x438] sm:$0xff] }
 0x195   : > { %2828 = vmatpush1.bf16.msra.mxu1 %v5654_v49  ;;  %2854 = vmatprep.subr.bf16.mxu0 %v5839_v50  ;;  %v573_v49 = vld [vmem:[%s7373_s1 + $0x218] sm:$0xff]  ;;  %v5783_v53 = vcombine.high %v637_v47, %v641_v48 }
 0x196   : > { %2829 = vmatprep.subr.bf16.mxu1 %v5775_v51  ;;  %v577_v50 = vld [vmem:[%s7373_s1 + $0x238] sm:$0xff]  ;;  %v5790_v51 = vcombine.low %v645_v39, %v649_v40 }
 0x197   : > { %v7707_v2 = vpop.f32.mrf.mxu0  ;;  %2805 = vmatmul.mubr.bf16.vlgmr.msra.gmra.mxu0 %v7529_v25  ;;  %v5759_v25 = vcombine.high %v613_v3, %v617_v4  ;;  %v5719_v54 = vcombine.high %v573_v49, %v577_v50  ;;  %v5718_v0 = vcombine.low %v573_v49, %v577_v50  ;;  %v749_v4 = vld [vmem:[%s7373_s1 + $0x798] sm:$0xff] }
 0x198   : > { %v7712_v5 = vpop.f32.mrf.mxu1  ;;  %2855 = vmatpush1.bf16.msra.mxu0 %v5838_v58  ;;  %2886 = vmatprep.mubr.bf16.mxu0 %v7440_v61  ;;  %v761_v58 = vld [vmem:[%s7373_s1 + $0x7f8] sm:$0xff] }
 0x199   : > { %2830 = vmatpush2.bf16.msra.mxu1 %v5774_v59  ;;  %v7715_v7 = vpop.f32.mrf.mxu0  ;;  %2856 = vmatprep.subr.bf16.mxu0 %v5831_v62  ;;  %v821_v59 = vld [vmem:[%s7373_s1 + $0x9d8] sm:$0xff]  ;;  %v5903_v1 = vcombine.high %v757_v57, %v761_v58 }
 0x19a   : > { %v7717_v10 = vpop.f32.mrf.mxu1  ;;  %2831 = vmatprep.subr.bf16.mxu1 %v5767_v63  ;;  %v825_v62 = vld [vmem:[%s7373_s1 + $0x9f8] sm:$0xff]  ;;  %v5782_v63 = vcombine.low %v637_v47, %v641_v48 }
 0x19b   : > { %v2482_v13 = vpop.f32.mrf.mxu0  ;;  %v5967_v3 = vcombine.high %v821_v59, %v825_v62  ;;  %v5966_v11 = vcombine.low %v821_v59, %v825_v62  ;;  %v793_v39 = vld [vmem:[%s7373_s1 + $0x8f8] sm:$0xff] }
 0x19c   : > { %v2523_v61 = vpop.f32.mrf.mxu1  ;;  %2857 = vmatpush1.bf16.msra.mxu0 %v5830_v6  ;;  %v753_v6 = vld [vmem:[%s7373_s1 + $0x7b8] sm:$0xff]  ;;  %v2520_v13 = vadd.f32 %v7712_v5, %v7707_v2 }
 0x19d   : > { %2832 = vmatpush2.bf16.msra.mxu1 %v5766_v8  ;;  %v2483_v16 = vpop.f32.mrf.mxu0  ;;  %2858 = vmatprep.subr.bf16.mxu0 %v5823_v9  ;;  %v813_v8 = vld [vmem:[%s7373_s1 + $0x998] sm:$0xff]  ;;  %v5895_v12 = vcombine.high %v749_v4, %v753_v6  ;;  %v5894_v23 = vcombine.low %v749_v4, %v753_v6 }
 0x19e   : > { %v2524_v20 = vpop.f32.mrf.mxu1  ;;  %2833 = vmatprep.subr.bf16.mxu1 %v5759_v25  ;;  %v817_v9 = vld [vmem:[%s7373_s1 + $0x9b8] sm:$0xff]  ;;  %v5902_v25 = vcombine.low %v757_v57, %v761_v58 }
 0x19f   : > { %v5959_v14 = vcombine.high %v813_v8, %v817_v9  ;;  %v745_v61 = vld [vmem:[%s7373_s1 + $0x778] sm:$0xff]  ;;  %v2522_v20 = vadd.f32 %v7717_v10, %v7715_v7  ;;  %v5958_v24 = vcombine.low %v813_v8, %v817_v9 }
 0x1a0   : > { %2859 = vmatpush1.bf16.msra.mxu0 %v5822_v60  ;;  %v495_v60 = vld [vmem:[#allocation2 + $0x30] sm:$0xff]  ;;  %v496_v2 = vld [vmem:[#allocation2] sm:$0xff]  ;;  %v5887_v26 = vcombine.high %v741_v15, %v745_v61  ;;  %v5886_v31 = vcombine.low %v741_v15, %v745_v61 }
 0x1a1   : > { %2834 = vmatpush2.bf16.msra.mxu1 %v5758_v17  ;;  %2860 = vmatprep.subr.bf16.mxu0 %v5815_v19  ;;  %v805_v17 = vld [vmem:[%s7373_s1 + $0x958] sm:$0xff] }
 0x1a2   : > { %2835 = vmatprep.subr.bf16.mxu1 %v5751_v22  ;;  %v809_v19 = vld [vmem:[%s7373_s1 + $0x978] sm:$0xff] }
 0x1a3   : > { %v737_v7 = vld [vmem:[%s7373_s1 + $0x738] sm:$0xff]  ;;  %v5950_v33 = vcombine.low %v805_v17, %v809_v19 }
 0x1a4   : > { %2861 = vmatpush1.bf16.msra.mxu0 %v5814_v27  ;;  %v797_v10 = vld [vmem:[%s7373_s1 + $0x918] sm:$0xff] }
 0x1a5   : > { %2836 = vmatpush2.bf16.msra.mxu1 %v5750_v28  ;;  %2862 = vmatprep.subr.bf16.mxu0 %v5807_v56  ;;  %v5951_v28 = vcombine.high %v805_v17, %v809_v19  ;;  %v733_v56 = vld [vmem:[%s7373_s1 + $0x718] sm:$0xff] }
 0x1a6   : > { %2837 = vmatprep.subr.bf16.mxu1 %v5743_v29  ;;  %v801_v29 = vld [vmem:[%s7373_s1 + $0x938] sm:$0xff]  ;;  %v5878_v40 = vcombine.low %v733_v56, %v737_v7 }
 0x1a7   : > { %v5942_v41 = vcombine.low %v797_v10, %v801_v29  ;;  %v785_v47 = vld [vmem:[%s7373_s1 + $0x8b8] sm:$0xff] }
 0x1a8   : > { %2863 = vmatpush1.bf16.msra.mxu0 %v5806_v35  ;;  %v5879_v35 = vcombine.high %v733_v56, %v737_v7  ;;  %v777_v57 = vld [vmem:[%s7373_s1 + $0x878] sm:$0xff] }
 0x1a9   : > { %2838 = vmatpush2.bf16.msra.mxu1 %v5742_v36  ;;  %2864 = vmatprep.subr.bf16.mxu0 %v5799_v37  ;;  %v725_v36 = vld [vmem:[%s7373_s1 + $0x6d8] sm:$0xff] }
 0x1aa   : > { %2839 = vmatprep.subr.bf16.mxu1 %v5735_v38  ;;  %v729_v37 = vld [vmem:[%s7373_s1 + $0x6f8] sm:$0xff] }
 0x1ab   : > { %v789_v38 = vld [vmem:[%s7373_s1 + $0x8d8] sm:$0xff]  ;;  %v5871_v42 = vcombine.high %v725_v36, %v729_v37  ;;  %v5870_v48 = vcombine.low %v725_v36, %v729_v37  ;;  %v499_v36 = vld [vmem:[#allocation2 + $0x8] sm:$0xff] }
 0x1ac   : > { %2865 = vmatpush1.bf16.msra.mxu0 %v5798_v43  ;;  %v5935_v43 = vcombine.high %v789_v38, %v793_v39  ;;  %v5934_v49 = vcombine.low %v789_v38, %v793_v39  ;;  %v769_v4 = vld [vmem:[%s7373_s1 + $0x838] sm:$0xff] }
 0x1ad   : > { %2840 = vmatpush2.bf16.msra.mxu1 %v5734_v44  ;;  %2866 = vmatprep.subr.bf16.mxu0 %v5791_v45  ;;  %v717_v44 = vld [vmem:[%s7373_s1 + $0x698] sm:$0xff] }
 0x1ae   : > { %2841 = vmatprep.subr.bf16.mxu1 %v5727_v46  ;;  %v721_v45 = vld [vmem:[%s7373_s1 + $0x6b8] sm:$0xff] }
 0x1af   : > { %v781_v46 = vld [vmem:[%s7373_s1 + $0x898] sm:$0xff]  ;;  %v5863_v50 = vcombine.high %v717_v44, %v721_v45  ;;  %v5862_v58 = vcombine.low %v717_v44, %v721_v45 }
 0x1b0   : > { %2867 = vmatpush1.bf16.msra.mxu0 %v5790_v51  ;;  %v5927_v51 = vcombine.high %v781_v46, %v785_v47  ;;  %v5926_v59 = vcombine.low %v781_v46, %v785_v47 }
 0x1b1   : > { %2842 = vmatpush2.bf16.msra.mxu1 %v5726_v52  ;;  %2868 = vmatprep.subr.bf16.mxu0 %v5783_v53  ;;  %v709_v52 = vld [vmem:[%s7373_s1 + $0x658] sm:$0xff] }
 0x1b2   : > { %2843 = vmatprep.subr.bf16.mxu1 %v5719_v54  ;;  %v713_v53 = vld [vmem:[%s7373_s1 + $0x678] sm:$0xff] }
 0x1b3   : > { %v773_v54 = vld [vmem:[%s7373_s1 + $0x858] sm:$0xff]  ;;  %v5855_v62 = vcombine.high %v709_v52, %v713_v53  ;;  %v5854_v6 = vcombine.low %v709_v52, %v713_v53 }
 0x1b4   : > { %2869 = vmatpush1.bf16.msra.mxu0 %v5782_v63  ;;  %v5919_v63 = vcombine.high %v773_v54, %v777_v57  ;;  %v5918_v8 = vcombine.low %v773_v54, %v777_v57  ;;  %v501_v54 = vld [vmem:[#allocation2 + $0x28] sm:$0xff] }
 0x1b5   : > { %2844 = vmatpush2.bf16.msra.mxu1 %v5718_v0  ;;  %2870 = vmatprep.subr.bf16.mxu0 %v5903_v1  ;;  %v701_v0 = vld [vmem:[%s7373_s1 + $0x618] sm:$0xff] }
 0x1b6   : > { %2895 = vmatprep.subr.bf16.mxu1 %v5967_v3  ;;  %v705_v1 = vld [vmem:[%s7373_s1 + $0x638] sm:$0xff] }
 0x1b7   : > { %v2560_v16 = vpop.f32.mrf.mxu0  ;;  %v765_v3 = vld [vmem:[%s7373_s1 + $0x818] sm:$0xff]  ;;  %v5847_v9 = vcombine.high %v701_v0, %v705_v1 }
 0x1b8   : > { %v2561_v22 = vadd.f32 %v2560_v16, %v2520_v13  ;;  %2846 = vmatmul.mubr.bf16.vlgmr.msra.gmra.mxu1 %v7486_v18  ;;  %2871 = vmatpush2.bf16.msra.mxu0 %v5902_v25  ;;  %v5911_v25 = vcombine.high %v765_v3, %v769_v4 }
 0x1b9   : > { %2896 = vmatpush1.bf16.msra.mxu1 %v5966_v11  ;;  %v2562_v5 = vpop.f32.mrf.mxu0  ;;  %2872 = vmatprep.subr.bf16.mxu0 %v5895_v12  ;;  %v5846_v11 = vcombine.low %v701_v0, %v705_v1  ;;  %v5910_v12 = vcombine.low %v765_v3, %v769_v4 }
 0x1ba   : > { %v2936_v55 = vadd.f32 %v2561_v22, %v495_v60  ;;  %v2563_v27 = vadd.f32 %v2562_v5, %v2522_v20  ;;  %2897 = vmatprep.subr.bf16.mxu1 %v5959_v14  ;;  %2927 = vmatprep.mubr.bf16.mxu1 %v7177_v34  ;;  %v5943_v34 = vcombine.high %v797_v10, %v801_v29  ;;  %v6429_v14 = vld [vmem:[%s7395_s30 + $0x10] ss:$0 sps:$4 sm:$0xff]   ;;  %v497_v20 = vld [vmem:[#allocation2 + $0x18] sm:$0xff] }
 0x1bb   : > { %v2564_v18 = vpop.f32.mrf.mxu0 }
 0x1bc   : > { %2944 = vst [vmem:[#allocation2 + $0x30] sm:$0xff] %v2936_v55  ;;  %v2937_v30 = vadd.f32 %v2563_v27, %v496_v2  ;;  %2873 = vmatpush2.bf16.msra.mxu0 %v5894_v23 }
 0x1bd   : > { %2898 = vmatpush1.bf16.msra.mxu1 %v5958_v24  ;;  %v2565_v32 = vpop.f32.mrf.mxu0  ;;  %2874 = vmatprep.subr.bf16.mxu0 %v5887_v26  ;;  %v498_v24 = vld [vmem:[#allocation2 + $0x10] sm:$0xff] }
 0x1be   : > { %2945 = vst [vmem:[#allocation2] sm:$0xff] %v2937_v30  ;;  %2899 = vmatprep.subr.bf16.mxu1 %v5951_v28 }
 0x1c0   : > { %2875 = vmatpush2.bf16.msra.mxu0 %v5886_v31 }
 0x1c1   : > { %2900 = vmatpush1.bf16.msra.mxu1 %v5950_v33  ;;  %2876 = vmatprep.subr.bf16.mxu0 %v5879_v35 }
 0x1c2   : > { %2901 = vmatprep.subr.bf16.mxu1 %v5943_v34 }
 0x1c4   : > { %2877 = vmatpush2.bf16.msra.mxu0 %v5878_v40  ;;  %v500_v40 = vld [vmem:[#allocation2 + $0x20] sm:$0xff] }
 0x1c5   : > { %2902 = vmatpush1.bf16.msra.mxu1 %v5942_v41  ;;  %2878 = vmatprep.subr.bf16.mxu0 %v5871_v42 }
 0x1c6   : > { %2903 = vmatprep.subr.bf16.mxu1 %v5935_v43 }
 0x1c8   : > { %2879 = vmatpush2.bf16.msra.mxu0 %v5870_v48 }
 0x1c9   : > { %2904 = vmatpush1.bf16.msra.mxu1 %v5934_v49  ;;  %2880 = vmatprep.subr.bf16.mxu0 %v5863_v50 }
 0x1ca   : > { %2905 = vmatprep.subr.bf16.mxu1 %v5927_v51 }
 0x1cc   : > { %2881 = vmatpush2.bf16.msra.mxu0 %v5862_v58 }
 0x1cd   : > { %2906 = vmatpush1.bf16.msra.mxu1 %v5926_v59  ;;  %2882 = vmatprep.subr.bf16.mxu0 %v5855_v62 }
 0x1ce   : > { %2907 = vmatprep.subr.bf16.mxu1 %v5919_v63  ;;  %v502_v63 = vld [vmem:[#allocation2 + $0x38] sm:$0xff] }
 0x1d0   : > { %2883 = vmatpush2.bf16.msra.mxu0 %v5854_v6 }
 0x1d1   : > { %2908 = vmatpush1.bf16.msra.mxu1 %v5918_v8  ;;  %2884 = vmatprep.subr.bf16.mxu0 %v5847_v9 }
 0x1d2   : > { %2909 = vmatprep.subr.bf16.mxu1 %v5911_v25 }
 0x1d4   : > { %2885 = vmatpush2.bf16.msra.mxu0 %v5846_v11 }
 0x1d5   : > { %2910 = vmatpush1.bf16.msra.mxu1 %v5910_v12 }
 0x1d7   : > { %2887 = vmatmul.mubr.bf16.vlgmr.msra.gmra.mxu0 %v7492_v21 }
 0x1d8   : > { %v2601_v13 = vpop.f32.mrf.mxu1  ;;  %2928 = vmatmul.mubr.bf16.vlgmr.msra.gmra.mxu1 %v6429_v14 }
 0x1da   : > { %v2603_v15 = vpop.f32.mrf.mxu1 }
 0x1dc   : > { %v2605_v61 = vpop.f32.mrf.mxu1 }
 0x1de   : > { %v2606_v60 = vpop.f32.mrf.mxu1 }
 0x1f7   : > { %v2642_v16 = vpop.f32.mrf.mxu0 }
 0x1f8   : > { %v2643_v17 = vadd.f32 %v2642_v16, %v2601_v13  ;;  %v2683_v19 = vpop.f32.mrf.mxu1 }
 0x1f9   : > { %v2644_v22 = vpop.f32.mrf.mxu0 }
 0x1fa   : > { %v2684_v23 = vadd.f32 %v2683_v19, %v2643_v17  ;;  %v2645_v2 = vadd.f32 %v2644_v22, %v2603_v15  ;;  %v2685_v5 = vpop.f32.mrf.mxu1 }
 0x1fb   : > { %v2646_v26 = vpop.f32.mrf.mxu0 }
 0x1fc   : > { %v2938_v55 = vadd.f32 %v2684_v23, %v497_v20  ;;  %v2686_v27 = vadd.f32 %v2685_v5, %v2645_v2  ;;  %v2687_v28 = vpop.f32.mrf.mxu1 }
 0x1fd   : > { %v2647_v21 = vpop.f32.mrf.mxu0 }
 0x1fe   : > { %2946 = vst [vmem:[#allocation2 + $0x18] sm:$0xff] %v2938_v55  ;;  %v2939_v56 = vadd.f32 %v2686_v27, %v498_v24  ;;  %v2688_v7 = vpop.f32.mrf.mxu1 }
 0x200   : > { %2947 = vst [vmem:[#allocation2 + $0x10] sm:$0xff] %v2939_v56 }
 0x237   : > { %v2724_v18 = vpop.f32.mrf.mxu0 }
 0x238   : > { %v2765_v10 = vpop.f32.mrf.mxu1 }
 0x239   : > { %v2726_v29 = vpop.f32.mrf.mxu0  ;;  %v2766_v34 = vadd.f32 %v2765_v10, %v2724_v18 }
 0x23a   : > { %v2767_v30 = vpop.f32.mrf.mxu1 }
 0x23b   : > { %v2728_v31 = vpop.f32.mrf.mxu0  ;;  %v2768_v38 = vadd.f32 %v2767_v30, %v2726_v29 }
 0x23c   : > { %v2769_v32 = vpop.f32.mrf.mxu1 }
 0x23d   : > { %v2729_v33 = vpop.f32.mrf.mxu0 }
 0x23e   : > { %v2770_v35 = vpop.f32.mrf.mxu1 }
 0x257   : > { %v2806_v37 = vpop.f32.mrf.mxu0 }
 0x258   : > { %v2807_v39 = vadd.f32 %v2806_v37, %v2766_v34 }
 0x259   : > { %v2808_v41 = vpop.f32.mrf.mxu0 }
 0x25a   : > { %v2940_v42 = vadd.f32 %v2807_v39, %v499_v36  ;;  %v2809_v43 = vadd.f32 %v2808_v41, %v2768_v38 }
 0x25b   : > { %v2810_v44 = vpop.f32.mrf.mxu0 }
 0x25c   : > { %2948 = vst [vmem:[#allocation2 + $0x8] sm:$0xff] %v2940_v42  ;;  %v2941_v45 = vadd.f32 %v2809_v43, %v500_v40 }
 0x25d   : > { %v2811_v46 = vpop.f32.mrf.mxu0 }
 0x25e   : > { %2949 = vst [vmem:[#allocation2 + $0x20] sm:$0xff] %v2941_v45 }
 0x278   : > { %v2847_v47 = vpop.f32.mrf.mxu1 }
 0x27a   : > { %v2849_v48 = vpop.f32.mrf.mxu1 }
 0x27c   : > { %v2851_v49 = vpop.f32.mrf.mxu1 }
 0x27e   : > { %v2852_v50 = vpop.f32.mrf.mxu1 }
 0x297   : > { %v2888_v51 = vpop.f32.mrf.mxu0 }
 0x298   : > { %v2889_v52 = vadd.f32 %v2888_v51, %v2847_v47  ;;  %v2929_v53 = vpop.f32.mrf.mxu1 }
 0x299   : > { %v2890_v57 = vpop.f32.mrf.mxu0 }
 0x29a   : > { %v2930_v58 = vadd.f32 %v2929_v53, %v2889_v52  ;;  %v2891_v59 = vadd.f32 %v2890_v57, %v2849_v48  ;;  %v2931_v62 = vpop.f32.mrf.mxu1 }
 0x29b   : > { %v2892_v0 = vpop.f32.mrf.mxu0 }
 0x29c   : > { %v2942_v1 = vadd.f32 %v2930_v58, %v501_v54  ;;  %v2932_v3 = vadd.f32 %v2931_v62, %v2891_v59  ;;  %v2933_v4 = vpop.f32.mrf.mxu1  ;;  %2955 = sbr.rel (%p5968_p8) target bundleno = 1636 (0x664), region = 92 }
 0x29d   : > { %v2893_v6 = vpop.f32.mrf.mxu0 }
 0x29e   : > { %2950 = vst [vmem:[#allocation2 + $0x28] sm:$0xff] %v2942_v1  ;;  %v2943_v8 = vadd.f32 %v2932_v3, %v502_v63  ;;  %v2934_v9 = vpop.f32.mrf.mxu1 }
 0x2a0   : > { %2951 = vst [vmem:[#allocation2 + $0x38] sm:$0xff] %v2943_v8 }
 0x2a1   : > { %v6431_v25 = vld [vmem:[#allocation8 + $0xe4] ss:$16 sps:$4 sm:$0xff]   ;;  %v6435_v12 = vld [vmem:[#allocation8 + $0xe0] ss:$16 sps:$4 sm:$0xff]   ;;  %v2966_v40 = vlaneseq  ;;  %v7787_v58 = vld [vmem:[#allocation6] sm:$0xff] }
 0x2a2   : > { %v6433_v11 = vld [vmem:[#allocation8 + $0x2e4] ss:$16 sps:$4 sm:$0xff]   ;;  %4604 = vmatprep.subr.bf16.mxu0 %v6431_v25  ;;  %v6436_v13 = vld [vmem:[#allocation8 + $0x2e0] ss:$16 sps:$4 sm:$0xff]  }
 0x2a3   : > { %4645 = vmatprep.subr.bf16.mxu1 %v6433_v11  ;;  %v6437_v14 = vld [vmem:[#allocation8 + $0xc4] ss:$16 sps:$4 sm:$0xff]   ;;  %4605 = vmatpush1.bf16.msra.mxu0 %v6435_v12  ;;  %v6441_v61 = vld [vmem:[#allocation8 + $0xc0] ss:$16 sps:$4 sm:$0xff]   ;;  %v7780_v45 = vshrl.u32 %v2966_v40, 7 }
 0x2a4   : > { %4646 = vmatpush1.bf16.msra.mxu1 %v6436_v13  ;;  %v6439_v15 = vld [vmem:[#allocation8 + $0x2c4] ss:$16 sps:$4 sm:$0xff]   ;;  %4606 = vmatprep.subr.bf16.mxu0 %v6437_v14  ;;  %v6442_v60 = vld [vmem:[#allocation8 + $0x2c0] ss:$16 sps:$4 sm:$0xff]  }
 0x2a5   : > { %4647 = vmatprep.subr.bf16.mxu1 %v6439_v15  ;;  %v6443_v16 = vld [vmem:[#allocation8 + $0xa4] ss:$16 sps:$4 sm:$0xff]   ;;  %v6447_v19 = vld [vmem:[#allocation8 + $0xa0] ss:$16 sps:$4 sm:$0xff]   ;;  %v7783_v50 = vsub.s32 1, %v7780_v45  ;;  %v2980_v51 = vsub.s32 3, %v7780_v45 }
 0x2a6   : > { %v6445_v17 = vld [vmem:[#allocation8 + $0x2a4] ss:$16 sps:$4 sm:$0xff]   ;;  %v6448_v20 = vld [vmem:[#allocation8 + $0x2a0] ss:$16 sps:$4 sm:$0xff]   ;;  %v2984_v54 = vsub.s32 4, %v7780_v45  ;;  %v7790_v62 = vsub.s32 0, %v7780_v45 }
 0x2a7   : > { %4607 = vmatpush1.bf16.msra.mxu0 %v6441_v61  ;;  %v6449_v22 = vld [vmem:[#allocation8 + $0x84] ss:$16 sps:$4 sm:$0xff]   ;;  %v6453_v2 = vld [vmem:[#allocation8 + $0x80] ss:$16 sps:$4 sm:$0xff]   ;;  %v7793_v63 = vsub.s32 2, %v7780_v45  ;;  %v2992_v0 = vsub.s32 6, %v7780_v45  ;;  %v2973_v3 = vrot.slane %v7787_v58, %v7783_v50  ;;  %v2981_v4 = vrot.slane %v7787_v58, %v2980_v51 }
 0x2a8   : > { %4648 = vmatpush1.bf16.msra.mxu1 %v6442_v60  ;;  %4608 = vmatprep.subr.bf16.mxu0 %v6443_v16  ;;  %v6451_v23 = vld [vmem:[#allocation8 + $0x284] ss:$16 sps:$4 sm:$0xff]   ;;  %v6454_v5 = vld [vmem:[#allocation8 + $0x280] ss:$16 sps:$4 sm:$0xff]   ;;  %v7802_v13 = vrot.slane %v7787_v58, %v2984_v54  ;;  %v2969_v15 = vrot.slane %v7787_v58, %v7790_v62 }
 0x2a9   : > { %4649 = vmatprep.subr.bf16.mxu1 %v6445_v17  ;;  %v6455_v24 = vld [vmem:[#allocation8 + $0x64] ss:$16 sps:$4 sm:$0xff]   ;;  %v6459_v55 = vld [vmem:[#allocation8 + $0x60] ss:$16 sps:$4 sm:$0xff]   ;;  %v2977_v61 = vrot.slane %v7787_v58, %v7793_v63  ;;  %v7809_v60 = vrot.slane %v7787_v58, %v2992_v0 }
 0x2aa   : > { %v6457_v26 = vld [vmem:[#allocation8 + $0x264] ss:$16 sps:$4 sm:$0xff]   ;;  %v6460_v27 = vld [vmem:[#allocation8 + $0x260] ss:$16 sps:$4 sm:$0xff]  }
 0x2ab   : > { %4609 = vmatpush1.bf16.msra.mxu0 %v6447_v19  ;;  %v6461_v28 = vld [vmem:[#allocation8 + $0x44] ss:$16 sps:$4 sm:$0xff]   ;;  %v6465_v56 = vld [vmem:[#allocation8 + $0x40] ss:$16 sps:$4 sm:$0xff]  }
 0x2ac   : > { %4650 = vmatpush1.bf16.msra.mxu1 %v6448_v20  ;;  %4610 = vmatprep.subr.bf16.mxu0 %v6449_v22  ;;  %v6463_v21 = vld [vmem:[#allocation8 + $0x244] ss:$16 sps:$4 sm:$0xff]   ;;  %v6466_v7 = vld [vmem:[#allocation8 + $0x240] ss:$16 sps:$4 sm:$0xff]  }
 0x2ad   : > { %4651 = vmatprep.subr.bf16.mxu1 %v6451_v23  ;;  %v6467_v18 = vld [vmem:[#allocation8 + $0x24] ss:$16 sps:$4 sm:$0xff]   ;;  %v6471_v29 = vld [vmem:[#allocation8 + $0x20] ss:$16 sps:$4 sm:$0xff]  }
 0x2ae   : > { %v6469_v10 = vld [vmem:[#allocation8 + $0x224] ss:$16 sps:$4 sm:$0xff]   ;;  %v6472_v30 = vld [vmem:[#allocation8 + $0x220] ss:$16 sps:$4 sm:$0xff]  }
 0x2af   : > { %4611 = vmatpush1.bf16.msra.mxu0 %v6453_v2  ;;  %v6473_v31 = vld [vmem:[#allocation8 + $0x4] ss:$16 sps:$4 sm:$0xff]   ;;  %v6477_v33 = vld [vmem:[#allocation8] ss:$16 sps:$4 sm:$0xff]  }
 0x2b0   : > { %4652 = vmatpush1.bf16.msra.mxu1 %v6454_v5  ;;  %4612 = vmatprep.subr.bf16.mxu0 %v6455_v24  ;;  %v6475_v32 = vld [vmem:[#allocation8 + $0x204] ss:$16 sps:$4 sm:$0xff]   ;;  %v6478_v35 = vld [vmem:[#allocation8 + $0x200] ss:$16 sps:$4 sm:$0xff]  }
 0x2b1   : > { %4653 = vmatprep.subr.bf16.mxu1 %v6457_v26  ;;  %v6479_v34 = vld [vmem:[#allocation8 + $0x1e4] ss:$16 sps:$4 sm:$0xff]   ;;  %v6483_v37 = vld [vmem:[#allocation8 + $0x1e0] ss:$16 sps:$4 sm:$0xff]  }
 0x2b2   : > { %v6481_v36 = vld [vmem:[#allocation8 + $0x3e4] ss:$16 sps:$4 sm:$0xff]   ;;  %v6484_v38 = vld [vmem:[#allocation8 + $0x3e0] ss:$16 sps:$4 sm:$0xff]  }
 0x2b3   : > { %4613 = vmatpush1.bf16.msra.mxu0 %v6459_v55  ;;  %v6485_v39 = vld [vmem:[#allocation8 + $0x1c4] ss:$16 sps:$4 sm:$0xff]   ;;  %v6489_v42 = vld [vmem:[#allocation8 + $0x1c0] ss:$16 sps:$4 sm:$0xff]  }
 0x2b4   : > { %4654 = vmatpush1.bf16.msra.mxu1 %v6460_v27  ;;  %4614 = vmatprep.subr.bf16.mxu0 %v6461_v28  ;;  %v6487_v41 = vld [vmem:[#allocation8 + $0x3c4] ss:$16 sps:$4 sm:$0xff]   ;;  %v6490_v43 = vld [vmem:[#allocation8 + $0x3c0] ss:$16 sps:$4 sm:$0xff]  }
 0x2b5   : > { %4655 = vmatprep.subr.bf16.mxu1 %v6463_v21  ;;  %v6491_v44 = vld [vmem:[#allocation8 + $0x1a4] ss:$16 sps:$4 sm:$0xff]   ;;  %v6495_v47 = vld [vmem:[#allocation8 + $0x1a0] ss:$16 sps:$4 sm:$0xff]  }
 0x2b6   : > { %v6493_v46 = vld [vmem:[#allocation8 + $0x3a4] ss:$16 sps:$4 sm:$0xff]   ;;  %v6496_v48 = vld [vmem:[#allocation8 + $0x3a0] ss:$16 sps:$4 sm:$0xff]  }
 0x2b7   : > { %4615 = vmatpush1.bf16.msra.mxu0 %v6465_v56  ;;  %v6497_v49 = vld [vmem:[#allocation8 + $0x184] ss:$16 sps:$4 sm:$0xff]   ;;  %v6501_v53 = vld [vmem:[#allocation8 + $0x180] ss:$16 sps:$4 sm:$0xff]  }
 0x2b8   : > { %4656 = vmatpush1.bf16.msra.mxu1 %v6466_v7  ;;  %4616 = vmatprep.subr.bf16.mxu0 %v6467_v18  ;;  %v6499_v52 = vld [vmem:[#allocation8 + $0x384] ss:$16 sps:$4 sm:$0xff]   ;;  %v6502_v1 = vld [vmem:[#allocation8 + $0x380] ss:$16 sps:$4 sm:$0xff]  }
 0x2b9   : > { %4657 = vmatprep.subr.bf16.mxu1 %v6469_v10  ;;  %v2957_v57 = vld [vmem:[#allocation2] sm:$0xff]  ;;  %v2959_v59 = vld [vmem:[#allocation2 + $0x10] sm:$0xff]  ;;  %v6507_v9 = vld [vmem:[#allocation8 + $0x160] ss:$16 sps:$4 sm:$0xff]  }
 0x2ba   : > { %v6503_v6 = vld [vmem:[#allocation8 + $0x164] ss:$16 sps:$4 sm:$0xff]   ;;  %v6508_v25 = vld [vmem:[#allocation8 + $0x360] ss:$16 sps:$4 sm:$0xff]   ;;  %v3007_v11 = vadd.f32 %v2973_v3, %v2957_v57  ;;  %v3009_v12 = vadd.f32 %v2981_v4, %v2959_v59 }
 0x2bb   : > { %4617 = vmatpush1.bf16.msra.mxu0 %v6471_v29  ;;  %v6505_v8 = vld [vmem:[#allocation8 + $0x364] ss:$16 sps:$4 sm:$0xff]   ;;  %v6513_v5 = vld [vmem:[#allocation8 + $0x140] ss:$16 sps:$4 sm:$0xff]  }
 0x2bc   : > { %4658 = vmatpush1.bf16.msra.mxu1 %v6472_v30  ;;  %4618 = vmatprep.subr.bf16.mxu0 %v6473_v31  ;;  %v6509_v14 = vld [vmem:[#allocation8 + $0x144] ss:$16 sps:$4 sm:$0xff]   ;;  %vm3015_vm0 = vcmp.gt.f32.partialorder %v3007_v11, 0.0  ;;  %v3023_v16 = vmul.f32 0.2, %v3007_v11  ;;  %vm3017_vm1 = vcmp.gt.f32.partialorder %v3009_v12, 0.0 }
 0x2bd   : > { %4659 = vmatprep.subr.bf16.mxu1 %v6475_v32  ;;  %v3025_v17 = vmul.f32 0.2, %v3009_v12  ;;  %v6511_v19 = vld [vmem:[#allocation8 + $0x344] ss:$16 sps:$4 sm:$0xff]   ;;  %v6514_v55 = vld [vmem:[#allocation8 + $0x340] ss:$16 sps:$4 sm:$0xff]  }
 0x2be   : > { %v2956_v20 = vld [vmem:[#allocation2 + $0x30] sm:$0xff]  ;;  %v2958_v22 = vld [vmem:[#allocation2 + $0x18] sm:$0xff]  ;;  %v3031_v23 = vsel %vm3015_vm0, %v3007_v11, %v3023_v16 }
 0x2bf   : > { %4619 = vmatpush1.bf16.msra.mxu0 %v6477_v33  ;;  %v3033_v2 = vsel %vm3017_vm1, %v3009_v12, %v3025_v17  ;;  %v7811_v24 = vpack.c.bf16 %v3031_v23, %v3031_v23  ;;  %v6515_v27 = vld [vmem:[#allocation8 + $0x124] ss:$16 sps:$4 sm:$0xff]   ;;  %v3006_v28 = vadd.f32 %v2969_v15, %v2956_v20  ;;  %v3008_v21 = vadd.f32 %v2977_v61, %v2958_v22  ;;  %v6519_v7 = vld [vmem:[#allocation8 + $0x120] ss:$16 sps:$4 sm:$0xff]  }
 0x2c0   : > { %4660 = vmatpush1.bf16.msra.mxu1 %v6478_v35  ;;  %4620 = vmatprep.subr.bf16.mxu0 %v6479_v34  ;;  %v7813_v26 = vpack.c.bf16 %v3033_v2, %v3033_v2  ;;  %v6517_v56 = vld [vmem:[#allocation8 + $0x324] ss:$16 sps:$4 sm:$0xff]   ;;  %v6520_v18 = vld [vmem:[#allocation8 + $0x320] ss:$16 sps:$4 sm:$0xff]  }
 0x2c1   : > { %4661 = vmatprep.subr.bf16.mxu1 %v6481_v36  ;;  %4636 = vmatprep.mubr.bf16.mxu0 %v7811_v24  ;;  %v6521_v10 = vld [vmem:[#allocation8 + $0x104] ss:$16 sps:$4 sm:$0xff]   ;;  %v3022_v29 = vmul.f32 0.2, %v3006_v28  ;;  %v3024_v30 = vmul.f32 0.2, %v3008_v21 }
 0x2c2   : > { %4677 = vmatprep.mubr.bf16.mxu1 %v7813_v26  ;;  %v6523_v31 = vld [vmem:[#allocation8 + $0x304] ss:$16 sps:$4 sm:$0xff]   ;;  %vm3014_vm2 = vcmp.gt.f32.partialorder %v3006_v28, 0.0  ;;  %vm3016_vm3 = vcmp.gt.f32.partialorder %v3008_v21, 0.0  ;;  %v6525_v32 = vld [vmem:[#allocation8 + $0x100] ss:$16 sps:$4 sm:$0xff]  }
 0x2c3   : > { %4621 = vmatpush2.bf16.msra.mxu0 %v6483_v37  ;;  %v6526_v33 = vld [vmem:[#allocation8 + $0x300] ss:$16 sps:$4 sm:$0xff]   ;;  %v3030_v35 = vsel %vm3014_vm2, %v3006_v28, %v3022_v29  ;;  %v3032_v34 = vsel %vm3016_vm3, %v3008_v21, %v3024_v30  ;;  %v6529_v36 = vld [vmem:[#allocation8 + $0x4e4] ss:$16 sps:$4 sm:$0xff]  }
 0x2c4   : > { %4662 = vmatpush2.bf16.msra.mxu1 %v6484_v38  ;;  %4622 = vmatprep.subr.bf16.mxu0 %v6485_v39  ;;  %v6532_v37 = vld [vmem:[#allocation8 + $0x6e4] ss:$16 sps:$4 sm:$0xff]   ;;  %v7817_v38 = vpack.c.bf16 %v3030_v35, %v3030_v35  ;;  %v7819_v39 = vpack.c.bf16 %v3032_v34, %v3032_v34  ;;  %v6527_v40 = vld [vmem:[#allocation8 + $0x4e0] ss:$16 sps:$4 sm:$0xff]  }
 0x2c5   : > { %4663 = vmatprep.subr.bf16.mxu1 %v6487_v41  ;;  %v6530_v41 = vld [vmem:[#allocation8 + $0x6e0] ss:$16 sps:$4 sm:$0xff]   ;;  %v6550_v54 = vld [vmem:[#allocation8 + $0x684] ss:$16 sps:$4 sm:$0xff]  }
 0x2c6   : > { %v6545_v57 = vld [vmem:[#allocation8 + $0x480] ss:$16 sps:$4 sm:$0xff]   ;;  %v6553_v0 = vld [vmem:[#allocation8 + $0x464] ss:$16 sps:$4 sm:$0xff]  }
 0x2c7   : > { %4623 = vmatpush2.bf16.msra.mxu0 %v6489_v42  ;;  %v6535_v42 = vld [vmem:[#allocation8 + $0x4c4] ss:$16 sps:$4 sm:$0xff]   ;;  %v6548_v59 = vld [vmem:[#allocation8 + $0x680] ss:$16 sps:$4 sm:$0xff]  }
 0x2c8   : > { %4664 = vmatpush2.bf16.msra.mxu1 %v6490_v43  ;;  %4624 = vmatprep.subr.bf16.mxu0 %v6491_v44  ;;  %v6538_v43 = vld [vmem:[#allocation8 + $0x6c4] ss:$16 sps:$4 sm:$0xff]   ;;  %v6533_v44 = vld [vmem:[#allocation8 + $0x4c0] ss:$16 sps:$4 sm:$0xff]  }
 0x2c9   : > { %4665 = vmatprep.subr.bf16.mxu1 %v6493_v46  ;;  %v6536_v46 = vld [vmem:[#allocation8 + $0x6c0] ss:$16 sps:$4 sm:$0xff]   ;;  %v6568_v15 = vld [vmem:[#allocation8 + $0x624] ss:$16 sps:$4 sm:$0xff]  }
 0x2ca   : > { %v6551_v3 = vld [vmem:[#allocation8 + $0x460] ss:$16 sps:$4 sm:$0xff]   ;;  %v6571_v20 = vld [vmem:[#allocation8 + $0x404] ss:$16 sps:$4 sm:$0xff]  }
 0x2cb   : > { %4625 = vmatpush2.bf16.msra.mxu0 %v6495_v47  ;;  %v6541_v47 = vld [vmem:[#allocation8 + $0x4a4] ss:$16 sps:$4 sm:$0xff]   ;;  %v6554_v4 = vld [vmem:[#allocation8 + $0x660] ss:$16 sps:$4 sm:$0xff]  }
 0x2cc   : > { %4666 = vmatpush2.bf16.msra.mxu1 %v6496_v48  ;;  %4626 = vmatprep.subr.bf16.mxu0 %v6497_v49  ;;  %v6544_v48 = vld [vmem:[#allocation8 + $0x6a4] ss:$16 sps:$4 sm:$0xff]   ;;  %v6539_v49 = vld [vmem:[#allocation8 + $0x4a0] ss:$16 sps:$4 sm:$0xff]  }
 0x2cd   : > { %4667 = vmatprep.subr.bf16.mxu1 %v6499_v52  ;;  %v6542_v52 = vld [vmem:[#allocation8 + $0x6a0] ss:$16 sps:$4 sm:$0xff]   ;;  %v6574_v22 = vld [vmem:[#allocation8 + $0x604] ss:$16 sps:$4 sm:$0xff]  }
 0x2ce   : > { %v6557_v11 = vld [vmem:[#allocation8 + $0x440] ss:$16 sps:$4 sm:$0xff]   ;;  %v2961_v23 = vld [vmem:[#allocation2 + $0x20] sm:$0xff] }
 0x2cf   : > { %4627 = vmatpush2.bf16.msra.mxu0 %v6501_v53  ;;  %v6547_v53 = vld [vmem:[#allocation8 + $0x484] ss:$16 sps:$4 sm:$0xff]   ;;  %v6560_v12 = vld [vmem:[#allocation8 + $0x640] ss:$16 sps:$4 sm:$0xff]  }
 0x2d0   : > { %4668 = vmatpush2.bf16.msra.mxu1 %v6502_v1  ;;  %4628 = vmatprep.subr.bf16.mxu0 %v6503_v6  ;;  %v6556_v1 = vld [vmem:[#allocation8 + $0x664] ss:$16 sps:$4 sm:$0xff]   ;;  %v6563_v17 = vld [vmem:[#allocation8 + $0x420] ss:$16 sps:$4 sm:$0xff]  }
 0x2d1   : > { %4669 = vmatprep.subr.bf16.mxu1 %v6505_v8  ;;  %v6559_v6 = vld [vmem:[#allocation8 + $0x444] ss:$16 sps:$4 sm:$0xff]   ;;  %v6572_v28 = vld [vmem:[#allocation8 + $0x600] ss:$16 sps:$4 sm:$0xff]  }
 0x2d2   : > { %v6562_v8 = vld [vmem:[#allocation8 + $0x644] ss:$16 sps:$4 sm:$0xff]   ;;  %v6575_v29 = vld [vmem:[#allocation8 + $0x5e0] ss:$16 sps:$4 sm:$0xff]  }
 0x2d3   : > { %4629 = vmatpush2.bf16.msra.mxu0 %v6507_v9  ;;  %v2988_v9 = vsub.s32 5, %v7780_v45  ;;  %v2963_v2 = vld [vmem:[#allocation2 + $0x38] sm:$0xff] }
 0x2d4   : > { %4670 = vmatpush2.bf16.msra.mxu1 %v6508_v25  ;;  %4630 = vmatprep.subr.bf16.mxu0 %v6509_v14  ;;  %v2996_v25 = vsub.s32 7, %v7780_v45  ;;  %v6565_v14 = vld [vmem:[#allocation8 + $0x424] ss:$16 sps:$4 sm:$0xff]   ;;  %v6581_v34 = vld [vmem:[#allocation8 + $0x5c0] ss:$16 sps:$4 sm:$0xff]  }
 0x2d5   : > { %4671 = vmatprep.subr.bf16.mxu1 %v6511_v19  ;;  %v2989_v61 = vrot.slane %v7787_v58, %v2988_v9  ;;  %v6566_v19 = vld [vmem:[#allocation8 + $0x620] ss:$16 sps:$4 sm:$0xff]   ;;  %v6586_v35 = vld [vmem:[#allocation8 + $0x7c4] ss:$16 sps:$4 sm:$0xff]  }
 0x2d6   : > { %v2997_v16 = vrot.slane %v7787_v58, %v2996_v25  ;;  %v6616_v9 = vld [vmem:[#allocation8 + $0x724] ss:$16 sps:$4 sm:$0xff]   ;;  %v6611_v25 = vld [vmem:[#allocation8 + $0x520] ss:$16 sps:$4 sm:$0xff]  }
 0x2d7   : > { %4631 = vmatpush2.bf16.msra.mxu0 %v6513_v5  ;;  %v3011_v5 = vadd.f32 %v2989_v61, %v2961_v23  ;;  %v6622_v61 = vld [vmem:[#allocation8 + $0x704] ss:$16 sps:$4 sm:$0xff]  }
 0x2d8   : > { %4672 = vmatpush2.bf16.msra.mxu1 %v6514_v55  ;;  %4632 = vmatprep.subr.bf16.mxu0 %v6515_v27  ;;  %v3013_v55 = vadd.f32 %v2997_v16, %v2963_v2  ;;  %v6569_v27 = vld [vmem:[#allocation8 + $0x400] ss:$16 sps:$4 sm:$0xff]   ;;  %v6623_v2 = vld [vmem:[#allocation8 + $0xe8] ss:$16 sps:$4 sm:$0xff]  }
 0x2d9   : > { %4673 = vmatprep.subr.bf16.mxu1 %v6517_v56  ;;  %vm3019_vm4 = vcmp.gt.f32.partialorder %v3011_v5, 0.0  ;;  %v3027_v21 = vmul.f32 0.2, %v3011_v5  ;;  %v6577_v56 = vld [vmem:[#allocation8 + $0x5e4] ss:$16 sps:$4 sm:$0xff]  }
 0x2da   : > { %vm3021_vm5 = vcmp.gt.f32.partialorder %v3013_v55, 0.0  ;;  %v3029_v58 = vmul.f32 0.2, %v3013_v55  ;;  %v6617_v16 = vld [vmem:[#allocation8 + $0x500] ss:$16 sps:$4 sm:$0xff]  }
 0x2db   : > { %4633 = vmatpush2.bf16.msra.mxu0 %v6519_v7  ;;  %v6580_v7 = vld [vmem:[#allocation8 + $0x7e4] ss:$16 sps:$4 sm:$0xff]  }
 0x2dc   : > { %4674 = vmatpush2.bf16.msra.mxu1 %v6520_v18  ;;  %4634 = vmatprep.subr.bf16.mxu0 %v6521_v10  ;;  %v3035_v18 = vsel %vm3019_vm4, %v3011_v5, %v3027_v21  ;;  %v3037_v10 = vsel %vm3021_vm5, %v3013_v55, %v3029_v58  ;;  %v6626_v5 = vld [vmem:[#allocation8 + $0x2e8] ss:$16 sps:$4 sm:$0xff]   ;;  %v6631_v55 = vld [vmem:[#allocation8 + $0xcc] ss:$16 sps:$4 sm:$0xff]  }
 0x2dd   : > { %4675 = vmatprep.subr.bf16.mxu1 %v6523_v31  ;;  %v7827_v30 = vpack.c.bf16 %v3035_v18, %v3035_v18  ;;  %v7829_v31 = vpack.c.bf16 %v3037_v10, %v3037_v10  ;;  %v6632_v21 = vld [vmem:[#allocation8 + $0x2c8] ss:$16 sps:$4 sm:$0xff]   ;;  %v6637_v58 = vld [vmem:[#allocation8 + $0xac] ss:$16 sps:$4 sm:$0xff]  }
 0x2de   : > { %v6638_v18 = vld [vmem:[#allocation8 + $0x2a8] ss:$16 sps:$4 sm:$0xff]   ;;  %v6643_v10 = vld [vmem:[#allocation8 + $0x8c] ss:$16 sps:$4 sm:$0xff]  }
 0x2df   : > { %4635 = vmatpush2.bf16.msra.mxu0 %v6525_v32  ;;  %v6578_v32 = vld [vmem:[#allocation8 + $0x7e0] ss:$16 sps:$4 sm:$0xff]  }
 0x2e0   : > { %4676 = vmatpush2.bf16.msra.mxu1 %v6526_v33  ;;  %4686 = vmatprep.subr.bf16.mxu0 %v6529_v36  ;;  %v6583_v33 = vld [vmem:[#allocation8 + $0x5c4] ss:$16 sps:$4 sm:$0xff]   ;;  %v6584_v36 = vld [vmem:[#allocation8 + $0x7c0] ss:$16 sps:$4 sm:$0xff]  }
 0x2e1   : > { %4727 = vmatprep.subr.bf16.mxu1 %v6532_v37  ;;  %v6589_v37 = vld [vmem:[#allocation8 + $0x5a4] ss:$16 sps:$4 sm:$0xff]  }
 0x2e2   : > { %4637 = vmatmul.mubr.bf16.vlgmr.msra.gmra.mxu0 %v7817_v38 }
 0x2e3   : > { %4678 = vmatmul.mubr.bf16.vlgmr.msra.gmra.mxu1 %v7819_v39  ;;  %4687 = vmatpush1.bf16.msra.mxu0 %v6527_v40  ;;  %v6592_v40 = vld [vmem:[#allocation8 + $0x7a4] ss:$16 sps:$4 sm:$0xff]  }
 0x2e4   : > { %4728 = vmatpush1.bf16.msra.mxu1 %v6530_v41  ;;  %4688 = vmatprep.subr.bf16.mxu0 %v6535_v42  ;;  %v6587_v41 = vld [vmem:[#allocation8 + $0x5a0] ss:$16 sps:$4 sm:$0xff]  }
 0x2e5   : > { %4729 = vmatprep.subr.bf16.mxu1 %v6538_v43  ;;  %4718 = vmatprep.mubr.bf16.mxu0 %v7827_v30  ;;  %v6590_v42 = vld [vmem:[#allocation8 + $0x7a0] ss:$16 sps:$4 sm:$0xff]   ;;  %v6595_v43 = vld [vmem:[#allocation8 + $0x584] ss:$16 sps:$4 sm:$0xff]  }
 0x2e6   : > { %4759 = vmatprep.mubr.bf16.mxu1 %v7829_v31 }
 0x2e7   : > { %4689 = vmatpush1.bf16.msra.mxu0 %v6533_v44  ;;  %v6598_v44 = vld [vmem:[#allocation8 + $0x784] ss:$16 sps:$4 sm:$0xff]  }
 0x2e8   : > { %4730 = vmatpush1.bf16.msra.mxu1 %v6536_v46  ;;  %4690 = vmatprep.subr.bf16.mxu0 %v6541_v47  ;;  %v6593_v46 = vld [vmem:[#allocation8 + $0x580] ss:$16 sps:$4 sm:$0xff]  }
 0x2e9   : > { %4731 = vmatprep.subr.bf16.mxu1 %v6544_v48  ;;  %v6596_v47 = vld [vmem:[#allocation8 + $0x780] ss:$16 sps:$4 sm:$0xff]   ;;  %v6601_v48 = vld [vmem:[#allocation8 + $0x564] ss:$16 sps:$4 sm:$0xff]  }
 0x2eb   : > { %4691 = vmatpush1.bf16.msra.mxu0 %v6539_v49  ;;  %v6604_v49 = vld [vmem:[#allocation8 + $0x764] ss:$16 sps:$4 sm:$0xff]  }
 0x2ec   : > { %4732 = vmatpush1.bf16.msra.mxu1 %v6542_v52  ;;  %4692 = vmatprep.subr.bf16.mxu0 %v6547_v53  ;;  %v6599_v52 = vld [vmem:[#allocation8 + $0x560] ss:$16 sps:$4 sm:$0xff]  }
 0x2ed   : > { %4733 = vmatprep.subr.bf16.mxu1 %v6550_v54  ;;  %v6602_v53 = vld [vmem:[#allocation8 + $0x760] ss:$16 sps:$4 sm:$0xff]   ;;  %v6607_v54 = vld [vmem:[#allocation8 + $0x544] ss:$16 sps:$4 sm:$0xff]  }
 0x2ef   : > { %4693 = vmatpush1.bf16.msra.mxu0 %v6545_v57  ;;  %v6610_v57 = vld [vmem:[#allocation8 + $0x744] ss:$16 sps:$4 sm:$0xff]  }
 0x2f0   : > { %4734 = vmatpush1.bf16.msra.mxu1 %v6548_v59  ;;  %4694 = vmatprep.subr.bf16.mxu0 %v6553_v0  ;;  %v2960_v59 = vld [vmem:[#allocation2 + $0x8] sm:$0xff] }
 0x2f1   : > { %4735 = vmatprep.subr.bf16.mxu1 %v6556_v1  ;;  %v2962_v0 = vld [vmem:[#allocation2 + $0x28] sm:$0xff] }
 0x2f2   : > { %v6605_v1 = vld [vmem:[#allocation8 + $0x540] ss:$16 sps:$4 sm:$0xff]  }
 0x2f3   : > { %4695 = vmatpush1.bf16.msra.mxu0 %v6551_v3  ;;  %v6608_v3 = vld [vmem:[#allocation8 + $0x740] ss:$16 sps:$4 sm:$0xff]  }
 0x2f4   : > { %4736 = vmatpush1.bf16.msra.mxu1 %v6554_v4  ;;  %4696 = vmatprep.subr.bf16.mxu0 %v6559_v6  ;;  %v3010_v4 = vadd.f32 %v7802_v13, %v2960_v59  ;;  %v3012_v6 = vadd.f32 %v7809_v60, %v2962_v0  ;;  %v6620_v13 = vld [vmem:[#allocation8 + $0x700] ss:$16 sps:$4 sm:$0xff]   ;;  %v6674_v59 = vld [vmem:[#allocation8 + $0x3e8] ss:$16 sps:$4 sm:$0xff]   ;;  %v6679_v0 = vld [vmem:[#allocation8 + $0x1cc] ss:$16 sps:$4 sm:$0xff]  }
 0x2f5   : > { %4737 = vmatprep.subr.bf16.mxu1 %v6562_v8  ;;  %v6613_v8 = vld [vmem:[#allocation8 + $0x524] ss:$16 sps:$4 sm:$0xff]  }
 0x2f6   : > { %vm3018_vm6 = vcmp.gt.f32.partialorder %v3010_v4, 0.0  ;;  %vm3020_vm7 = vcmp.gt.f32.partialorder %v3012_v6, 0.0 }
 0x2f7   : > { %4697 = vmatpush1.bf16.msra.mxu0 %v6557_v11  ;;  %v6614_v11 = vld [vmem:[#allocation8 + $0x720] ss:$16 sps:$4 sm:$0xff]  }
 0x2f8   : > { %4738 = vmatpush1.bf16.msra.mxu1 %v6560_v12  ;;  %4698 = vmatprep.subr.bf16.mxu0 %v6565_v14  ;;  %v6619_v12 = vld [vmem:[#allocation8 + $0x504] ss:$16 sps:$4 sm:$0xff]   ;;  %v3026_v14 = vmul.f32 0.2, %v3010_v4 }
 0x2f9   : > { %4739 = vmatprep.subr.bf16.mxu1 %v6568_v15  ;;  %v3028_v15 = vmul.f32 0.2, %v3012_v6 }
 0x2fa   : > { %v3034_v60 = vsel %vm3018_vm6, %v3010_v4, %v3026_v14  ;;  %v6680_v4 = vld [vmem:[#allocation8 + $0x3c8] ss:$16 sps:$4 sm:$0xff]  }
 0x2fb   : > { %4699 = vmatpush1.bf16.msra.mxu0 %v6563_v17  ;;  %v3036_v17 = vsel %vm3020_vm7, %v3012_v6, %v3028_v15  ;;  %v6685_v6 = vld [vmem:[#allocation8 + $0x1ac] ss:$16 sps:$4 sm:$0xff]   ;;  %v6689_v14 = vld [vmem:[#allocation8 + $0x188] ss:$16 sps:$4 sm:$0xff]  }
 0x2fc   : > { %4740 = vmatpush1.bf16.msra.mxu1 %v6566_v19  ;;  %4700 = vmatprep.subr.bf16.mxu0 %v6571_v20  ;;  %v6625_v19 = vld [vmem:[#allocation8 + $0xec] ss:$16 sps:$4 sm:$0xff]   ;;  %v7837_v23 = vpack.c.bf16 %v3036_v17, %v3036_v17  ;;  %v6692_v15 = vld [vmem:[#allocation8 + $0x388] ss:$16 sps:$4 sm:$0xff]  }
 0x2fd   : > { %4741 = vmatprep.subr.bf16.mxu1 %v6574_v22  ;;  %v6628_v20 = vld [vmem:[#allocation8 + $0x2ec] ss:$16 sps:$4 sm:$0xff]   ;;  %v7835_v22 = vpack.c.bf16 %v3034_v60, %v3034_v60  ;;  %v6698_v60 = vld [vmem:[#allocation8 + $0x368] ss:$16 sps:$4 sm:$0xff]  }
 0x2fe   : > { %v6703_v17 = vld [vmem:[#allocation8 + $0x14c] ss:$16 sps:$4 sm:$0xff]  }
 0x2ff   : > { %4701 = vmatpush1.bf16.msra.mxu0 %v6569_v27  ;;  %v6634_v27 = vld [vmem:[#allocation8 + $0x2cc] ss:$16 sps:$4 sm:$0xff]  }
 0x300   : > { %4742 = vmatpush1.bf16.msra.mxu1 %v6572_v28  ;;  %4702 = vmatprep.subr.bf16.mxu0 %v6577_v56  ;;  %v6629_v28 = vld [vmem:[#allocation8 + $0xc8] ss:$16 sps:$4 sm:$0xff]   ;;  %v6640_v56 = vld [vmem:[#allocation8 + $0x2ac] ss:$16 sps:$4 sm:$0xff]  }
 0x301   : > { %4743 = vmatprep.subr.bf16.mxu1 %v6580_v7  ;;  %v6635_v7 = vld [vmem:[#allocation8 + $0xa8] ss:$16 sps:$4 sm:$0xff]  }
 0x303   : > { %4703 = vmatpush2.bf16.msra.mxu0 %v6575_v29  ;;  %v6646_v29 = vld [vmem:[#allocation8 + $0x28c] ss:$16 sps:$4 sm:$0xff]  }
 0x304   : > { %4744 = vmatpush2.bf16.msra.mxu1 %v6578_v32  ;;  %4704 = vmatprep.subr.bf16.mxu0 %v6583_v33  ;;  %v6641_v32 = vld [vmem:[#allocation8 + $0x88] ss:$16 sps:$4 sm:$0xff]  }
 0x305   : > { %4745 = vmatprep.subr.bf16.mxu1 %v6586_v35  ;;  %v6644_v33 = vld [vmem:[#allocation8 + $0x288] ss:$16 sps:$4 sm:$0xff]   ;;  %v6649_v35 = vld [vmem:[#allocation8 + $0x6c] ss:$16 sps:$4 sm:$0xff]  }
 0x307   : > { %4705 = vmatpush2.bf16.msra.mxu0 %v6581_v34  ;;  %v6652_v34 = vld [vmem:[#allocation8 + $0x26c] ss:$16 sps:$4 sm:$0xff]  }
 0x308   : > { %4746 = vmatpush2.bf16.msra.mxu1 %v6584_v36  ;;  %4706 = vmatprep.subr.bf16.mxu0 %v6589_v37  ;;  %v6647_v36 = vld [vmem:[#allocation8 + $0x68] ss:$16 sps:$4 sm:$0xff]   ;;  %v6658_v37 = vld [vmem:[#allocation8 + $0x24c] ss:$16 sps:$4 sm:$0xff]  }
 0x309   : > { %4747 = vmatprep.subr.bf16.mxu1 %v6592_v40  ;;  %v6653_v40 = vld [vmem:[#allocation8 + $0x48] ss:$16 sps:$4 sm:$0xff]  }
 0x30b   : > { %4707 = vmatpush2.bf16.msra.mxu0 %v6587_v41  ;;  %v6656_v41 = vld [vmem:[#allocation8 + $0x248] ss:$16 sps:$4 sm:$0xff]  }
 0x30c   : > { %4748 = vmatpush2.bf16.msra.mxu1 %v6590_v42  ;;  %4708 = vmatprep.subr.bf16.mxu0 %v6595_v43  ;;  %v6661_v42 = vld [vmem:[#allocation8 + $0x2c] ss:$16 sps:$4 sm:$0xff]  }
 0x30d   : > { %4749 = vmatprep.subr.bf16.mxu1 %v6598_v44  ;;  %v6664_v43 = vld [vmem:[#allocation8 + $0x22c] ss:$16 sps:$4 sm:$0xff]   ;;  %v6659_v44 = vld [vmem:[#allocation8 + $0x28] ss:$16 sps:$4 sm:$0xff]  }
 0x30f   : > { %4709 = vmatpush2.bf16.msra.mxu0 %v6593_v46  ;;  %v6662_v46 = vld [vmem:[#allocation8 + $0x228] ss:$16 sps:$4 sm:$0xff]  }
 0x310   : > { %4750 = vmatpush2.bf16.msra.mxu1 %v6596_v47  ;;  %4710 = vmatprep.subr.bf16.mxu0 %v6601_v48  ;;  %v6667_v47 = vld [vmem:[#allocation8 + $0xc] ss:$16 sps:$4 sm:$0xff]  }
 0x311   : > { %4751 = vmatprep.subr.bf16.mxu1 %v6604_v49  ;;  %v6670_v48 = vld [vmem:[#allocation8 + $0x20c] ss:$16 sps:$4 sm:$0xff]   ;;  %v6665_v49 = vld [vmem:[#allocation8 + $0x8] ss:$16 sps:$4 sm:$0xff]  }
 0x313   : > { %4711 = vmatpush2.bf16.msra.mxu0 %v6599_v52  ;;  %v6668_v52 = vld [vmem:[#allocation8 + $0x208] ss:$16 sps:$4 sm:$0xff]  }
 0x314   : > { %4752 = vmatpush2.bf16.msra.mxu1 %v6602_v53  ;;  %4712 = vmatprep.subr.bf16.mxu0 %v6607_v54  ;;  %v6673_v53 = vld [vmem:[#allocation8 + $0x1ec] ss:$16 sps:$4 sm:$0xff]  }
 0x315   : > { %4753 = vmatprep.subr.bf16.mxu1 %v6610_v57  ;;  %v6676_v54 = vld [vmem:[#allocation8 + $0x3ec] ss:$16 sps:$4 sm:$0xff]   ;;  %v6671_v57 = vld [vmem:[#allocation8 + $0x1e8] ss:$16 sps:$4 sm:$0xff]  }
 0x317   : > { %4713 = vmatpush2.bf16.msra.mxu0 %v6605_v1  ;;  %v6682_v1 = vld [vmem:[#allocation8 + $0x3cc] ss:$16 sps:$4 sm:$0xff]  }
 0x318   : > { %4754 = vmatpush2.bf16.msra.mxu1 %v6608_v3  ;;  %4714 = vmatprep.subr.bf16.mxu0 %v6613_v8  ;;  %v6677_v3 = vld [vmem:[#allocation8 + $0x1c8] ss:$16 sps:$4 sm:$0xff]   ;;  %v6688_v8 = vld [vmem:[#allocation8 + $0x3ac] ss:$16 sps:$4 sm:$0xff]  }
 0x319   : > { %4755 = vmatprep.subr.bf16.mxu1 %v6616_v9  ;;  %v6683_v9 = vld [vmem:[#allocation8 + $0x1a8] ss:$16 sps:$4 sm:$0xff]  }
 0x31b   : > { %4715 = vmatpush2.bf16.msra.mxu0 %v6611_v25  ;;  %v6686_v25 = vld [vmem:[#allocation8 + $0x3a8] ss:$16 sps:$4 sm:$0xff]  }
 0x31c   : > { %4756 = vmatpush2.bf16.msra.mxu1 %v6614_v11  ;;  %4716 = vmatprep.subr.bf16.mxu0 %v6619_v12  ;;  %v6691_v11 = vld [vmem:[#allocation8 + $0x18c] ss:$16 sps:$4 sm:$0xff]  }
 0x31d   : > { %4757 = vmatprep.subr.bf16.mxu1 %v6622_v61  ;;  %v6694_v12 = vld [vmem:[#allocation8 + $0x38c] ss:$16 sps:$4 sm:$0xff]  }
 0x31e   : > { %v6697_v61 = vld [vmem:[#allocation8 + $0x16c] ss:$16 sps:$4 sm:$0xff]  }
 0x31f   : > { %4717 = vmatpush2.bf16.msra.mxu0 %v6617_v16  ;;  %v6700_v16 = vld [vmem:[#allocation8 + $0x36c] ss:$16 sps:$4 sm:$0xff]  }
 0x320   : > { %4758 = vmatpush2.bf16.msra.mxu1 %v6620_v13  ;;  %4768 = vmatprep.subr.bf16.mxu0 %v6625_v19  ;;  %v6695_v13 = vld [vmem:[#allocation8 + $0x168] ss:$16 sps:$4 sm:$0xff]   ;;  %v6706_v19 = vld [vmem:[#allocation8 + $0x34c] ss:$16 sps:$4 sm:$0xff]  }
 0x321   : > { %4809 = vmatprep.subr.bf16.mxu1 %v6628_v20  ;;  %v6701_v20 = vld [vmem:[#allocation8 + $0x148] ss:$16 sps:$4 sm:$0xff]  }
 0x322   : > { %4719 = vmatmul.mubr.bf16.vlgmr.msra.gmra.mxu0 %v7835_v22 }
 0x323   : > { %4760 = vmatmul.mubr.bf16.vlgmr.msra.gmra.mxu1 %v7837_v23  ;;  %4769 = vmatpush1.bf16.msra.mxu0 %v6623_v2  ;;  %v6704_v2 = vld [vmem:[#allocation8 + $0x348] ss:$16 sps:$4 sm:$0xff]  }
 0x324   : > { %4810 = vmatpush1.bf16.msra.mxu1 %v6626_v5  ;;  %4770 = vmatprep.subr.bf16.mxu0 %v6631_v55  ;;  %v6709_v5 = vld [vmem:[#allocation8 + $0x12c] ss:$16 sps:$4 sm:$0xff]  }
 0x325   : > { %4811 = vmatprep.subr.bf16.mxu1 %v6634_v27  ;;  %4800 = vmatprep.mubr.bf16.mxu0 %v7811_v24  ;;  %v6650_v24 = vld [vmem:[#allocation8 + $0x268] ss:$16 sps:$4 sm:$0xff]   ;;  %v6712_v55 = vld [vmem:[#allocation8 + $0x32c] ss:$16 sps:$4 sm:$0xff]  }
 0x326   : > { %4841 = vmatprep.mubr.bf16.mxu1 %v7813_v26  ;;  %v6655_v26 = vld [vmem:[#allocation8 + $0x4c] ss:$16 sps:$4 sm:$0xff]   ;;  %v6707_v27 = vld [vmem:[#allocation8 + $0x128] ss:$16 sps:$4 sm:$0xff]  }
 0x327   : > { %4771 = vmatpush1.bf16.msra.mxu0 %v6629_v28  ;;  %v6710_v28 = vld [vmem:[#allocation8 + $0x328] ss:$16 sps:$4 sm:$0xff]  }
 0x328   : > { %4812 = vmatpush1.bf16.msra.mxu1 %v6632_v21  ;;  %4772 = vmatprep.subr.bf16.mxu0 %v6637_v58  ;;  %v6715_v21 = vld [vmem:[#allocation8 + $0x10c] ss:$16 sps:$4 sm:$0xff]  }
 0x329   : > { %4813 = vmatprep.subr.bf16.mxu1 %v6640_v56  ;;  %v6718_v58 = vld [vmem:[#allocation8 + $0x30c] ss:$16 sps:$4 sm:$0xff]   ;;  %v6713_v56 = vld [vmem:[#allocation8 + $0x108] ss:$16 sps:$4 sm:$0xff]  }
 0x32b   : > { %4773 = vmatpush1.bf16.msra.mxu0 %v6635_v7  ;;  %v6716_v7 = vld [vmem:[#allocation8 + $0x308] ss:$16 sps:$4 sm:$0xff]  }
 0x32c   : > { %4814 = vmatpush1.bf16.msra.mxu1 %v6638_v18  ;;  %4774 = vmatprep.subr.bf16.mxu0 %v6643_v10  ;;  %v6721_v18 = vld [vmem:[#allocation8 + $0x4ec] ss:$16 sps:$4 sm:$0xff]  }
 0x32d   : > { %4815 = vmatprep.subr.bf16.mxu1 %v6646_v29  ;;  %v6724_v10 = vld [vmem:[#allocation8 + $0x6ec] ss:$16 sps:$4 sm:$0xff]   ;;  %v6719_v29 = vld [vmem:[#allocation8 + $0x4e8] ss:$16 sps:$4 sm:$0xff]  }
 0x32f   : > { %4775 = vmatpush1.bf16.msra.mxu0 %v6641_v32  ;;  %v6722_v32 = vld [vmem:[#allocation8 + $0x6e8] ss:$16 sps:$4 sm:$0xff]  }
 0x330   : > { %4816 = vmatpush1.bf16.msra.mxu1 %v6644_v33  ;;  %4776 = vmatprep.subr.bf16.mxu0 %v6649_v35  ;;  %v6727_v33 = vld [vmem:[#allocation8 + $0x4cc] ss:$16 sps:$4 sm:$0xff]  }
 0x331   : > { %4817 = vmatprep.subr.bf16.mxu1 %v6652_v34  ;;  %v6730_v35 = vld [vmem:[#allocation8 + $0x6cc] ss:$16 sps:$4 sm:$0xff]   ;;  %v6725_v34 = vld [vmem:[#allocation8 + $0x4c8] ss:$16 sps:$4 sm:$0xff]  }
 0x333   : > { %4777 = vmatpush1.bf16.msra.mxu0 %v6647_v36  ;;  %v6728_v36 = vld [vmem:[#allocation8 + $0x6c8] ss:$16 sps:$4 sm:$0xff]  }
 0x334   : > { %4818 = vmatpush1.bf16.msra.mxu1 %v6650_v24  ;;  %4778 = vmatprep.subr.bf16.mxu0 %v6655_v26  ;;  %v6733_v24 = vld [vmem:[#allocation8 + $0x4ac] ss:$16 sps:$4 sm:$0xff]  }
 0x335   : > { %4819 = vmatprep.subr.bf16.mxu1 %v6658_v37  ;;  %v6736_v26 = vld [vmem:[#allocation8 + $0x6ac] ss:$16 sps:$4 sm:$0xff]   ;;  %v6731_v37 = vld [vmem:[#allocation8 + $0x4a8] ss:$16 sps:$4 sm:$0xff]  }
 0x337   : > { %4779 = vmatpush1.bf16.msra.mxu0 %v6653_v40  ;;  %v6734_v40 = vld [vmem:[#allocation8 + $0x6a8] ss:$16 sps:$4 sm:$0xff]  }
 0x338   : > { %4820 = vmatpush1.bf16.msra.mxu1 %v6656_v41  ;;  %4780 = vmatprep.subr.bf16.mxu0 %v6661_v42  ;;  %v6739_v41 = vld [vmem:[#allocation8 + $0x48c] ss:$16 sps:$4 sm:$0xff]  }
 0x339   : > { %4821 = vmatprep.subr.bf16.mxu1 %v6664_v43  ;;  %v6742_v42 = vld [vmem:[#allocation8 + $0x68c] ss:$16 sps:$4 sm:$0xff]  }
 0x33a   : > { %v6745_v43 = vld [vmem:[#allocation8 + $0x46c] ss:$16 sps:$4 sm:$0xff]  }
 0x33b   : > { %4781 = vmatpush1.bf16.msra.mxu0 %v6659_v44  ;;  %v6748_v44 = vld [vmem:[#allocation8 + $0x66c] ss:$16 sps:$4 sm:$0xff]  }
 0x33c   : > { %4822 = vmatpush1.bf16.msra.mxu1 %v6662_v46  ;;  %4782 = vmatprep.subr.bf16.mxu0 %v6667_v47  ;;  %v6743_v46 = vld [vmem:[#allocation8 + $0x468] ss:$16 sps:$4 sm:$0xff]  }
 0x33d   : > { %4823 = vmatprep.subr.bf16.mxu1 %v6670_v48  ;;  %v6746_v47 = vld [vmem:[#allocation8 + $0x668] ss:$16 sps:$4 sm:$0xff]   ;;  %v6751_v48 = vld [vmem:[#allocation8 + $0x44c] ss:$16 sps:$4 sm:$0xff]  }
 0x33f   : > { %4783 = vmatpush1.bf16.msra.mxu0 %v6665_v49  ;;  %v6752_v49 = vld [vmem:[#allocation8 + $0x648] ss:$16 sps:$4 sm:$0xff]  }
 0x340   : > { %4824 = vmatpush1.bf16.msra.mxu1 %v6668_v52  ;;  %4784 = vmatprep.subr.bf16.mxu0 %v6673_v53  ;;  %v6757_v52 = vld [vmem:[#allocation8 + $0x42c] ss:$16 sps:$4 sm:$0xff]  }
 0x341   : > { %4825 = vmatprep.subr.bf16.mxu1 %v6676_v54  ;;  %v6760_v53 = vld [vmem:[#allocation8 + $0x62c] ss:$16 sps:$4 sm:$0xff]   ;;  %v6755_v54 = vld [vmem:[#allocation8 + $0x428] ss:$16 sps:$4 sm:$0xff]  }
 0x343   : > { %4785 = vmatpush2.bf16.msra.mxu0 %v6671_v57  ;;  %v6758_v57 = vld [vmem:[#allocation8 + $0x628] ss:$16 sps:$4 sm:$0xff]  }
 0x344   : > { %4826 = vmatpush2.bf16.msra.mxu1 %v6674_v59  ;;  %4786 = vmatprep.subr.bf16.mxu0 %v6679_v0  ;;  %v6763_v59 = vld [vmem:[#allocation8 + $0x40c] ss:$16 sps:$4 sm:$0xff]  }
 0x345   : > { %4827 = vmatprep.subr.bf16.mxu1 %v6682_v1  ;;  %v6766_v0 = vld [vmem:[#allocation8 + $0x60c] ss:$16 sps:$4 sm:$0xff]   ;;  %v6761_v1 = vld [vmem:[#allocation8 + $0x408] ss:$16 sps:$4 sm:$0xff]  }
 0x347   : > { %4787 = vmatpush2.bf16.msra.mxu0 %v6677_v3  ;;  %v6764_v3 = vld [vmem:[#allocation8 + $0x608] ss:$16 sps:$4 sm:$0xff]  }
 0x348   : > { %4828 = vmatpush2.bf16.msra.mxu1 %v6680_v4  ;;  %4788 = vmatprep.subr.bf16.mxu0 %v6685_v6  ;;  %v6769_v4 = vld [vmem:[#allocation8 + $0x5ec] ss:$16 sps:$4 sm:$0xff]  }
 0x349   : > { %4829 = vmatprep.subr.bf16.mxu1 %v6688_v8  ;;  %v6772_v6 = vld [vmem:[#allocation8 + $0x7ec] ss:$16 sps:$4 sm:$0xff]   ;;  %v6767_v8 = vld [vmem:[#allocation8 + $0x5e8] ss:$16 sps:$4 sm:$0xff]  }
 0x34b   : > { %4789 = vmatpush2.bf16.msra.mxu0 %v6683_v9  ;;  %v6770_v9 = vld [vmem:[#allocation8 + $0x7e8] ss:$16 sps:$4 sm:$0xff]  }
 0x34c   : > { %4830 = vmatpush2.bf16.msra.mxu1 %v6686_v25  ;;  %4790 = vmatprep.subr.bf16.mxu0 %v6691_v11  ;;  %v6775_v25 = vld [vmem:[#allocation8 + $0x5cc] ss:$16 sps:$4 sm:$0xff]  }
 0x34d   : > { %4831 = vmatprep.subr.bf16.mxu1 %v6694_v12  ;;  %v6778_v11 = vld [vmem:[#allocation8 + $0x7cc] ss:$16 sps:$4 sm:$0xff]   ;;  %v6773_v12 = vld [vmem:[#allocation8 + $0x5c8] ss:$16 sps:$4 sm:$0xff]  }
 0x34f   : > { %4791 = vmatpush2.bf16.msra.mxu0 %v6689_v14  ;;  %v6776_v14 = vld [vmem:[#allocation8 + $0x7c8] ss:$16 sps:$4 sm:$0xff]  }
 0x350   : > { %4832 = vmatpush2.bf16.msra.mxu1 %v6692_v15  ;;  %4792 = vmatprep.subr.bf16.mxu0 %v6697_v61  ;;  %v6781_v15 = vld [vmem:[#allocation8 + $0x5ac] ss:$16 sps:$4 sm:$0xff]  }
 0x351   : > { %4833 = vmatprep.subr.bf16.mxu1 %v6700_v16  ;;  %v6784_v61 = vld [vmem:[#allocation8 + $0x7ac] ss:$16 sps:$4 sm:$0xff]   ;;  %v6779_v16 = vld [vmem:[#allocation8 + $0x5a8] ss:$16 sps:$4 sm:$0xff]  }
 0x353   : > { %4793 = vmatpush2.bf16.msra.mxu0 %v6695_v13  ;;  %v6782_v13 = vld [vmem:[#allocation8 + $0x7a8] ss:$16 sps:$4 sm:$0xff]  }
 0x354   : > { %4834 = vmatpush2.bf16.msra.mxu1 %v6698_v60  ;;  %4794 = vmatprep.subr.bf16.mxu0 %v6703_v17  ;;  %v6787_v60 = vld [vmem:[#allocation8 + $0x58c] ss:$16 sps:$4 sm:$0xff]  }
 0x355   : > { %4835 = vmatprep.subr.bf16.mxu1 %v6706_v19  ;;  %v6790_v17 = vld [vmem:[#allocation8 + $0x78c] ss:$16 sps:$4 sm:$0xff]   ;;  %v6785_v19 = vld [vmem:[#allocation8 + $0x588] ss:$16 sps:$4 sm:$0xff]  }
 0x357   : > { %4795 = vmatpush2.bf16.msra.mxu0 %v6701_v20  ;;  %v6788_v20 = vld [vmem:[#allocation8 + $0x788] ss:$16 sps:$4 sm:$0xff]  }
 0x358   : > { %4836 = vmatpush2.bf16.msra.mxu1 %v6704_v2  ;;  %4796 = vmatprep.subr.bf16.mxu0 %v6709_v5  ;;  %v6793_v2 = vld [vmem:[#allocation8 + $0x56c] ss:$16 sps:$4 sm:$0xff]  }
 0x359   : > { %4837 = vmatprep.subr.bf16.mxu1 %v6712_v55  ;;  %v6796_v5 = vld [vmem:[#allocation8 + $0x76c] ss:$16 sps:$4 sm:$0xff]   ;;  %v6791_v55 = vld [vmem:[#allocation8 + $0x568] ss:$16 sps:$4 sm:$0xff]  }
 0x35b   : > { %4797 = vmatpush2.bf16.msra.mxu0 %v6707_v27  ;;  %v6794_v27 = vld [vmem:[#allocation8 + $0x768] ss:$16 sps:$4 sm:$0xff]  }
 0x35c   : > { %4838 = vmatpush2.bf16.msra.mxu1 %v6710_v28  ;;  %4798 = vmatprep.subr.bf16.mxu0 %v6715_v21  ;;  %v6799_v28 = vld [vmem:[#allocation8 + $0x54c] ss:$16 sps:$4 sm:$0xff]  }
 0x35d   : > { %4839 = vmatprep.subr.bf16.mxu1 %v6718_v58  ;;  %v6802_v21 = vld [vmem:[#allocation8 + $0x74c] ss:$16 sps:$4 sm:$0xff]   ;;  %v6797_v58 = vld [vmem:[#allocation8 + $0x548] ss:$16 sps:$4 sm:$0xff]  }
 0x35f   : > { %4799 = vmatpush2.bf16.msra.mxu0 %v6713_v56  ;;  %v6800_v56 = vld [vmem:[#allocation8 + $0x748] ss:$16 sps:$4 sm:$0xff]  }
 0x360   : > { %4840 = vmatpush2.bf16.msra.mxu1 %v6716_v7  ;;  %4850 = vmatprep.subr.bf16.mxu0 %v6721_v18  ;;  %v6805_v7 = vld [vmem:[#allocation8 + $0x52c] ss:$16 sps:$4 sm:$0xff]  }
 0x361   : > { %4891 = vmatprep.subr.bf16.mxu1 %v6724_v10  ;;  %v6808_v18 = vld [vmem:[#allocation8 + $0x72c] ss:$16 sps:$4 sm:$0xff]   ;;  %v6803_v10 = vld [vmem:[#allocation8 + $0x528] ss:$16 sps:$4 sm:$0xff]  }
 0x362   : > { %4801 = vmatmul.mubr.bf16.vlgmr.msra.gmra.mxu0 %v7817_v38  ;;  %v6737_v38 = vld [vmem:[#allocation8 + $0x488] ss:$16 sps:$4 sm:$0xff]  }
 0x363   : > { %4842 = vmatmul.mubr.bf16.vlgmr.msra.gmra.mxu1 %v7819_v39  ;;  %4851 = vmatpush1.bf16.msra.mxu0 %v6719_v29  ;;  %v6740_v39 = vld [vmem:[#allocation8 + $0x688] ss:$16 sps:$4 sm:$0xff]  }
 0x364   : > { %4892 = vmatpush1.bf16.msra.mxu1 %v6722_v32  ;;  %4852 = vmatprep.subr.bf16.mxu0 %v6727_v33  ;;  %v6806_v29 = vld [vmem:[#allocation8 + $0x728] ss:$16 sps:$4 sm:$0xff]   ;;  %v6811_v32 = vld [vmem:[#allocation8 + $0x50c] ss:$16 sps:$4 sm:$0xff]  }
 0x365   : > { %4893 = vmatprep.subr.bf16.mxu1 %v6730_v35  ;;  %4882 = vmatprep.mubr.bf16.mxu0 %v7827_v30  ;;  %v6754_v30 = vld [vmem:[#allocation8 + $0x64c] ss:$16 sps:$4 sm:$0xff]   ;;  %v6809_v35 = vld [vmem:[#allocation8 + $0x508] ss:$16 sps:$4 sm:$0xff]  }
 0x366   : > { %4923 = vmatprep.mubr.bf16.mxu1 %v7829_v31  ;;  %v6749_v31 = vld [vmem:[#allocation8 + $0x448] ss:$16 sps:$4 sm:$0xff]   ;;  %v6814_v33 = vld [vmem:[#allocation8 + $0x70c] ss:$16 sps:$4 sm:$0xff]  }
 0x367   : > { %4853 = vmatpush1.bf16.msra.mxu0 %v6725_v34  ;;  %v6812_v34 = vld [vmem:[#allocation8 + $0x708] ss:$16 sps:$4 sm:$0xff]  }
 0x368   : > { %4894 = vmatpush1.bf16.msra.mxu1 %v6728_v36  ;;  %4854 = vmatprep.subr.bf16.mxu0 %v6733_v24  ;;  %v6817_v36 = vld [vmem:[#allocation11 + $0x74] ss:$8 sps:$4 sm:$0xff]   ;;  %v6815_v24 = vld [vmem:[#allocation11 + $0x70] ss:$8 sps:$4 sm:$0xff]  }
 0x369   : > { %4895 = vmatprep.subr.bf16.mxu1 %v6736_v26  ;;  %v6820_v26 = vld [vmem:[#allocation11 + $0x64] ss:$8 sps:$4 sm:$0xff]  }
 0x36b   : > { %4855 = vmatpush1.bf16.msra.mxu0 %v6731_v37 }
 0x36c   : > { %4896 = vmatpush1.bf16.msra.mxu1 %v6734_v40  ;;  %4856 = vmatprep.subr.bf16.mxu0 %v6739_v41  ;;  %v6818_v41 = vld [vmem:[#allocation11 + $0x60] ss:$8 sps:$4 sm:$0xff]  }
 0x36d   : > { %4897 = vmatprep.subr.bf16.mxu1 %v6742_v42 }
 0x36f   : > { %4857 = vmatpush1.bf16.msra.mxu0 %v6737_v38 }
 0x370   : > { %4898 = vmatpush1.bf16.msra.mxu1 %v6740_v39  ;;  %4858 = vmatprep.subr.bf16.mxu0 %v6745_v43  ;;  %v6823_v39 = vld [vmem:[#allocation11 + $0x54] ss:$8 sps:$4 sm:$0xff]  }
 0x371   : > { %4899 = vmatprep.subr.bf16.mxu1 %v6748_v44 }
 0x373   : > { %4859 = vmatpush1.bf16.msra.mxu0 %v6743_v46  ;;  %v6821_v46 = vld [vmem:[#allocation11 + $0x50] ss:$8 sps:$4 sm:$0xff]  }
 0x374   : > { %4900 = vmatpush1.bf16.msra.mxu1 %v6746_v47  ;;  %4860 = vmatprep.subr.bf16.mxu0 %v6751_v48 }
 0x375   : > { %4901 = vmatprep.subr.bf16.mxu1 %v6754_v30  ;;  %v6826_v30 = vld [vmem:[#allocation11 + $0x44] ss:$8 sps:$4 sm:$0xff]  }
 0x377   : > { %4861 = vmatpush1.bf16.msra.mxu0 %v6749_v31  ;;  %v6863_v31 = vld [vmem:[#allocation11 + $0x170] ss:$8 sps:$4 sm:$0xff]  }
 0x378   : > { %4902 = vmatpush1.bf16.msra.mxu1 %v6752_v49  ;;  %4862 = vmatprep.subr.bf16.mxu0 %v6757_v52  ;;  %v6868_v49 = vld [vmem:[#allocation11 + $0x164] ss:$8 sps:$4 sm:$0xff]   ;;  %v6866_v52 = vld [vmem:[#allocation11 + $0x160] ss:$8 sps:$4 sm:$0xff]  }
 0x379   : > { %4903 = vmatprep.subr.bf16.mxu1 %v6760_v53  ;;  %v6829_v53 = vld [vmem:[#allocation11 + $0x34] ss:$8 sps:$4 sm:$0xff]  }
 0x37b   : > { %4863 = vmatpush1.bf16.msra.mxu0 %v6755_v54  ;;  %v6871_v54 = vld [vmem:[#allocation11 + $0x154] ss:$8 sps:$4 sm:$0xff]  }
 0x37c   : > { %4904 = vmatpush1.bf16.msra.mxu1 %v6758_v57  ;;  %4864 = vmatprep.subr.bf16.mxu0 %v6763_v59  ;;  %v6827_v57 = vld [vmem:[#allocation11 + $0x30] ss:$8 sps:$4 sm:$0xff]  }
 0x37d   : > { %4905 = vmatprep.subr.bf16.mxu1 %v6766_v0  ;;  %v6869_v59 = vld [vmem:[#allocation11 + $0x150] ss:$8 sps:$4 sm:$0xff]   ;;  %v6832_v0 = vld [vmem:[#allocation11 + $0x24] ss:$8 sps:$4 sm:$0xff]  }
 0x37f   : > { %4865 = vmatpush1.bf16.msra.mxu0 %v6761_v1  ;;  %v6874_v1 = vld [vmem:[#allocation11 + $0x144] ss:$8 sps:$4 sm:$0xff]  }
 0x380   : > { %4906 = vmatpush1.bf16.msra.mxu1 %v6764_v3  ;;  %4866 = vmatprep.subr.bf16.mxu0 %v6769_v4  ;;  %v6830_v3 = vld [vmem:[#allocation11 + $0x20] ss:$8 sps:$4 sm:$0xff]  }
 0x381   : > { %4907 = vmatprep.subr.bf16.mxu1 %v6772_v6  ;;  %v6872_v4 = vld [vmem:[#allocation11 + $0x140] ss:$8 sps:$4 sm:$0xff]   ;;  %v6835_v6 = vld [vmem:[#allocation11 + $0x14] ss:$8 sps:$4 sm:$0xff]  }
 0x383   : > { %4867 = vmatpush2.bf16.msra.mxu0 %v6767_v8  ;;  %v6877_v8 = vld [vmem:[#allocation11 + $0x134] ss:$8 sps:$4 sm:$0xff]  }
 0x384   : > { %4908 = vmatpush2.bf16.msra.mxu1 %v6770_v9  ;;  %4868 = vmatprep.subr.bf16.mxu0 %v6775_v25  ;;  %v6833_v9 = vld [vmem:[#allocation11 + $0x10] ss:$8 sps:$4 sm:$0xff]  }
 0x385   : > { %4909 = vmatprep.subr.bf16.mxu1 %v6778_v11  ;;  %v6875_v25 = vld [vmem:[#allocation11 + $0x130] ss:$8 sps:$4 sm:$0xff]   ;;  %v6838_v11 = vld [vmem:[#allocation11 + $0x4] ss:$8 sps:$4 sm:$0xff]  }
 0x387   : > { %4869 = vmatpush2.bf16.msra.mxu0 %v6773_v12  ;;  %v6880_v12 = vld [vmem:[#allocation11 + $0x124] ss:$8 sps:$4 sm:$0xff]  }
 0x388   : > { %4910 = vmatpush2.bf16.msra.mxu1 %v6776_v14  ;;  %4870 = vmatprep.subr.bf16.mxu0 %v6781_v15  ;;  %v6836_v14 = vld [vmem:[#allocation11] ss:$8 sps:$4 sm:$0xff]  }
 0x389   : > { %4911 = vmatprep.subr.bf16.mxu1 %v6784_v61  ;;  %v6878_v15 = vld [vmem:[#allocation11 + $0x120] ss:$8 sps:$4 sm:$0xff]   ;;  %v6841_v61 = vld [vmem:[#allocation11 + $0xf4] ss:$8 sps:$4 sm:$0xff]  }
 0x38b   : > { %4871 = vmatpush2.bf16.msra.mxu0 %v6779_v16  ;;  %v6883_v16 = vld [vmem:[#allocation11 + $0x114] ss:$8 sps:$4 sm:$0xff]  }
 0x38c   : > { %4912 = vmatpush2.bf16.msra.mxu1 %v6782_v13  ;;  %4872 = vmatprep.subr.bf16.mxu0 %v6787_v60  ;;  %v6839_v13 = vld [vmem:[#allocation11 + $0xf0] ss:$8 sps:$4 sm:$0xff]  }
 0x38d   : > { %4913 = vmatprep.subr.bf16.mxu1 %v6790_v17  ;;  %v6881_v60 = vld [vmem:[#allocation11 + $0x110] ss:$8 sps:$4 sm:$0xff]   ;;  %v6844_v17 = vld [vmem:[#allocation11 + $0xe4] ss:$8 sps:$4 sm:$0xff]  }
 0x38f   : > { %4873 = vmatpush2.bf16.msra.mxu0 %v6785_v19  ;;  %v6886_v19 = vld [vmem:[#allocation11 + $0x104] ss:$8 sps:$4 sm:$0xff]  }
 0x390   : > { %4914 = vmatpush2.bf16.msra.mxu1 %v6788_v20  ;;  %4874 = vmatprep.subr.bf16.mxu0 %v6793_v2  ;;  %v6842_v20 = vld [vmem:[#allocation11 + $0xe0] ss:$8 sps:$4 sm:$0xff]  }
 0x391   : > { %4915 = vmatprep.subr.bf16.mxu1 %v6796_v5  ;;  %v6884_v2 = vld [vmem:[#allocation11 + $0x100] ss:$8 sps:$4 sm:$0xff]   ;;  %v6847_v5 = vld [vmem:[#allocation11 + $0xd4] ss:$8 sps:$4 sm:$0xff]  }
 0x393   : > { %4875 = vmatpush2.bf16.msra.mxu0 %v6791_v55  ;;  %v6889_v55 = vld [vmem:[#allocation11 + $0x1f4] ss:$8 sps:$4 sm:$0xff]  }
 0x394   : > { %4916 = vmatpush2.bf16.msra.mxu1 %v6794_v27  ;;  %4876 = vmatprep.subr.bf16.mxu0 %v6799_v28  ;;  %v6845_v27 = vld [vmem:[#allocation11 + $0xd0] ss:$8 sps:$4 sm:$0xff]  }
 0x395   : > { %4917 = vmatprep.subr.bf16.mxu1 %v6802_v21  ;;  %v6887_v28 = vld [vmem:[#allocation11 + $0x1f0] ss:$8 sps:$4 sm:$0xff]   ;;  %v6850_v21 = vld [vmem:[#allocation11 + $0xc4] ss:$8 sps:$4 sm:$0xff]  }
 0x397   : > { %4877 = vmatpush2.bf16.msra.mxu0 %v6797_v58  ;;  %v6892_v58 = vld [vmem:[#allocation11 + $0x1e4] ss:$8 sps:$4 sm:$0xff]  }
 0x398   : > { %4918 = vmatpush2.bf16.msra.mxu1 %v6800_v56  ;;  %4878 = vmatprep.subr.bf16.mxu0 %v6805_v7  ;;  %v6848_v56 = vld [vmem:[#allocation11 + $0xc0] ss:$8 sps:$4 sm:$0xff]  }
 0x399   : > { %4919 = vmatprep.subr.bf16.mxu1 %v6808_v18  ;;  %v6890_v7 = vld [vmem:[#allocation11 + $0x1e0] ss:$8 sps:$4 sm:$0xff]   ;;  %v6853_v18 = vld [vmem:[#allocation11 + $0xb4] ss:$8 sps:$4 sm:$0xff]  }
 0x39b   : > { %4879 = vmatpush2.bf16.msra.mxu0 %v6803_v10  ;;  %v6895_v10 = vld [vmem:[#allocation11 + $0x1d4] ss:$8 sps:$4 sm:$0xff]  }
 0x39c   : > { %4920 = vmatpush2.bf16.msra.mxu1 %v6806_v29  ;;  %4880 = vmatprep.subr.bf16.mxu0 %v6811_v32  ;;  %v6851_v29 = vld [vmem:[#allocation11 + $0xb0] ss:$8 sps:$4 sm:$0xff]  }
 0x39d   : > { %4921 = vmatprep.subr.bf16.mxu1 %v6814_v33  ;;  %v6893_v32 = vld [vmem:[#allocation11 + $0x1d0] ss:$8 sps:$4 sm:$0xff]   ;;  %v6856_v33 = vld [vmem:[#allocation11 + $0xa4] ss:$8 sps:$4 sm:$0xff]  }
 0x39f   : > { %4881 = vmatpush2.bf16.msra.mxu0 %v6809_v35  ;;  %v6898_v35 = vld [vmem:[#allocation11 + $0x1c4] ss:$8 sps:$4 sm:$0xff]  }
 0x3a0   : > { %4922 = vmatpush2.bf16.msra.mxu1 %v6812_v34  ;;  %5344 = vmatprep.subr.bf16.mxu0 %v6817_v36  ;;  %v6854_v34 = vld [vmem:[#allocation11 + $0xa0] ss:$8 sps:$4 sm:$0xff]  }
 0x3a1   : > { %v6896_v36 = vld [vmem:[#allocation11 + $0x1c0] ss:$8 sps:$4 sm:$0xff]  }
 0x3a2   : > { %v7847_v37 = vpop.f32.mrf.mxu0  ;;  %4883 = vmatmul.mubr.bf16.vlgmr.msra.gmra.mxu0 %v7835_v22  ;;  %v6865_v22 = vld [vmem:[#allocation11 + $0x174] ss:$8 sps:$4 sm:$0xff]  }
 0x3a3   : > { %v7849_v40 = vpop.f32.mrf.mxu1  ;;  %4924 = vmatmul.mubr.bf16.vlgmr.msra.gmra.mxu1 %v7837_v23  ;;  %5345 = vmatpush1.bf16.msra.mxu0 %v6815_v24  ;;  %v6824_v23 = vld [vmem:[#allocation11 + $0x40] ss:$8 sps:$4 sm:$0xff]   ;;  %v6859_v24 = vld [vmem:[#allocation11 + $0x94] ss:$8 sps:$4 sm:$0xff]  }
 0x3a4   : > { %v7853_v42 = vpop.f32.mrf.mxu0  ;;  %5346 = vmatprep.subr.bf16.mxu0 %v6820_v26  ;;  %5385 = vmatprep.subr.bf16.mxu1 %v6865_v22  ;;  %v6901_v26 = vld [vmem:[#allocation11 + $0x1b4] ss:$8 sps:$4 sm:$0xff]  }
 0x3a5   : > { %v7855_v38 = vpop.f32.mrf.mxu1  ;;  %5386 = vmatpush1.bf16.msra.mxu1 %v6863_v31 }
 0x3a6   : > { %v4642_v43 = vpop.f32.mrf.mxu0  ;;  %5387 = vmatprep.subr.bf16.mxu1 %v6868_v49  ;;  %v6904_v49 = vld [vmem:[#allocation11 + $0x1a4] ss:$8 sps:$4 sm:$0xff]  }
 0x3a7   : > { %v4683_v44 = vpop.f32.mrf.mxu1  ;;  %5347 = vmatpush1.bf16.msra.mxu0 %v6818_v41  ;;  %v7857_v41 = vld [vmem:[#allocation9] sm:$0xf]  ;;  %v6899_v43 = vld [vmem:[#allocation11 + $0x1b0] ss:$8 sps:$4 sm:$0xff]  }
 0x3a8   : > { %v4643_v47 = vpop.f32.mrf.mxu0  ;;  %5348 = vmatprep.subr.bf16.mxu0 %v6823_v39  ;;  %v6857_v39 = vld [vmem:[#allocation11 + $0x90] ss:$8 sps:$4 sm:$0xff]   ;;  %v6862_v44 = vld [vmem:[#allocation11 + $0x84] ss:$8 sps:$4 sm:$0xff]  }
 0x3a9   : > { %v4684_v48 = vpop.f32.mrf.mxu1  ;;  %5388 = vmatpush1.bf16.msra.mxu1 %v6866_v52  ;;  %v3311_v47 = vrot.slane %v7857_v41, %v7783_v50 }
 0x3aa   : > { %5389 = vmatprep.subr.bf16.mxu1 %v6871_v54  ;;  %v6860_v48 = vld [vmem:[#allocation11 + $0x80] ss:$8 sps:$4 sm:$0xff]  }
 0x3ab   : > { %5349 = vmatpush1.bf16.msra.mxu0 %v6821_v46  ;;  %v3307_v46 = vrot.slane %v7857_v41, %v7790_v62  ;;  %v4641_v31 = vadd.f32 %v7853_v42, %v3311_v47  ;;  %v6905_v42 = vld [vmem:[#allocation11 + $0x190] ss:$8 sps:$4 sm:$0xff]  }
 0x3ac   : > { %5350 = vmatprep.subr.bf16.mxu0 %v6826_v30 }
 0x3ad   : > { %5390 = vmatpush1.bf16.msra.mxu1 %v6869_v59  ;;  %v4639_v30 = vadd.f32 %v7847_v37, %v3307_v46  ;;  %v4682_v54 = vadd.f32 %v7855_v38, %v4641_v31 }
 0x3ae   : > { %5391 = vmatprep.subr.bf16.mxu1 %v6874_v1 }
 0x3af   : > { %5351 = vmatpush1.bf16.msra.mxu0 %v6824_v23  ;;  %v4680_v22 = vadd.f32 %v7849_v40, %v4639_v30 }
 0x3b0   : > { %5352 = vmatprep.subr.bf16.mxu0 %v6829_v53  ;;  %v6902_v53 = vld [vmem:[#allocation11 + $0x1a0] ss:$8 sps:$4 sm:$0xff]  }
 0x3b1   : > { %5392 = vmatpush1.bf16.msra.mxu1 %v6872_v4  ;;  %v6907_v4 = vld [vmem:[#allocation11 + $0x194] ss:$8 sps:$4 sm:$0xff]  }
 0x3b2   : > { %5393 = vmatprep.subr.bf16.mxu1 %v6877_v8 }
 0x3b3   : > { %5353 = vmatpush1.bf16.msra.mxu0 %v6827_v57 }
 0x3b4   : > { %5354 = vmatprep.subr.bf16.mxu0 %v6832_v0 }
 0x3b5   : > { %5394 = vmatpush1.bf16.msra.mxu1 %v6875_v25 }
 0x3b6   : > { %5395 = vmatprep.subr.bf16.mxu1 %v6880_v12 }
 0x3b7   : > { %5355 = vmatpush1.bf16.msra.mxu0 %v6830_v3 }
 0x3b8   : > { %5356 = vmatprep.subr.bf16.mxu0 %v6835_v6 }
 0x3b9   : > { %5396 = vmatpush1.bf16.msra.mxu1 %v6878_v15 }
 0x3ba   : > { %5397 = vmatprep.subr.bf16.mxu1 %v6883_v16 }
 0x3bb   : > { %5357 = vmatpush1.bf16.msra.mxu0 %v6833_v9 }
 0x3bc   : > { %5358 = vmatprep.subr.bf16.mxu0 %v6838_v11  ;;  %v6910_v11 = vld [vmem:[#allocation11 + $0x184] ss:$8 sps:$4 sm:$0xff]  }
 0x3bd   : > { %5398 = vmatpush1.bf16.msra.mxu1 %v6881_v60 }
 0x3be   : > { %5399 = vmatprep.subr.bf16.mxu1 %v6886_v19 }
 0x3bf   : > { %5359 = vmatpush1.bf16.msra.mxu0 %v6836_v14  ;;  %v6908_v14 = vld [vmem:[#allocation11 + $0x180] ss:$8 sps:$4 sm:$0xff]  }
 0x3c0   : > { %5360 = vmatprep.subr.bf16.mxu0 %v6841_v61 }
 0x3c1   : > { %5400 = vmatpush1.bf16.msra.mxu1 %v6884_v2 }
 0x3c2   : > { %5401 = vmatprep.subr.bf16.mxu1 %v6889_v55 }
 0x3c3   : > { %5361 = vmatpush2.bf16.msra.mxu0 %v6839_v13 }
 0x3c4   : > { %5362 = vmatprep.subr.bf16.mxu0 %v6844_v17 }
 0x3c5   : > { %5402 = vmatpush2.bf16.msra.mxu1 %v6887_v28  ;;  %v3319_v28 = vrot.slane %v7857_v41, %v2980_v51 }
 0x3c6   : > { %5403 = vmatprep.subr.bf16.mxu1 %v6892_v58 }
 0x3c7   : > { %5363 = vmatpush2.bf16.msra.mxu0 %v6842_v20 }
 0x3c8   : > { %5364 = vmatprep.subr.bf16.mxu0 %v6847_v5 }
 0x3c9   : > { %5404 = vmatpush2.bf16.msra.mxu1 %v6890_v7 }
 0x3ca   : > { %5405 = vmatprep.subr.bf16.mxu1 %v6895_v10 }
 0x3cb   : > { %5365 = vmatpush2.bf16.msra.mxu0 %v6845_v27  ;;  %v3315_v27 = vrot.slane %v7857_v41, %v7793_v63 }
 0x3cc   : > { %5366 = vmatprep.subr.bf16.mxu0 %v6850_v21 }
 0x3cd   : > { %5406 = vmatpush2.bf16.msra.mxu1 %v6893_v32 }
 0x3ce   : > { %5407 = vmatprep.subr.bf16.mxu1 %v6898_v35 }
 0x3cf   : > { %5367 = vmatpush2.bf16.msra.mxu0 %v6848_v56 }
 0x3d0   : > { %5368 = vmatprep.subr.bf16.mxu0 %v6853_v18 }
 0x3d1   : > { %5408 = vmatpush2.bf16.msra.mxu1 %v6896_v36 }
 0x3d2   : > { %5409 = vmatprep.subr.bf16.mxu1 %v6901_v26 }
 0x3d3   : > { %5369 = vmatpush2.bf16.msra.mxu0 %v6851_v29 }
 0x3d4   : > { %5370 = vmatprep.subr.bf16.mxu0 %v6856_v33 }
 0x3d5   : > { %5410 = vmatpush2.bf16.msra.mxu1 %v6899_v43 }
 0x3d6   : > { %5411 = vmatprep.subr.bf16.mxu1 %v6904_v49  ;;  %v5012_v49 = vld [vmem:[#allocation12] sm:$0x3] }
 0x3d7   : > { %5371 = vmatpush2.bf16.msra.mxu0 %v6854_v34 }
 0x3d8   : > { %5372 = vmatprep.subr.bf16.mxu0 %v6859_v24 }
 0x3d9   : > { %5412 = vmatpush2.bf16.msra.mxu1 %v6902_v53 }
 0x3da   : > { %5413 = vmatprep.subr.bf16.mxu1 %v6907_v4 }
 0x3db   : > { %5373 = vmatpush2.bf16.msra.mxu0 %v6857_v39 }
 0x3dc   : > { %5374 = vmatprep.subr.bf16.mxu0 %v6862_v44 }
 0x3dd   : > { %5414 = vmatpush2.bf16.msra.mxu1 %v6905_v42 }
 0x3de   : > { %5415 = vmatprep.subr.bf16.mxu1 %v6910_v11 }
 0x3df   : > { %5375 = vmatpush2.bf16.msra.mxu0 %v6860_v48 }
 0x3e1   : > { %5416 = vmatpush2.bf16.msra.mxu1 %v6908_v14 }
 0x3e2   : > { %v4720_v23 = vpop.f32.mrf.mxu0 }
 0x3e3   : > { %v4761_v52 = vpop.f32.mrf.mxu1  ;;  %v4721_v57 = vadd.f32 %v4720_v23, %v4680_v22  ;;  %v5432_v23 = vld [vmem:[#allocation14] sm:$0x3] }
 0x3e4   : > { %v4722_v59 = vpop.f32.mrf.mxu0  ;;  %v5433_v53 = vunpack.c.l.bf16 %v5432_v23 }
 0x3e5   : > { %v4763_v0 = vpop.f32.mrf.mxu1  ;;  %v4762_v1 = vadd.f32 %v4761_v52, %v4721_v57  ;;  %v4723_v3 = vadd.f32 %v4722_v59, %v4682_v54  ;;  %v5017_v52 = vrot.slane %v5012_v49, %v7790_v62  ;;  %v5021_v54 = vrot.slane %v5012_v49, %v7783_v50 }
 0x3e6   : > { %v4724_v37 = vpop.f32.mrf.mxu0 }
 0x3e7   : > { %v4765_v6 = vpop.f32.mrf.mxu1  ;;  %vm4932_vm8 = vcmp.gt.f32.partialorder %v4762_v1, 0.0  ;;  %v4936_v8 = vmul.f32 0.2, %v4762_v1  ;;  %v4764_v40 = vadd.f32 %v4763_v0, %v4723_v3  ;;  %v5438_v0 = vrot.slane %v5433_v53, %v7790_v62 }
 0x3e8   : > { %v4725_v9 = vpop.f32.mrf.mxu0 }
 0x3e9   : > { %v4766_v25 = vpop.f32.mrf.mxu1  ;;  %vm4933_vm9 = vcmp.gt.f32.partialorder %v4764_v40, 0.0  ;;  %v4937_v38 = vmul.f32 0.2, %v4764_v40  ;;  %v4940_v12 = vsel %vm4932_vm8, %v4762_v1, %v4936_v8  ;;  %v5442_v1 = vrot.slane %v5433_v53, %v7793_v63 }
 0x3ea   : > { %v4944_v16 = vpack.c.bf16 %v4940_v12, %v4940_v12  ;;  %v7178_v63 = vmov 0  }
 0x3eb   : > { %v4941_v15 = vsel %vm4933_vm9, %v4764_v40, %v4937_v38  ;;  %v5448_v40 = vrot.slane %v5438_v0, %v7790_v62  ;;  %v5452_v9 = vrot.slane %v5442_v1, %v7790_v62  ;;  %6430 = vset.pattern.permute.xlu0 %v7178_v63 }
 0x3ec   : > { %v4945_v61 = vpack.c.bf16 %v4941_v15, %v4941_v15 }
 0x3ee   : > { %5376 = vmatprep.mubr.bf16.mxu0 %v4945_v61  ;;  %v6289_v61 = vld [vmem:[#allocation3] ss:$0 sm:$0xff] }
 0x3ef   : > { %5377 = vmatmul.mubr.bf16.vlgmr.msra.gmra.mxu0 %v4944_v16 }
 0x422   : > { %v4802_v13 = vpop.f32.mrf.mxu0 }
 0x423   : > { %v4843_v60 = vpop.f32.mrf.mxu1  ;;  %v4803_v21 = vadd.f32 %v4802_v13, %v3315_v27 }
 0x424   : > { %v4804_v17 = vpop.f32.mrf.mxu0 }
 0x425   : > { %v4845_v19 = vpop.f32.mrf.mxu1  ;;  %v4805_v58 = vadd.f32 %v4804_v17, %v3319_v28  ;;  %v4844_v56 = vadd.f32 %v4843_v60, %v4803_v21 }
 0x426   : > { %v4806_v20 = vpop.f32.mrf.mxu0 }
 0x427   : > { %v4847_v2 = vpop.f32.mrf.mxu1  ;;  %v4846_v10 = vadd.f32 %v4845_v19, %v4805_v58 }
 0x428   : > { %v4807_v5 = vpop.f32.mrf.mxu0 }
 0x429   : > { %v4848_v55 = vpop.f32.mrf.mxu1 }
 0x462   : > { %v4884_v7 = vpop.f32.mrf.mxu0 }
 0x463   : > { %v4925_v18 = vpop.f32.mrf.mxu1  ;;  %v4885_v29 = vadd.f32 %v4884_v7, %v4844_v56 }
 0x464   : > { %v4886_v32 = vpop.f32.mrf.mxu0 }
 0x465   : > { %v4927_v33 = vpop.f32.mrf.mxu1  ;;  %v4926_v35 = vadd.f32 %v4925_v18, %v4885_v29  ;;  %v4887_v34 = vadd.f32 %v4886_v32, %v4846_v10 }
 0x466   : > { %v4888_v36 = vpop.f32.mrf.mxu0 }
 0x467   : > { %v4929_v24 = vpop.f32.mrf.mxu1  ;;  %vm4934_vm10 = vcmp.gt.f32.partialorder %v4926_v35, 0.0  ;;  %v4938_v26 = vmul.f32 0.2, %v4926_v35  ;;  %v4928_v39 = vadd.f32 %v4927_v33, %v4887_v34 }
 0x468   : > { %v4889_v43 = vpop.f32.mrf.mxu0 }
 0x469   : > { %v4930_v45 = vpop.f32.mrf.mxu1  ;;  %vm4935_vm11 = vcmp.gt.f32.partialorder %v4928_v39, 0.0  ;;  %v4939_v51 = vmul.f32 0.2, %v4928_v39  ;;  %v4942_v41 = vsel %vm4934_vm10, %v4926_v35, %v4938_v26 }
 0x46a   : > { %v4946_v47 = vpack.c.bf16 %v4942_v41, %v4942_v41 }
 0x46b   : > { %v4943_v44 = vsel %vm4935_vm11, %v4928_v39, %v4939_v51 }
 0x46c   : > { %v4947_v46 = vpack.c.bf16 %v4943_v44, %v4943_v44 }
 0x46e   : > { %5417 = vmatprep.mubr.bf16.mxu1 %v4947_v46 }
 0x46f   : > { %5418 = vmatmul.mubr.bf16.vlgmr.msra.gmra.mxu1 %v4946_v47 }
 0x4af   : > { %v5378_v48 = vpop.f32.mrf.mxu0 }
 0x4b0   : > { %v5379_v57 = vadd.f32 %v5378_v48, %v5017_v52 }
 0x4b1   : > { %v5380_v30 = vpop.f32.mrf.mxu0 }
 0x4b2   : > { %v5381_v3 = vadd.f32 %v5380_v30, %v5021_v54 }
 0x4b3   : > { %v5382_v31 = vpop.f32.mrf.mxu0 }
 0x4b5   : > { %v5383_v22 = vpop.f32.mrf.mxu0 }
 0x52f   : > { %v5419_v59 = vpop.f32.mrf.mxu1 }
 0x530   : > { %v5420_v4 = vadd.f32 %v5419_v59, %v5379_v57 }
 0x531   : > { %v5421_v37 = vpop.f32.mrf.mxu1 }
 0x532   : > { %vm5426_vm12 = vcmp.gt.f32.partialorder %v5420_v4, 0.0  ;;  %v5428_v6 = vmul.f32 0.2, %v5420_v4  ;;  %v5422_v42 = vadd.f32 %v5421_v37, %v5381_v3 }
 0x533   : > { %v5423_v8 = vpop.f32.mrf.mxu1 }
 0x534   : > { %vm5427_vm13 = vcmp.gt.f32.partialorder %v5422_v42, 0.0  ;;  %v5429_v25 = vmul.f32 0.2, %v5422_v42  ;;  %v5430_v50 = vsel %vm5426_vm12, %v5420_v4, %v5428_v6 }
 0x535   : > { %v5424_v38 = vpop.f32.mrf.mxu1  ;;  %v5453_v12 = vmul.f32 %v5448_v40, %v5430_v50 }
 0x536   : > { %v5431_v11 = vsel %vm5427_vm13, %v5422_v42, %v5429_v25 }
 0x537   : > { %v5454_v14 = vmul.f32 %v5452_v9, %v5431_v11 }
 0x539   : > { %v5455_v15 = vadd.f32 %v5454_v14, %v5453_v12 }
 0x53b   : > { %5456 = vadd.xlane.f32.xlu0 %v5455_v15 }
 0x5c4   : > { %v5457_v16 = vpop.xlane.xlu0 %5456 }
 0x5c5   : > { %v5465_v13 = vadd.f32 %v6289_v61, %v5457_v16 }
 0x5c7   : > { %v6290_v60 = vmul.f32 -1.442695, %v5465_v13 }
 0x5c9   : > { %6911 = vpow2.f32 %v6290_v60 }
 0x5d6   : > { %v6912_v17 = vpop.eup %6911 }
 0x5d7   : > { %v5469_v19 = vadd.f32 1.0, %v6912_v17 }
 0x5d9   : > { %6913 = vrcp.f32 %v5469_v19 }
 0x5e6   : > { %v6914_v62 = vpop.eup %6913 }
 0x5e7   : > { %5474 = vperm.xlu0 %6430, %v6914_v62  }
 0x662   : > { %v5475_v20 = vpop.permute.xlu0 %5474 }
 0x663   : > { %5477 = vst [vmem:[%s7908_s9] sm:$0xff] %v5475_v20 }
 0x664 PF: > { %s27_s16 = sadd.s32 1, %s7161_s16   ;;  %s7923_s11 = smov %s7145_s12 }
 0x665   : > { %p24_p5 = scmp.ge.s32.totalorder %s27_s16, 7   ;;  %s7924_s12 = smov %s7149_s13 }
 0x666   : > { %s7925_s13 = smov %s7356_s21  ;;  %s7926_s14 = smov %s7157_s15 }
 0x667   : > { %s7927_s15 = smov %s7929_s26  ;;  %26 = sbr.rel (!%p24_p5) target bundleno = 10 (0xa), region = 131 }
 0x66c   :  { %5497 = vsyncpa [#allocation5], 1 }
 0x66d   :  { %5499 = vsyncpa [#allocation5 + $0x1], 1 }
 0x66e   :  { %5500 = vsyncpa [#allocation7], 1 }
 0x66f   :  { %5501 = vsyncpa [#allocation10], 1 }
 0x670   :  { %5502 = vsyncpa [#allocation13], 1 }

</bundles_post_ra>
